<compile_context>
chip_gen: v6e
topology: v6e:2x2x1
jax: 0.10.0
libtpu: 0.0.40
codegen_flags: <defaults>
</compile_context>

<pallas_src>
import jax
import jax.numpy as jnp
from jax.experimental import pallas as pl
from jax.experimental.pallas import tpu as pltpu


def _round_up(x, m):
    return ((x + m - 1) // m) * m


def gen_scale_kernel(x_ref, w1_ref, b1_ref, w2_ref, b2_ref, o_ref):
    xv = x_ref[...]
    w1v = w1_ref[...]
    if xv.dtype != w1v.dtype:
        # In-kernel cast (VPU) so x is streamed from HBM only once in its
        # native dtype; the bf16 MXU rate is what matters, not the cast.
        xv = xv.astype(w1v.dtype)

    # ---- Layer 1: (bm, D) @ (D, D) on the MXU, f32 accumulation ----
    h = jnp.dot(xv, w1v, preferred_element_type=jnp.float32)
    h = jnp.maximum(h + b1_ref[...].astype(jnp.float32), 0.0)     # bias + ReLU (VPU)

    # ---- Layer 2 (D -> 1): VPU multiply + XLU lane reduction ----
    z = jnp.sum(h * w2_ref[...].astype(jnp.float32), axis=-1)     # (bm,)
    z = z.reshape(1, -1) + b2_ref[0]                              # lane-dense (1, bm)

    # ---- Numerically-stable softplus on full vregs ----
    sp = jnp.maximum(z, 0.0) + jnp.log1p(jnp.exp(-jnp.abs(z)))
    o_ref[...] = sp.astype(o_ref.dtype)


def generator_scale(x, w1, b1, w2, b2, *, block_m=1024, compute_dtype=None,
                    min_grid_steps=2):
    """Forward pass of Generator_Scale.

    x  : (B, D) float32 (or bf16 -- streamed as-is, cast in-kernel if needed)
    w1 : (D, D) float32   (pre-transposed: h = x @ w1 + b1)
    b1 : (1, D) float32
    w2 : (1, D) float32   (second Linear weight as a row)
    b2 : (1,)   float32   (scalar bias, placed in SMEM)
    compute_dtype: optional (e.g. jnp.bfloat16) dtype for the layer-1 MXU
                   operands; accumulation / bias / softplus stay f32.
    Returns (B, 1) float32.
    """
    B, D = x.shape

    # Lane/sublane-friendly tile size, never larger than the (128-rounded) batch.
    block_m = max(128, _round_up(block_m, 128))
    B128 = _round_up(B, 128)
    block_m = min(block_m, B128)
    # Keep at least `min_grid_steps` grid steps when the batch allows it, so the
    # single "parallel" axis can shard across both v7x TensorCores and the
    # pipeline has step-to-step DMA/compute overlap. Cost on 1-TC chips is one
    # extra ~0.35 us step.
    if min_grid_steps > 1 and B128 >= min_grid_steps * 128:
        cap = _round_up(pl.cdiv(B128, min_grid_steps), 128)
        block_m = min(block_m, cap)
    n_tiles = pl.cdiv(B, block_m)

    if compute_dtype is not None:
        w1 = w1.astype(compute_dtype)   # resident (D, D), tiny; x cast in-kernel

    out = pl.pallas_call(
        gen_scale_kernel,
        out_shape=jax.ShapeDtypeStruct((1, B), jnp.float32),
        grid_spec=pltpu.PrefetchScalarGridSpec(
            num_scalar_prefetch=0,
            grid=(n_tiles,),
            in_specs=[
                pl.BlockSpec((block_m, D), lambda i: (i, 0)),        # x tile
                # TODO(synk): w1/b1/w2 are grid-invariant; if D grows, single-
                # buffer them (pipeline_mode) and add a K-reduction grid axis
                # with a VMEM accumulator. Not needed at D=256 (~0.25 MiB).
                pl.BlockSpec((D, D), lambda i: (0, 0)),              # w1 (resident)
                pl.BlockSpec((1, D), lambda i: (0, 0)),              # b1 row
                pl.BlockSpec((1, D), lambda i: (0, 0)),              # w2 row
                pl.BlockSpec(memory_space=pltpu.MemorySpace.SMEM),   # b2 scalar
            ],
            # Lane-dense output slab: one (1, block_m) row per grid step;
            # ragged batches hit a masked partial store only on the last block.
            out_specs=pl.BlockSpec((1, block_m), lambda i: (0, i)),
        ),
        compiler_params=pltpu.CompilerParams(
            dimension_semantics=("parallel",),   # batch tiles shard across TCs (v7x)
        ),
    )(x, w1, b1, w2, b2)

    # (1, B) row-major -> (B, 1)
    return out.reshape(B, 1)


def init_params(key, input_size):
    """Deterministic synthetic params matching nn.Linear init bounds.

    torch.nn.Linear(in, out) has weight (out, in), bias (out,). We store
    w1 transposed (in, in) and w2 as a (1, in) row."""
    k1, k2, k3, k4 = jax.random.split(key, 4)
    bound = 1.0 / jnp.sqrt(input_size)
    w1 = jax.random.uniform(k1, (input_size, input_size), jnp.float32, -bound, bound)
    b1 = jax.random.uniform(k2, (1, input_size), jnp.float32, -bound, bound)
    w2 = jax.random.uniform(k3, (1, input_size), jnp.float32, -bound, bound)
    b2 = jax.random.uniform(k4, (1,), jnp.float32, -bound, bound)
    return w1, b1, w2, b2


def reference(x, w1, b1, w2, b2):
    h = jnp.maximum(x @ w1 + b1, 0.0)
    z = h @ w2.T + b2                      # (B, 1)
    return jnp.maximum(z, 0.0) + jnp.log1p(jnp.exp(-jnp.abs(z)))


if __name__ == "__main__":
    input_size = 256   # module default

    key = jax.random.PRNGKey(0)
    kx, kp = jax.random.split(key)
    w1, b1, w2, b2 = init_params(kp, input_size)

    # 1) f32 path, batch a multiple of 128 -> 2 grid steps (both TCs on v7x).
    x = jax.random.normal(kx, (512, input_size), jnp.float32)
    out = jax.block_until_ready(generator_scale(x, w1, b1, w2, b2))
    ref = reference(x, w1, b1, w2, b2)
    assert out.shape == (512, 1), out.shape
    assert jnp.allclose(out, ref, atol=1e-4, rtol=1e-4), \
        f"f32 max err {jnp.max(jnp.abs(out - ref))}"

    # 2) Ragged batch -> partial last block (no wrapper-side pad pass over x).
    xr = jax.random.normal(jax.random.PRNGKey(1), (300, input_size), jnp.float32)
    outr = jax.block_until_ready(generator_scale(xr, w1, b1, w2, b2))
    refr = reference(xr, w1, b1, w2, b2)
    assert outr.shape == (300, 1), outr.shape
    assert jnp.allclose(outr, refr, atol=1e-4, rtol=1e-4), \
        f"ragged max err {jnp.max(jnp.abs(outr - refr))}"

    # 3) bf16 layer-1 MXU path: x cast in-kernel, f32 accumulation/softplus.
    outb = jax.block_until_ready(
        generator_scale(x, w1, b1, w2, b2, compute_dtype=jnp.bfloat16))
    assert jnp.allclose(outb, ref, atol=1e-1, rtol=1e-1), \
        f"bf16 max err {jnp.max(jnp.abs(outb - ref))}"

    print("KERNEL_OK")
</pallas_src>

<mosaic_0001>
module attributes {stable_mosaic.version = 11 : i64} {
  func.func @gen_scale_kernel(%arg0: i32, %arg1: memref<256x256xf32, #tpu.memory_space<vmem>>, %arg2: memref<256x256xf32, #tpu.memory_space<vmem>>, %arg3: memref<1x256xf32, #tpu.memory_space<vmem>>, %arg4: memref<1x256xf32, #tpu.memory_space<vmem>>, %arg5: memref<1xf32, #tpu.memory_space<smem>>, %arg6: memref<1x256xf32, #tpu.memory_space<vmem>>) attributes {dimension_semantics = [#tpu.dimension_semantics<parallel>], iteration_bounds = array<i64: 2>, scalar_prefetch = 0 : i64, scratch_operands = 0 : i64, tpu.core_type = #tpu.core_type<tc>, window_params = [{transform_indices = @transform_0, window_bounds = array<i64: 256, 256>}, {pipeline_mode = #tpu.pipeline_mode<synchronous>, transform_indices = @transform_1, window_bounds = array<i64: 256, 256>}, {pipeline_mode = #tpu.pipeline_mode<synchronous>, transform_indices = @transform_2, window_bounds = array<i64: 1, 256>}, {pipeline_mode = #tpu.pipeline_mode<synchronous>, transform_indices = @transform_3, window_bounds = array<i64: 1, 256>}, {transform_indices = @transform_4, window_bounds = array<i64: 1>}, {transform_indices = @transform_5, window_bounds = array<i64: 1, 256>}]} {
    %c0 = arith.constant 0 : index
    %c0_0 = arith.constant 0 : index
    %0 = vector.load %arg1[%c0, %c0_0] : memref<256x256xf32, #tpu.memory_space<vmem>>, vector<256x256xf32>
    %c0_1 = arith.constant 0 : index
    %c0_2 = arith.constant 0 : index
    %1 = vector.load %arg2[%c0_1, %c0_2] : memref<256x256xf32, #tpu.memory_space<vmem>>, vector<256x256xf32>
    %cst = arith.constant dense<0.000000e+00> : vector<256x256xf32>
    %2 = tpu.matmul %0, %1, %cst {dimension_numbers = #tpu.dot_dimension_numbers<[1], [0], [0], [1], [0, 0, 1, 1], [], []>} : vector<256x256xf32>, vector<256x256xf32>, vector<256x256xf32> -> vector<256x256xf32>
    %c0_3 = arith.constant 0 : index
    %c0_4 = arith.constant 0 : index
    %3 = vector.load %arg3[%c0_3, %c0_4] : memref<1x256xf32, #tpu.memory_space<vmem>>, vector<1x256xf32>
    %4 = vector.broadcast %3 : vector<1x256xf32> to vector<256x256xf32>
    %5 = arith.addf %2, %4 : vector<256x256xf32>
    %cst_5 = arith.constant 0.000000e+00 : f32
    %6 = vector.broadcast %cst_5 : f32 to vector<256x256xf32>
    %7 = arith.maximumf %5, %6 : vector<256x256xf32>
    %c0_6 = arith.constant 0 : index
    %c0_7 = arith.constant 0 : index
    %8 = vector.load %arg4[%c0_6, %c0_7] : memref<1x256xf32, #tpu.memory_space<vmem>>, vector<1x256xf32>
    %9 = vector.broadcast %8 : vector<1x256xf32> to vector<256x256xf32>
    %10 = arith.mulf %7, %9 : vector<256x256xf32>
    %cst_8 = arith.constant dense<0.000000e+00> : vector<256xf32>
    %11 = vector.multi_reduction <add>, %10, %cst_8 [1] : vector<256x256xf32> to vector<256xf32>
    %12 = vector.shape_cast %11 : vector<256xf32> to vector<1x256xf32>
    %c0_9 = arith.constant 0 : index
    %13 = memref.load %arg5[%c0_9] : memref<1xf32, #tpu.memory_space<smem>>
    %14 = vector.broadcast %13 : f32 to vector<1x256xf32>
    %15 = arith.addf %12, %14 : vector<1x256xf32>
    %cst_10 = arith.constant 0.000000e+00 : f32
    %16 = vector.broadcast %cst_10 : f32 to vector<1x256xf32>
    %17 = arith.maximumf %15, %16 : vector<1x256xf32>
    %18 = math.absf %15 : vector<1x256xf32>
    %cst_11 = arith.constant 0.000000e+00 : f32
    %19 = vector.broadcast %cst_11 : f32 to vector<1x256xf32>
    %20 = arith.subf %19, %18 : vector<1x256xf32>
    %21 = math.exp %20 : vector<1x256xf32>
    %22 = math.log1p %21 : vector<1x256xf32>
    %23 = arith.addf %17, %22 : vector<1x256xf32>
    %c0_12 = arith.constant 0 : index
    %c0_13 = arith.constant 0 : index
    %24 = vector.load %arg6[%c0_12, %c0_13] : memref<1x256xf32, #tpu.memory_space<vmem>>, vector<1x256xf32>
    tpu.vector_store %arg6[%c0_12, %c0_13], %23 {strides = array<i32>} : memref<1x256xf32, #tpu.memory_space<vmem>>, vector<1x256xf32>,
    return
  }
  func.func @transform_0(%arg0: i32) -> (i32, i32) {
    %c0_i32 = arith.constant 0 : i32
    %c0_i32_0 = arith.constant 0 : i32
    return %arg0, %c0_i32 : i32, i32
  }
  func.func @transform_1(%arg0: i32) -> (i32, i32) {
    %c0_i32 = arith.constant 0 : i32
    %c0_i32_0 = arith.constant 0 : i32
    %c0_i32_1 = arith.constant 0 : i32
    return %c0_i32, %c0_i32_0 : i32, i32
  }
  func.func @transform_2(%arg0: i32) -> (i32, i32) {
    %c0_i32 = arith.constant 0 : i32
    %c0_i32_0 = arith.constant 0 : i32
    %c0_i32_1 = arith.constant 0 : i32
    return %c0_i32, %c0_i32_0 : i32, i32
  }
  func.func @transform_3(%arg0: i32) -> (i32, i32) {
    %c0_i32 = arith.constant 0 : i32
    %c0_i32_0 = arith.constant 0 : i32
    %c0_i32_1 = arith.constant 0 : i32
    return %c0_i32, %c0_i32_0 : i32, i32
  }
  func.func @transform_4(%arg0: i32) -> i32 {
    %c0_i32 = arith.constant 0 : i32
    %c0_i32_0 = arith.constant 0 : i32
    return %c0_i32 : i32
  }
  func.func @transform_5(%arg0: i32) -> (i32, i32) {
    %c0_i32 = arith.constant 0 : i32
    %c0_i32_0 = arith.constant 0 : i32
    return %c0_i32, %arg0 : i32, i32
  }
}

</mosaic_0001>

<bundles_post_ra>
// kernel: tpu_custom_call.1
= control target key start
LH: loop header
LB: loop body
LE: loop exit
PB: predicated region body
PF: predicated region fallthrough
CT: control target
= control target key end

     0   :  { %s6720_s0 = inlined_call_operand.hbm [shape: f32[512,256], index: 0, kind: input, shape index: {}]   ;;  %s6721_s1 = inlined_call_operand.hbm [shape: f32[256,256], index: 1, kind: input, shape index: {}]   ;;  %s6722_s2 = inlined_call_operand.vmem [shape: f32[1,256], index: 2, kind: input, shape index: {}]   ;;  %s6723_s3 = inlined_call_operand.vmem [shape: f32[1,256], index: 3, kind: input, shape index: {}]   ;;  %s6724_s4 = inlined_call_operand.<no memory space> [shape: f32[1], index: 4, kind: input, shape index: {}]   ;;  %s6725_s5 = inlined_call_operand.hbm [shape: f32[1,512], index: 5, kind: output, shape index: {}]  }
   0x1   :  { %10 = sst [smem:[#allocation2]] %s6724_s4 }
   0x2   :  { %11 = vsyncpa [#allocation4], 0 }
   0x3   :  { %13 = vsyncpa [#allocation4 + $0x1], 0 }
   0x4   :  { %14 = vsyncpa [#allocation7], 0 }
   0x5   :  { %15 = vsyncpa [#allocation5], 0 }
   0x6   :  { %17 = vsyncpa [#allocation5 + $0x1], 0  ;;  %s4874_s20 = smov 0   ;;  %s4876_s21 = smov 0  }
   0x7   :  { %s4878_s22 = smov 0   ;;  %s4880_s23 = smov 0  }
   0x8 LB: > { %s4895_s4 = sadd.s32 4294967295, %s4832_s23   ;;  %s4435_s24 = sadd.s32 4294967294, %s4832_s23   ;;  %s4832_s23 = sphi %s4880_s23, %s6871_s23   ;;  %s4828_s22 = sphi %s4878_s22, %s6870_s22   ;;  %s4824_s21 = sphi %s4876_s21, %s6869_s21   ;;  %s4820_s20 = sphi %s4874_s20, %s6868_s20  }
   0x9   : > { %p43_p0 = scmp.ne.s32.totalorder %s4824_s21, %s4820_s20  ;;  %p6726_p1 = scmp.eq.s32.totalorder %s4895_s4, 0 }
   0xa   : > { %p157_p3 = scmp.eq.s32.totalorder %s4435_s24, 1  ;;  %p4436_p5 = scmp.ge.s32.totalorder %s4832_s23, 1 }
   0xb   : > { %p4904_p4 = por %p6726_p1, %p43_p0  ;;  %p164_p7 = scmp.lt.s32.totalorder %s4832_s23, 3 }
   0xc   : > { %p4909_p6 = por %p157_p3, %p43_p0  ;;  %s4834_s28 = smov [#allocation6]  }
   0xd   : > { %s6743_s25 = scalar_select %p4904_p4, 1, 0 }
   0xe   : > { %s6744_s26 = scalar_select %p4909_p6, 1, 0 }
   0xf   : > { %p4914_p8 = pnand %p4436_p5, %p164_p7  ;;  %s176_s29 = sshll.u32 %s4834_s28, 4  ;;  %s177_s29 = int_to_ptr.vmem [resolvable:$true] %s176_s29 }
  0x10   : > { %s4928_s6 = sadd.s32 1, %s4832_s23   ;;  %s30_s7 = sadd.s32 1, %s4828_s22 }
  0x11   : > { %s6745_s27 = scalar_select %p4914_p8, 1, 0 }
  0x12   : > { %p4527_p9 = pneg %p4914_p8  ;;  %s27_s8 = ssub.s32 %s4832_s23, %s4928_s6 }
  0x13   : > { %s4721_s9 = scalar_lea.vmem %s177_s29, 8192  ;;  %p4729_p5 = scmp.lt.s32.totalorder %s177_s29, %s177_s29 }
  0x14   : > { %p4923_p11 = pnand %p4527_p9, %p6726_p1  ;;  %p4722_p13 = scmp.ne.s32.totalorder %s177_s29, %s4721_s9 }
  0x15   : > { %p4730_p7 = scmp.lt.s32.totalorder %s4721_s9, %s4721_s9 }
  0x16   : > { %p4712_p12 = pneg %p4923_p11 }
  0x17   : > { %p4731_p10 = por %p4730_p7, %p4729_p5 }
  0x18   : > { %p4724_p0 = pnand %p4722_p13, %p4712_p12 }
  0x1a   : > { %p4725_p3 = pneg %p4724_p0 }
  0x1c   : > { %p4732_p2 = pnand %p4731_p10, %p4725_p3 }
  0x1e   : > { %4735 = shalt.err (!%p4732_p2)
}
  0x1f   : > { %s4835_s10 = smov 256   ;;  %s4836_s11 = smov 16  }
  0x20   : > { %4530 = dma.hbm_to_vmem [thread:$0]  (!%p4923_p11), %s6721_s1, 8192, %s177_s29, [#allocation7], %s4835_s10, %s4835_s10, %s4836_s11  }
  0x21   : > { %p28_p2 = scmp.eq.s32.totalorder %s27_s8, 0  ;;  %p37_p9 = scmp.ne.s32.totalorder %s4828_s22, %s4824_s21 }
  0x22   : > { %p38_p10 = scmp.eq.s32.totalorder %s4832_s23, 0  ;;  %p4540_p12 = scmp.lt.s32.totalorder %s4832_s23, 2 }
  0x23   : > { %s4948_s14 = scalar_select %p28_p2, %s4828_s22, %s30_s7  }
  0x24   : > { %p39_p13 = por %p38_p10, %p37_p9  ;;  %p6747_p0 = scmp.eq.s32.totalorder %s4895_s4, 1 }
  0x25   : > { %s199_s16 = sand.u32 1, %s4828_s22   ;;  %s4453_s17 = sshll.u32 %s4832_s23, 13 }
  0x26   : > { %p4952_p3 = por %p6747_p0, %p37_p9  ;;  %s4439_s18 = sshll.u32 %s199_s16, 9 }
  0x27   : > { %s4961_s28 = scalar_lea.hbm %s6720_s0, %s4453_s17  ;;  %s203_s29 = scalar_lea.vmem [#allocation3], %s4439_s18 }
  0x28   : > { %s6748_s15 = scalar_select %p4952_p3, 1, 0 }
  0x29   : > { %s211_s30 = sshll.u32 %s203_s29, 4  ;;  %p4963_p11 = pnand %p4540_p12, %p39_p13  ;;  %s4967_s30 = int_to_ptr.vmem [resolvable:$true] %s211_s30 }
  0x2a   : > { %s4969_s8 = scalar_lea.sflag [#allocation4], %s199_s16  ;;  %s4736_s9 = scalar_lea.hbm %s4961_s28, 8192 }
  0x2b   : > { %p4737_p5 = scmp.ne.s32.totalorder %s4961_s28, %s4736_s9  ;;  %p4738_p7 = pneg %p4963_p11 }
  0x2c   : > { %s4741_s17 = scalar_lea.hbm %s6720_s0, 16384  ;;  %p4742_p10 = scmp.lt.s32.totalorder %s4961_s28, %s6720_s0 }
  0x2d   : > { %p4739_p2 = pnand %p4738_p7, %p4737_p5  ;;  %p4743_p12 = scmp.lt.s32.totalorder %s4741_s17, %s4736_s9 }
  0x2f   : > { %p4740_p9 = pneg %p4739_p2  ;;  %p4744_p13 = por %p4743_p12, %p4742_p10 }
  0x31   : > { %p4745_p0 = pnand %p4744_p13, %p4740_p9 }
  0x33   : > { %4748 = shalt.err (!%p4745_p0)
}
  0x34   : > { %s4749_s16 = scalar_lea.vmem %s4967_s30, 8192  ;;  %s4837_s24 = smov [#allocation3]  }
  0x35   : > { %p4750_p1 = scmp.ne.s32.totalorder %s4967_s30, %s4749_s16  ;;  %s4754_s29 = sshll.u32 %s4837_s24, 4  ;;  %s4755_s29 = int_to_ptr.vmem [resolvable:$false] %s4754_s29 }
  0x36   : > { %s4756_s12 = scalar_lea.vmem %s4755_s29, 16384  ;;  %p4757_p2 = scmp.lt.s32.totalorder %s4967_s30, %s4755_s29 }
  0x37   : > { %p4752_p6 = pnand %p4750_p1, %p4738_p7  ;;  %p4758_p3 = scmp.lt.s32.totalorder %s4756_s12, %s4749_s16 }
  0x39   : > { %p4753_p5 = pneg %p4752_p6  ;;  %p4759_p4 = por %p4758_p3, %p4757_p2 }
  0x3b   : > { %p4760_p8 = pnand %p4759_p4, %p4753_p5 }
  0x3d   : > { %4763 = shalt.err (!%p4760_p8)
}
  0x3e   : > { %4534 = dma.hbm_to_vmem [thread:$0]  (!%p4963_p11), %s4961_s28, 8192, %s4967_s30, %s4969_s8, %s4835_s10, %s4835_s10, %s4836_s11  }
  0x3f   : > { %p6750_p1 = scmp.ne.s32.totalorder %s6745_s27, 0 }
  0x41   : > { %223 = sbr.rel (%p6750_p1) target bundleno = 944 (0x3b0), region = 40 }
  0x46   : > { %s4996_s9 = sand.u32 1, %s4824_s21   ;;  %p6751_p4 = scmp.ne.s32.totalorder %s6743_s25, 0 }
  0x47   : > { %s4444_s13 = sshll.u32 %s4996_s9, 9  ;;  %s226_s17 = scalar_lea.sflag [#allocation4], %s4996_s9 }
  0x48   : > { %s5000_s18 = scalar_lea.vmem [#allocation3], %s4444_s13 }
  0x49   : > { %4807 = dma.done.wait (%p6751_p4), %s226_s17, 8192  }
  0x4a   : > { %4809 = vsyncadd (%p6751_p4), %s226_s17, 4294959104  ;;  %p6752_p6 = scmp.eq.s32.totalorder %s4895_s4, 0 }
  0x4c   : > { %4811 = dma.done.wait (%p6752_p6), [#allocation7], 8192   ;;  %p6753_p8 = pmov %p6752_p6 }
  0x4d   : > { %v357_v0 = vld [vmem:[#allocation6 + $0xf8] sm:$0xff]  ;;  %v356_v1 = vld [vmem:[#allocation6 + $0xf0] sm:$0xff]  ;;  %v355_v2 = vld [vmem:[#allocation6 + $0xe8] sm:$0xff]  ;;  %s895_s28 = sld [smem:[#allocation2]]  ;;  %s4446_s30 = sshll.u32 %s4996_s9, 1 }
  0x4e   : > { %4813 = vsyncadd (%p6753_p8), [#allocation7], 4294959104  ;;  %402 = vmatprep.subr.mxu0 %v357_v0  ;;  %4455 = vmatprep.subr.mxu1 %v357_v0  ;;  %v354_v3 = vld [vmem:[#allocation6 + $0xe0] sm:$0xff]  ;;  %v353_v4 = vld [vmem:[#allocation6 + $0xd8] sm:$0xff]  ;;  %s4454_s7 = sshll.u32 %s4895_s4, 5  ;;  %s259_s8 = scalar_lea.vmem [#allocation8], %s4446_s30 }
  0x4f   : > { %403 = vmatpush1.msra.mxu0 %v356_v1  ;;  %4487 = vmatpush1.msra.mxu1 %v356_v1  ;;  %v352_v5 = vld [vmem:[#allocation6 + $0xd0] sm:$0xff]  ;;  %v351_v6 = vld [vmem:[#allocation6 + $0xc8] sm:$0xff]  ;;  %v350_v7 = vld [vmem:[#allocation6 + $0xc0] sm:$0xff]  ;;  %s4355_s19 = sshll.u32 %s259_s8, 4  ;;  %s4353_s29 = scalar_lea.hbm %s6725_s5, %s4454_s7  ;;  %s4356_s19 = int_to_ptr.vmem [resolvable:$true] %s4355_s19 }
  0x50   : > { %404 = vmatprep.subr.mxu0 %v355_v2  ;;  %4456 = vmatprep.subr.mxu1 %v355_v2  ;;  %v349_v8 = vld [vmem:[#allocation6 + $0xb8] sm:$0xff]  ;;  %v348_v9 = vld [vmem:[#allocation6 + $0xb0] sm:$0xff]  ;;  %v347_v10 = vld [vmem:[#allocation6 + $0xa8] sm:$0xff]  ;;  %s4341_s12 = scalar_lea.sflag [#allocation5], %s4996_s9  ;;  %s4764_s13 = scalar_lea.vmem %s4356_s19, 32 }
  0x51   : > { %405 = vmatpush1.msra.mxu0 %v354_v3  ;;  %4488 = vmatpush1.msra.mxu1 %v354_v3  ;;  %v346_v11 = vld [vmem:[#allocation6 + $0xa0] sm:$0xff]  ;;  %v345_v12 = vld [vmem:[#allocation6 + $0x98] sm:$0xff]  ;;  %v344_v13 = vld [vmem:[#allocation6 + $0x90] sm:$0xff]  ;;  %p4765_p3 = scmp.ne.s32.totalorder %s4356_s19, %s4764_s13  ;;  %p6865_p11 = scmp.ne.s32.totalorder %s6748_s15, 0 }
  0x52   : > { %406 = vmatprep.subr.mxu0 %v353_v4  ;;  %4457 = vmatprep.subr.mxu1 %v353_v4  ;;  %v343_v14 = vld [vmem:[#allocation6 + $0x88] sm:$0xff]  ;;  %v342_v15 = vld [vmem:[#allocation6 + $0x80] sm:$0xff]  ;;  %v341_v16 = vld [vmem:[#allocation6 + $0x78] sm:$0xff]  ;;  %s4840_s4 = smov [#allocation8]  }
  0x53   : > { %407 = vmatpush1.msra.mxu0 %v352_v5  ;;  %4489 = vmatpush1.msra.mxu1 %v352_v5  ;;  %v340_v17 = vld [vmem:[#allocation6 + $0x70] sm:$0xff]  ;;  %v339_v18 = vld [vmem:[#allocation6 + $0x68] sm:$0xff]  ;;  %v338_v19 = vld [vmem:[#allocation6 + $0x60] sm:$0xff]  ;;  %p4766_p7 = pnand %p4765_p3, %p6865_p11  ;;  %s4768_s17 = sshll.u32 %s4840_s4, 4  ;;  %s4769_s17 = int_to_ptr.vmem [resolvable:$false] %s4768_s17 }
  0x54   : > { %408 = vmatprep.subr.mxu0 %v351_v6  ;;  %4458 = vmatprep.subr.mxu1 %v351_v6  ;;  %v337_v20 = vld [vmem:[#allocation6 + $0x58] sm:$0xff]  ;;  %v336_v21 = vld [vmem:[#allocation6 + $0x50] sm:$0xff]  ;;  %v335_v22 = vld [vmem:[#allocation6 + $0x48] sm:$0xff]  ;;  %p4771_p10 = scmp.lt.s32.totalorder %s4356_s19, %s4769_s17 }
  0x55   : > { %409 = vmatpush1.msra.mxu0 %v350_v7  ;;  %4490 = vmatpush1.msra.mxu1 %v350_v7  ;;  %v334_v23 = vld [vmem:[#allocation6 + $0x40] sm:$0xff]  ;;  %v333_v24 = vld [vmem:[#allocation6 + $0x38] sm:$0xff]  ;;  %v332_v25 = vld [vmem:[#allocation6 + $0x30] sm:$0xff]  ;;  %p4767_p9 = pneg %p4766_p7 }
  0x56   : > { %410 = vmatprep.subr.mxu0 %v349_v8  ;;  %4459 = vmatprep.subr.mxu1 %v349_v8  ;;  %v331_v26 = vld [vmem:[#allocation6 + $0x28] sm:$0xff]  ;;  %v330_v27 = vld [vmem:[#allocation6 + $0x20] sm:$0xff]  ;;  %v329_v28 = vld [vmem:[#allocation6 + $0x18] sm:$0xff] }
  0x57   : > { %411 = vmatpush1.msra.mxu0 %v348_v9  ;;  %4491 = vmatpush1.msra.mxu1 %v348_v9  ;;  %v328_v29 = vld [vmem:[#allocation6 + $0x10] sm:$0xff]  ;;  %v327_v30 = vld [vmem:[#allocation6 + $0x8] sm:$0xff]  ;;  %v326_v31 = vld [vmem:[#allocation6] sm:$0xff] }
  0x58   : > { %412 = vmatprep.subr.mxu0 %v347_v10  ;;  %4460 = vmatprep.subr.mxu1 %v347_v10  ;;  %v389_v32 = vld [vmem:[#allocation6 + $0x1f8] sm:$0xff]  ;;  %v388_v33 = vld [vmem:[#allocation6 + $0x1f0] sm:$0xff]  ;;  %v387_v34 = vld [vmem:[#allocation6 + $0x1e8] sm:$0xff] }
  0x59   : > { %413 = vmatpush1.msra.mxu0 %v346_v11  ;;  %4492 = vmatpush1.msra.mxu1 %v346_v11  ;;  %v386_v35 = vld [vmem:[#allocation6 + $0x1e0] sm:$0xff]  ;;  %v385_v36 = vld [vmem:[#allocation6 + $0x1d8] sm:$0xff]  ;;  %v384_v37 = vld [vmem:[#allocation6 + $0x1d0] sm:$0xff] }
  0x5a   : > { %414 = vmatprep.subr.mxu0 %v345_v12  ;;  %4461 = vmatprep.subr.mxu1 %v345_v12  ;;  %v383_v38 = vld [vmem:[#allocation6 + $0x1c8] sm:$0xff]  ;;  %v382_v39 = vld [vmem:[#allocation6 + $0x1c0] sm:$0xff]  ;;  %v381_v40 = vld [vmem:[#allocation6 + $0x1b8] sm:$0xff] }
  0x5b   : > { %415 = vmatpush1.msra.mxu0 %v344_v13  ;;  %4493 = vmatpush1.msra.mxu1 %v344_v13  ;;  %v380_v41 = vld [vmem:[#allocation6 + $0x1b0] sm:$0xff]  ;;  %v379_v42 = vld [vmem:[#allocation6 + $0x1a8] sm:$0xff]  ;;  %v378_v43 = vld [vmem:[#allocation6 + $0x1a0] sm:$0xff] }
  0x5c   : > { %416 = vmatprep.subr.mxu0 %v343_v14  ;;  %4462 = vmatprep.subr.mxu1 %v343_v14  ;;  %v377_v44 = vld [vmem:[#allocation6 + $0x198] sm:$0xff]  ;;  %v376_v45 = vld [vmem:[#allocation6 + $0x190] sm:$0xff]  ;;  %v375_v46 = vld [vmem:[#allocation6 + $0x188] sm:$0xff] }
  0x5d   : > { %417 = vmatpush1.msra.mxu0 %v342_v15  ;;  %4494 = vmatpush1.msra.mxu1 %v342_v15  ;;  %v374_v47 = vld [vmem:[#allocation6 + $0x180] sm:$0xff]  ;;  %v373_v48 = vld [vmem:[#allocation6 + $0x178] sm:$0xff]  ;;  %v372_v49 = vld [vmem:[#allocation6 + $0x170] sm:$0xff] }
  0x5e   : > { %418 = vmatprep.subr.mxu0 %v341_v16  ;;  %4463 = vmatprep.subr.mxu1 %v341_v16  ;;  %v371_v50 = vld [vmem:[#allocation6 + $0x168] sm:$0xff]  ;;  %v370_v51 = vld [vmem:[#allocation6 + $0x160] sm:$0xff]  ;;  %v369_v52 = vld [vmem:[#allocation6 + $0x158] sm:$0xff] }
  0x5f   : > { %419 = vmatpush1.msra.mxu0 %v340_v17  ;;  %4495 = vmatpush1.msra.mxu1 %v340_v17  ;;  %v368_v53 = vld [vmem:[#allocation6 + $0x150] sm:$0xff]  ;;  %v367_v54 = vld [vmem:[#allocation6 + $0x148] sm:$0xff]  ;;  %v366_v55 = vld [vmem:[#allocation6 + $0x140] sm:$0xff] }
  0x60   : > { %420 = vmatprep.subr.mxu0 %v339_v18  ;;  %4464 = vmatprep.subr.mxu1 %v339_v18  ;;  %v365_v56 = vld [vmem:[#allocation6 + $0x138] sm:$0xff]  ;;  %v364_v57 = vld [vmem:[#allocation6 + $0x130] sm:$0xff]  ;;  %v363_v58 = vld [vmem:[#allocation6 + $0x128] sm:$0xff] }
  0x61   : > { %421 = vmatpush1.msra.mxu0 %v338_v19  ;;  %4496 = vmatpush1.msra.mxu1 %v338_v19  ;;  %v362_v59 = vld [vmem:[#allocation6 + $0x120] sm:$0xff]  ;;  %v361_v60 = vld [vmem:[#allocation6 + $0x118] sm:$0xff]  ;;  %v360_v61 = vld [vmem:[#allocation6 + $0x110] sm:$0xff] }
  0x62   : > { %422 = vmatprep.subr.mxu0 %v337_v20  ;;  %4465 = vmatprep.subr.mxu1 %v337_v20  ;;  %v359_v62 = vld [vmem:[#allocation6 + $0x108] sm:$0xff]  ;;  %v358_v63 = vld [vmem:[#allocation6 + $0x100] sm:$0xff]  ;;  %v265_v4 = vld [vmem:[%s5000_s18 + $0x18] sm:$0xff] }
  0x63   : > { %423 = vmatpush1.msra.mxu0 %v336_v21  ;;  %4497 = vmatpush1.msra.mxu1 %v336_v21  ;;  %v263_v0 = vld [vmem:[%s5000_s18 + $0x8] sm:$0xff]  ;;  %v262_v2 = vld [vmem:[%s5000_s18] sm:$0xff]  ;;  %v297_v5 = vld [vmem:[%s5000_s18 + $0x118] sm:$0xff] }
  0x64   : > { %424 = vmatprep.subr.mxu0 %v335_v22  ;;  %4466 = vmatprep.subr.mxu1 %v335_v22  ;;  %v295_v1 = vld [vmem:[%s5000_s18 + $0x108] sm:$0xff]  ;;  %v294_v3 = vld [vmem:[%s5000_s18 + $0x100] sm:$0xff]  ;;  %v264_v6 = vld [vmem:[%s5000_s18 + $0x10] sm:$0xff] }
  0x65   : > { %425 = vmatpush1.msra.mxu0 %v334_v23  ;;  %4498 = vmatpush1.msra.mxu1 %v334_v23  ;;  %v296_v7 = vld [vmem:[%s5000_s18 + $0x110] sm:$0xff]  ;;  %v267_v8 = vld [vmem:[%s5000_s18 + $0x28] sm:$0xff]  ;;  %v266_v10 = vld [vmem:[%s5000_s18 + $0x20] sm:$0xff] }
  0x66   : > { %426 = vmatprep.subr.mxu0 %v333_v24  ;;  %4467 = vmatprep.subr.mxu1 %v333_v24  ;;  %v299_v9 = vld [vmem:[%s5000_s18 + $0x128] sm:$0xff]  ;;  %v298_v11 = vld [vmem:[%s5000_s18 + $0x120] sm:$0xff]  ;;  %v269_v12 = vld [vmem:[%s5000_s18 + $0x38] sm:$0xff] }
  0x67   : > { %427 = vmatpush1.msra.mxu0 %v332_v25  ;;  %4499 = vmatpush1.msra.mxu1 %v332_v25  ;;  %v301_v13 = vld [vmem:[%s5000_s18 + $0x138] sm:$0xff]  ;;  %v268_v14 = vld [vmem:[%s5000_s18 + $0x30] sm:$0xff]  ;;  %v271_v16 = vld [vmem:[%s5000_s18 + $0x48] sm:$0xff] }
  0x68   : > { %428 = vmatprep.subr.mxu0 %v331_v26  ;;  %4468 = vmatprep.subr.mxu1 %v331_v26  ;;  %v300_v15 = vld [vmem:[%s5000_s18 + $0x130] sm:$0xff]  ;;  %v303_v17 = vld [vmem:[%s5000_s18 + $0x148] sm:$0xff]  ;;  %v270_v18 = vld [vmem:[%s5000_s18 + $0x40] sm:$0xff] }
  0x69   : > { %429 = vmatpush1.msra.mxu0 %v330_v27  ;;  %4500 = vmatpush1.msra.mxu1 %v330_v27  ;;  %v302_v19 = vld [vmem:[%s5000_s18 + $0x140] sm:$0xff]  ;;  %v273_v20 = vld [vmem:[%s5000_s18 + $0x58] sm:$0xff]  ;;  %v272_v22 = vld [vmem:[%s5000_s18 + $0x50] sm:$0xff] }
  0x6a   : > { %430 = vmatprep.subr.mxu0 %v329_v28  ;;  %4469 = vmatprep.subr.mxu1 %v329_v28  ;;  %v305_v21 = vld [vmem:[%s5000_s18 + $0x158] sm:$0xff]  ;;  %v304_v23 = vld [vmem:[%s5000_s18 + $0x150] sm:$0xff]  ;;  %v275_v24 = vld [vmem:[%s5000_s18 + $0x68] sm:$0xff] }
  0x6b   : > { %431 = vmatpush1.msra.mxu0 %v328_v29  ;;  %4501 = vmatpush1.msra.mxu1 %v328_v29  ;;  %v307_v25 = vld [vmem:[%s5000_s18 + $0x168] sm:$0xff]  ;;  %v274_v26 = vld [vmem:[%s5000_s18 + $0x60] sm:$0xff]  ;;  %v277_v28 = vld [vmem:[%s5000_s18 + $0x78] sm:$0xff] }
  0x6c   : > { %432 = vmatprep.subr.mxu0 %v327_v30  ;;  %4470 = vmatprep.subr.mxu1 %v327_v30  ;;  %v306_v27 = vld [vmem:[%s5000_s18 + $0x160] sm:$0xff]  ;;  %v309_v29 = vld [vmem:[%s5000_s18 + $0x178] sm:$0xff]  ;;  %v276_v30 = vld [vmem:[%s5000_s18 + $0x70] sm:$0xff] }
  0x6d   : > { %433 = vmatpush1.msra.mxu0 %v326_v31  ;;  %4502 = vmatpush1.msra.mxu1 %v326_v31  ;;  %v308_v31 = vld [vmem:[%s5000_s18 + $0x170] sm:$0xff] }
  0x6e   : > { %434 = vmatprep.subr.mxu0 %v389_v32  ;;  %4471 = vmatprep.subr.mxu1 %v389_v32  ;;  %v279_v32 = vld [vmem:[%s5000_s18 + $0x88] sm:$0xff] }
  0x6f   : > { %435 = vmatpush2.msra.mxu0 %v388_v33  ;;  %4503 = vmatpush2.msra.mxu1 %v388_v33  ;;  %v311_v33 = vld [vmem:[%s5000_s18 + $0x188] sm:$0xff] }
  0x70   : > { %436 = vmatprep.subr.mxu0 %v387_v34  ;;  %4472 = vmatprep.subr.mxu1 %v387_v34  ;;  %v278_v34 = vld [vmem:[%s5000_s18 + $0x80] sm:$0xff] }
  0x71   : > { %437 = vmatpush2.msra.mxu0 %v386_v35  ;;  %4504 = vmatpush2.msra.mxu1 %v386_v35  ;;  %v310_v35 = vld [vmem:[%s5000_s18 + $0x180] sm:$0xff] }
  0x72   : > { %438 = vmatprep.subr.mxu0 %v385_v36  ;;  %4473 = vmatprep.subr.mxu1 %v385_v36  ;;  %v281_v36 = vld [vmem:[%s5000_s18 + $0x98] sm:$0xff] }
  0x73   : > { %439 = vmatpush2.msra.mxu0 %v384_v37  ;;  %4505 = vmatpush2.msra.mxu1 %v384_v37  ;;  %v313_v37 = vld [vmem:[%s5000_s18 + $0x198] sm:$0xff] }
  0x74   : > { %440 = vmatprep.subr.mxu0 %v383_v38  ;;  %4474 = vmatprep.subr.mxu1 %v383_v38  ;;  %v280_v38 = vld [vmem:[%s5000_s18 + $0x90] sm:$0xff] }
  0x75   : > { %441 = vmatpush2.msra.mxu0 %v382_v39  ;;  %4506 = vmatpush2.msra.mxu1 %v382_v39  ;;  %v312_v39 = vld [vmem:[%s5000_s18 + $0x190] sm:$0xff] }
  0x76   : > { %442 = vmatprep.subr.mxu0 %v381_v40  ;;  %4475 = vmatprep.subr.mxu1 %v381_v40  ;;  %v283_v40 = vld [vmem:[%s5000_s18 + $0xa8] sm:$0xff] }
  0x77   : > { %443 = vmatpush2.msra.mxu0 %v380_v41  ;;  %4507 = vmatpush2.msra.mxu1 %v380_v41  ;;  %v315_v41 = vld [vmem:[%s5000_s18 + $0x1a8] sm:$0xff] }
  0x78   : > { %444 = vmatprep.subr.mxu0 %v379_v42  ;;  %4476 = vmatprep.subr.mxu1 %v379_v42  ;;  %v282_v42 = vld [vmem:[%s5000_s18 + $0xa0] sm:$0xff] }
  0x79   : > { %445 = vmatpush2.msra.mxu0 %v378_v43  ;;  %4508 = vmatpush2.msra.mxu1 %v378_v43  ;;  %v314_v43 = vld [vmem:[%s5000_s18 + $0x1a0] sm:$0xff] }
  0x7a   : > { %446 = vmatprep.subr.mxu0 %v377_v44  ;;  %4477 = vmatprep.subr.mxu1 %v377_v44  ;;  %v285_v44 = vld [vmem:[%s5000_s18 + $0xb8] sm:$0xff] }
  0x7b   : > { %447 = vmatpush2.msra.mxu0 %v376_v45  ;;  %4509 = vmatpush2.msra.mxu1 %v376_v45  ;;  %v317_v45 = vld [vmem:[%s5000_s18 + $0x1b8] sm:$0xff] }
  0x7c   : > { %448 = vmatprep.subr.mxu0 %v375_v46  ;;  %4478 = vmatprep.subr.mxu1 %v375_v46  ;;  %v284_v46 = vld [vmem:[%s5000_s18 + $0xb0] sm:$0xff] }
  0x7d   : > { %449 = vmatpush2.msra.mxu0 %v374_v47  ;;  %4510 = vmatpush2.msra.mxu1 %v374_v47  ;;  %v316_v47 = vld [vmem:[%s5000_s18 + $0x1b0] sm:$0xff] }
  0x7e   : > { %450 = vmatprep.subr.mxu0 %v373_v48  ;;  %4479 = vmatprep.subr.mxu1 %v373_v48  ;;  %v287_v48 = vld [vmem:[%s5000_s18 + $0xc8] sm:$0xff] }
  0x7f   : > { %451 = vmatpush2.msra.mxu0 %v372_v49  ;;  %4511 = vmatpush2.msra.mxu1 %v372_v49  ;;  %v319_v49 = vld [vmem:[%s5000_s18 + $0x1c8] sm:$0xff] }
  0x80   : > { %452 = vmatprep.subr.mxu0 %v371_v50  ;;  %4480 = vmatprep.subr.mxu1 %v371_v50  ;;  %v286_v50 = vld [vmem:[%s5000_s18 + $0xc0] sm:$0xff] }
  0x81   : > { %453 = vmatpush2.msra.mxu0 %v370_v51  ;;  %4512 = vmatpush2.msra.mxu1 %v370_v51  ;;  %v318_v51 = vld [vmem:[%s5000_s18 + $0x1c0] sm:$0xff] }
  0x82   : > { %454 = vmatprep.subr.mxu0 %v369_v52  ;;  %4481 = vmatprep.subr.mxu1 %v369_v52  ;;  %v289_v52 = vld [vmem:[%s5000_s18 + $0xd8] sm:$0xff] }
  0x83   : > { %455 = vmatpush2.msra.mxu0 %v368_v53  ;;  %4513 = vmatpush2.msra.mxu1 %v368_v53  ;;  %v321_v53 = vld [vmem:[%s5000_s18 + $0x1d8] sm:$0xff] }
  0x84   : > { %456 = vmatprep.subr.mxu0 %v367_v54  ;;  %4482 = vmatprep.subr.mxu1 %v367_v54  ;;  %v288_v54 = vld [vmem:[%s5000_s18 + $0xd0] sm:$0xff] }
  0x85   : > { %457 = vmatpush2.msra.mxu0 %v366_v55  ;;  %4514 = vmatpush2.msra.mxu1 %v366_v55  ;;  %v320_v55 = vld [vmem:[%s5000_s18 + $0x1d0] sm:$0xff] }
  0x86   : > { %458 = vmatprep.subr.mxu0 %v365_v56  ;;  %4483 = vmatprep.subr.mxu1 %v365_v56  ;;  %v291_v56 = vld [vmem:[%s5000_s18 + $0xe8] sm:$0xff] }
  0x87   : > { %459 = vmatpush2.msra.mxu0 %v364_v57  ;;  %4515 = vmatpush2.msra.mxu1 %v364_v57  ;;  %v323_v57 = vld [vmem:[%s5000_s18 + $0x1e8] sm:$0xff] }
  0x88   : > { %460 = vmatprep.subr.mxu0 %v363_v58  ;;  %4484 = vmatprep.subr.mxu1 %v363_v58  ;;  %v290_v58 = vld [vmem:[%s5000_s18 + $0xe0] sm:$0xff] }
  0x89   : > { %461 = vmatpush2.msra.mxu0 %v362_v59  ;;  %4516 = vmatpush2.msra.mxu1 %v362_v59  ;;  %v322_v59 = vld [vmem:[%s5000_s18 + $0x1e0] sm:$0xff] }
  0x8a   : > { %462 = vmatprep.subr.mxu0 %v361_v60  ;;  %4485 = vmatprep.subr.mxu1 %v361_v60  ;;  %v293_v60 = vld [vmem:[%s5000_s18 + $0xf8] sm:$0xff] }
  0x8b   : > { %463 = vmatpush2.msra.mxu0 %v360_v61  ;;  %4517 = vmatpush2.msra.mxu1 %v360_v61  ;;  %v325_v61 = vld [vmem:[%s5000_s18 + $0x1f8] sm:$0xff] }
  0x8c   : > { %464 = vmatprep.subr.mxu0 %v359_v62  ;;  %4486 = vmatprep.subr.mxu1 %v359_v62  ;;  %v292_v62 = vld [vmem:[%s5000_s18 + $0xf0] sm:$0xff] }
  0x8d   : > { %465 = vmatpush2.msra.mxu0 %v358_v63  ;;  %4518 = vmatpush2.msra.mxu1 %v358_v63  ;;  %v324_v63 = vld [vmem:[%s5000_s18 + $0x1f0] sm:$0xff]  ;;  %s4770_s18 = scalar_lea.vmem %s4769_s17, 64 }
  0x8e   : > { %466 = vmatprep.mubr.f32.mxu0 %v263_v0  ;;  %562 = vmatprep.mubr.f32.mxu1 %v295_v1  ;;  %v6730_v0 = vlaneseq  ;;  %p4772_p12 = scmp.lt.s32.totalorder %s4770_s18, %s4764_s13 }
  0x8f   : > { %467 = vmatmul.mubr.f32.vlgmr.msra.gmra.mxu0 %v262_v2  ;;  %563 = vmatmul.mubr.f32.vlgmr.msra.gmra.mxu1 %v294_v3  ;;  %v390_v3 = vld [vmem:[%s6722_s2] sm:$0x3] }
  0x90   : > { %472 = vmatprep.mubr.f32.mxu0 %v265_v4  ;;  %568 = vmatprep.mubr.f32.mxu1 %v297_v5  ;;  %v5075_v1 = vshrl.u32 %v6730_v0, 7  ;;  %p4773_p13 = por %p4772_p12, %p4771_p10 }
  0x92   : > { %6754 = vst [vmem:[#allocation12_spill] sm:$0xff] %v5075_v1  ;;  %v5078_v2 = vsub.s32 0, %v5075_v1  ;;  %v5084_v4 = vsub.s32 1, %v5075_v1  ;;  %p4774_p0 = pnand %p4773_p13, %p4767_p9 }
  0x93   : > { %473 = vmatmul.mubr.f32.gmra.mxu0 %v264_v6  ;;  %569 = vmatmul.mubr.f32.gmra.mxu1 %v296_v7 }
  0x94   : > { %478 = vmatprep.mubr.f32.mxu0 %v267_v8  ;;  %574 = vmatprep.mubr.f32.mxu1 %v299_v9  ;;  %v5087_v5 = vrot.slane %v390_v3, %v5078_v2  ;;  %v5090_v6 = vrot.slane %v390_v3, %v5084_v4 }
  0x97   : > { %479 = vmatmul.mubr.f32.gmra.mxu0 %v266_v10  ;;  %575 = vmatmul.mubr.f32.gmra.mxu1 %v298_v11  ;;  %v723_v11 = vld [vmem:[%s6723_s3] sm:$0x3] }
  0x98   : > { %484 = vmatprep.mubr.f32.mxu0 %v269_v12  ;;  %580 = vmatprep.mubr.f32.mxu1 %v301_v13 }
  0x9b   : > { %485 = vmatmul.mubr.f32.gmra.mxu0 %v268_v14  ;;  %581 = vmatmul.mubr.f32.gmra.mxu1 %v300_v15 }
  0x9c   : > { %490 = vmatprep.mubr.f32.mxu0 %v271_v16  ;;  %586 = vmatprep.mubr.f32.mxu1 %v303_v17 }
  0x9f   : > { %491 = vmatmul.mubr.f32.gmra.mxu0 %v270_v18  ;;  %587 = vmatmul.mubr.f32.gmra.mxu1 %v302_v19  ;;  %v5100_v19 = vrot.slane %v723_v11, %v5078_v2 }
  0xa0   : > { %496 = vmatprep.mubr.f32.mxu0 %v273_v20  ;;  %592 = vmatprep.mubr.f32.mxu1 %v305_v21  ;;  %v5103_v21 = vrot.slane %v723_v11, %v5084_v4 }
  0xa3   : > { %497 = vmatmul.mubr.f32.gmra.mxu0 %v272_v22  ;;  %593 = vmatmul.mubr.f32.gmra.mxu1 %v304_v23 }
  0xa4   : > { %502 = vmatprep.mubr.f32.mxu0 %v275_v24  ;;  %598 = vmatprep.mubr.f32.mxu1 %v307_v25 }
  0xa7   : > { %503 = vmatmul.mubr.f32.gmra.mxu0 %v274_v26  ;;  %599 = vmatmul.mubr.f32.gmra.mxu1 %v306_v27 }
  0xa8   : > { %508 = vmatprep.mubr.f32.mxu0 %v277_v28  ;;  %604 = vmatprep.mubr.f32.mxu1 %v309_v29 }
  0xab   : > { %509 = vmatmul.mubr.f32.gmra.mxu0 %v276_v30  ;;  %605 = vmatmul.mubr.f32.gmra.mxu1 %v308_v31 }
  0xac   : > { %514 = vmatprep.mubr.f32.mxu0 %v279_v32  ;;  %610 = vmatprep.mubr.f32.mxu1 %v311_v33 }
  0xaf   : > { %515 = vmatmul.mubr.f32.gmra.mxu0 %v278_v34  ;;  %611 = vmatmul.mubr.f32.gmra.mxu1 %v310_v35 }
  0xb0   : > { %520 = vmatprep.mubr.f32.mxu0 %v281_v36  ;;  %616 = vmatprep.mubr.f32.mxu1 %v313_v37 }
  0xb3   : > { %521 = vmatmul.mubr.f32.gmra.mxu0 %v280_v38  ;;  %617 = vmatmul.mubr.f32.gmra.mxu1 %v312_v39 }
  0xb4   : > { %526 = vmatprep.mubr.f32.mxu0 %v283_v40  ;;  %622 = vmatprep.mubr.f32.mxu1 %v315_v41 }
  0xb7   : > { %527 = vmatmul.mubr.f32.gmra.mxu0 %v282_v42  ;;  %623 = vmatmul.mubr.f32.gmra.mxu1 %v314_v43 }
  0xb8   : > { %532 = vmatprep.mubr.f32.mxu0 %v285_v44  ;;  %628 = vmatprep.mubr.f32.mxu1 %v317_v45 }
  0xbb   : > { %533 = vmatmul.mubr.f32.gmra.mxu0 %v284_v46  ;;  %629 = vmatmul.mubr.f32.gmra.mxu1 %v316_v47 }
  0xbc   : > { %538 = vmatprep.mubr.f32.mxu0 %v287_v48  ;;  %634 = vmatprep.mubr.f32.mxu1 %v319_v49 }
  0xbf   : > { %539 = vmatmul.mubr.f32.gmra.mxu0 %v286_v50  ;;  %635 = vmatmul.mubr.f32.gmra.mxu1 %v318_v51 }
  0xc0   : > { %544 = vmatprep.mubr.f32.mxu0 %v289_v52  ;;  %640 = vmatprep.mubr.f32.mxu1 %v321_v53 }
  0xc3   : > { %545 = vmatmul.mubr.f32.gmra.mxu0 %v288_v54  ;;  %641 = vmatmul.mubr.f32.gmra.mxu1 %v320_v55 }
  0xc4   : > { %550 = vmatprep.mubr.f32.mxu0 %v291_v56  ;;  %646 = vmatprep.mubr.f32.mxu1 %v323_v57 }
  0xc7   : > { %551 = vmatmul.mubr.f32.gmra.mxu0 %v290_v58  ;;  %647 = vmatmul.mubr.f32.gmra.mxu1 %v322_v59 }
  0xc8   : > { %556 = vmatprep.mubr.f32.mxu0 %v293_v60  ;;  %652 = vmatprep.mubr.f32.mxu1 %v325_v61 }
  0xcb   : > { %557 = vmatmul.mubr.f32.gmra.mxu0 %v292_v62  ;;  %653 = vmatmul.mubr.f32.gmra.mxu1 %v324_v63 }
 0x14f   : > { %v468_v7 = vpop.f32.mrf.mxu0  ;;  %v564_v8 = vpop.f32.mrf.mxu1 }
 0x150   : > { %v469_v9 = vadd.f32 %v468_v7, %v5087_v5  ;;  %v565_v10 = vadd.f32 %v564_v8, %v5087_v5 }
 0x151   : > { %v470_v12 = vpop.f32.mrf.mxu0  ;;  %v566_v13 = vpop.f32.mrf.mxu1 }
 0x152   : > { %v691_v14 = vmax.f32 %v565_v10, 0.0  ;;  %v471_v15 = vadd.f32 %v470_v12, %v5090_v6  ;;  %v567_v16 = vadd.f32 %v566_v13, %v5090_v6  ;;  %v659_v17 = vmax.f32 %v469_v9, 0.0 }
 0x153   : > { %v474_v18 = vpop.f32.mrf.mxu0  ;;  %v570_v20 = vpop.f32.mrf.mxu1 }
 0x154   : > { %v660_v22 = vmax.f32 %v471_v15, 0.0  ;;  %v692_v23 = vmax.f32 %v567_v16, 0.0  ;;  %v475_v24 = vadd.f32 %v474_v18, %v5087_v5  ;;  %v571_v25 = vadd.f32 %v570_v20, %v5087_v5 }
 0x155   : > { %v476_v26 = vpop.f32.mrf.mxu0  ;;  %v572_v27 = vpop.f32.mrf.mxu1  ;;  %v767_v28 = vmul.f32 %v5100_v19, %v691_v14  ;;  %v735_v36 = vmul.f32 %v5100_v19, %v659_v17 }
 0x156   : > { %v693_v29 = vmax.f32 %v571_v25, 0.0  ;;  %v477_v30 = vadd.f32 %v476_v26, %v5090_v6  ;;  %v573_v31 = vadd.f32 %v572_v27, %v5090_v6  ;;  %v661_v32 = vmax.f32 %v475_v24, 0.0 }
 0x157   : > { %v480_v33 = vpop.f32.mrf.mxu0  ;;  %v576_v34 = vpop.f32.mrf.mxu1  ;;  %v768_v35 = vmul.f32 %v5103_v21, %v692_v23  ;;  %v736_v37 = vmul.f32 %v5103_v21, %v660_v22 }
 0x158   : > { %v769_v38 = vmul.f32 %v5100_v19, %v693_v29  ;;  %v662_v39 = vmax.f32 %v477_v30, 0.0  ;;  %v694_v40 = vmax.f32 %v573_v31, 0.0  ;;  %v481_v41 = vadd.f32 %v480_v33, %v5087_v5 }
 0x159   : > { %v577_v42 = vadd.f32 %v576_v34, %v5087_v5  ;;  %v482_v43 = vpop.f32.mrf.mxu0  ;;  %v578_v44 = vpop.f32.mrf.mxu1  ;;  %v847_v45 = vadd.f32 %v768_v35, %v767_v28  ;;  %v799_v46 = vadd.f32 %v736_v37, %v735_v36  ;;  %v737_v51 = vmul.f32 %v5100_v19, %v661_v32 }
 0x15a   : > { %v738_v47 = vmul.f32 %v5103_v21, %v662_v39  ;;  %v770_v48 = vmul.f32 %v5103_v21, %v694_v40  ;;  %v483_v49 = vadd.f32 %v482_v43, %v5090_v6  ;;  %v579_v50 = vadd.f32 %v578_v44, %v5090_v6 }
 0x15b   : > { %v663_v52 = vmax.f32 %v481_v41, 0.0  ;;  %v695_v53 = vmax.f32 %v577_v42, 0.0  ;;  %848 = vadd.xlane.f32.xlu1 %v847_v45  ;;  %800 = vadd.xlane.f32.xlu0 %v799_v46  ;;  %v486_v54 = vpop.f32.mrf.mxu0  ;;  %v582_v55 = vpop.f32.mrf.mxu1 }
 0x15c   : > { %v664_v56 = vmax.f32 %v483_v49, 0.0  ;;  %v696_v57 = vmax.f32 %v579_v50, 0.0  ;;  %v487_v58 = vadd.f32 %v486_v54, %v5087_v5  ;;  %v583_v59 = vadd.f32 %v582_v55, %v5087_v5 }
 0x15d   : > { %v739_v60 = vmul.f32 %v5100_v19, %v663_v52  ;;  %v771_v61 = vmul.f32 %v5100_v19, %v695_v53  ;;  %v488_v62 = vpop.f32.mrf.mxu0  ;;  %v584_v63 = vpop.f32.mrf.mxu1  ;;  %v850_v3 = vadd.f32 %v770_v48, %v769_v38  ;;  %v802_v7 = vadd.f32 %v738_v47, %v737_v51 }
 0x15e   : > { %v740_v8 = vmul.f32 %v5103_v21, %v664_v56  ;;  %v772_v9 = vmul.f32 %v5103_v21, %v696_v57  ;;  %v665_v10 = vmax.f32 %v487_v58, 0.0  ;;  %v697_v11 = vmax.f32 %v583_v59, 0.0 }
 0x15f   : > { %v489_v12 = vadd.f32 %v488_v62, %v5090_v6  ;;  %v585_v13 = vadd.f32 %v584_v63, %v5090_v6  ;;  %851 = vadd.xlane.f32.xlu1 %v850_v3  ;;  %803 = vadd.xlane.f32.xlu0 %v802_v7  ;;  %v492_v14 = vpop.f32.mrf.mxu0  ;;  %v588_v15 = vpop.f32.mrf.mxu1 }
 0x160   : > { %v741_v16 = vmul.f32 %v5100_v19, %v665_v10  ;;  %v773_v17 = vmul.f32 %v5100_v19, %v697_v11  ;;  %v493_v18 = vadd.f32 %v492_v14, %v5087_v5  ;;  %v589_v20 = vadd.f32 %v588_v15, %v5087_v5 }
 0x161   : > { %v666_v22 = vmax.f32 %v489_v12, 0.0  ;;  %v698_v23 = vmax.f32 %v585_v13, 0.0  ;;  %v494_v24 = vpop.f32.mrf.mxu0  ;;  %v590_v25 = vpop.f32.mrf.mxu1  ;;  %v853_v26 = vadd.f32 %v772_v9, %v771_v61  ;;  %v805_v27 = vadd.f32 %v740_v8, %v739_v60 }
 0x162   : > { %v667_v28 = vmax.f32 %v493_v18, 0.0  ;;  %v699_v29 = vmax.f32 %v589_v20, 0.0  ;;  %v495_v30 = vadd.f32 %v494_v24, %v5090_v6  ;;  %v591_v31 = vadd.f32 %v590_v25, %v5090_v6 }
 0x163   : > { %v742_v32 = vmul.f32 %v5103_v21, %v666_v22  ;;  %v774_v33 = vmul.f32 %v5103_v21, %v698_v23  ;;  %854 = vadd.xlane.f32.xlu1 %v853_v26  ;;  %806 = vadd.xlane.f32.xlu0 %v805_v27  ;;  %v498_v34 = vpop.f32.mrf.mxu0  ;;  %v594_v35 = vpop.f32.mrf.mxu1 }
 0x164   : > { %v743_v36 = vmul.f32 %v5100_v19, %v667_v28  ;;  %v775_v37 = vmul.f32 %v5100_v19, %v699_v29  ;;  %v668_v38 = vmax.f32 %v495_v30, 0.0  ;;  %v700_v39 = vmax.f32 %v591_v31, 0.0 }
 0x165   : > { %v499_v40 = vadd.f32 %v498_v34, %v5087_v5  ;;  %v595_v41 = vadd.f32 %v594_v35, %v5087_v5  ;;  %v500_v42 = vpop.f32.mrf.mxu0  ;;  %v596_v43 = vpop.f32.mrf.mxu1  ;;  %v856_v44 = vadd.f32 %v774_v33, %v773_v17  ;;  %v808_v45 = vadd.f32 %v742_v32, %v741_v16 }
 0x166   : > { %v744_v46 = vmul.f32 %v5103_v21, %v668_v38  ;;  %v776_v47 = vmul.f32 %v5103_v21, %v700_v39  ;;  %v501_v48 = vadd.f32 %v500_v42, %v5090_v6  ;;  %v597_v49 = vadd.f32 %v596_v43, %v5090_v6 }
 0x167   : > { %v669_v50 = vmax.f32 %v499_v40, 0.0  ;;  %v701_v51 = vmax.f32 %v595_v41, 0.0  ;;  %857 = vadd.xlane.f32.xlu1 %v856_v44  ;;  %809 = vadd.xlane.f32.xlu0 %v808_v45  ;;  %v504_v52 = vpop.f32.mrf.mxu0  ;;  %v600_v53 = vpop.f32.mrf.mxu1 }
 0x168   : > { %v670_v54 = vmax.f32 %v501_v48, 0.0  ;;  %v702_v55 = vmax.f32 %v597_v49, 0.0  ;;  %v505_v56 = vadd.f32 %v504_v52, %v5087_v5  ;;  %v601_v57 = vadd.f32 %v600_v53, %v5087_v5 }
 0x169   : > { %v745_v58 = vmul.f32 %v5100_v19, %v669_v50  ;;  %v777_v59 = vmul.f32 %v5100_v19, %v701_v51  ;;  %v506_v60 = vpop.f32.mrf.mxu0  ;;  %v602_v61 = vpop.f32.mrf.mxu1  ;;  %v859_v62 = vadd.f32 %v776_v47, %v775_v37  ;;  %v811_v63 = vadd.f32 %v744_v46, %v743_v36 }
 0x16a   : > { %v746_v3 = vmul.f32 %v5103_v21, %v670_v54  ;;  %v778_v7 = vmul.f32 %v5103_v21, %v702_v55  ;;  %v671_v8 = vmax.f32 %v505_v56, 0.0  ;;  %v703_v9 = vmax.f32 %v601_v57, 0.0 }
 0x16b   : > { %v507_v10 = vadd.f32 %v506_v60, %v5090_v6  ;;  %v603_v11 = vadd.f32 %v602_v61, %v5090_v6  ;;  %860 = vadd.xlane.f32.xlu1 %v859_v62  ;;  %812 = vadd.xlane.f32.xlu0 %v811_v63  ;;  %v510_v12 = vpop.f32.mrf.mxu0  ;;  %v606_v13 = vpop.f32.mrf.mxu1 }
 0x16c   : > { %v747_v14 = vmul.f32 %v5100_v19, %v671_v8  ;;  %v779_v15 = vmul.f32 %v5100_v19, %v703_v9  ;;  %v511_v16 = vadd.f32 %v510_v12, %v5087_v5  ;;  %v607_v17 = vadd.f32 %v606_v13, %v5087_v5 }
 0x16d   : > { %v672_v18 = vmax.f32 %v507_v10, 0.0  ;;  %v704_v20 = vmax.f32 %v603_v11, 0.0  ;;  %v512_v22 = vpop.f32.mrf.mxu0  ;;  %v608_v23 = vpop.f32.mrf.mxu1  ;;  %v862_v24 = vadd.f32 %v778_v7, %v777_v59  ;;  %v814_v25 = vadd.f32 %v746_v3, %v745_v58 }
 0x16e   : > { %v673_v26 = vmax.f32 %v511_v16, 0.0  ;;  %v705_v27 = vmax.f32 %v607_v17, 0.0  ;;  %v513_v28 = vadd.f32 %v512_v22, %v5090_v6  ;;  %v609_v29 = vadd.f32 %v608_v23, %v5090_v6 }
 0x16f   : > { %v748_v30 = vmul.f32 %v5103_v21, %v672_v18  ;;  %v780_v31 = vmul.f32 %v5103_v21, %v704_v20  ;;  %863 = vadd.xlane.f32.xlu1 %v862_v24  ;;  %815 = vadd.xlane.f32.xlu0 %v814_v25  ;;  %v516_v32 = vpop.f32.mrf.mxu0  ;;  %v612_v33 = vpop.f32.mrf.mxu1 }
 0x170   : > { %v749_v34 = vmul.f32 %v5100_v19, %v673_v26  ;;  %v781_v35 = vmul.f32 %v5100_v19, %v705_v27  ;;  %v674_v36 = vmax.f32 %v513_v28, 0.0  ;;  %v706_v37 = vmax.f32 %v609_v29, 0.0 }
 0x171   : > { %v517_v38 = vadd.f32 %v516_v32, %v5087_v5  ;;  %v613_v39 = vadd.f32 %v612_v33, %v5087_v5  ;;  %v518_v40 = vpop.f32.mrf.mxu0  ;;  %v614_v41 = vpop.f32.mrf.mxu1  ;;  %v865_v42 = vadd.f32 %v780_v31, %v779_v15  ;;  %v817_v43 = vadd.f32 %v748_v30, %v747_v14 }
 0x172   : > { %v750_v44 = vmul.f32 %v5103_v21, %v674_v36  ;;  %v782_v45 = vmul.f32 %v5103_v21, %v706_v37  ;;  %v519_v46 = vadd.f32 %v518_v40, %v5090_v6  ;;  %v615_v47 = vadd.f32 %v614_v41, %v5090_v6 }
 0x173   : > { %v675_v48 = vmax.f32 %v517_v38, 0.0  ;;  %v707_v49 = vmax.f32 %v613_v39, 0.0  ;;  %866 = vadd.xlane.f32.xlu1 %v865_v42  ;;  %818 = vadd.xlane.f32.xlu0 %v817_v43  ;;  %v522_v50 = vpop.f32.mrf.mxu0  ;;  %v618_v51 = vpop.f32.mrf.mxu1 }
 0x174   : > { %v676_v52 = vmax.f32 %v519_v46, 0.0  ;;  %v708_v53 = vmax.f32 %v615_v47, 0.0  ;;  %v523_v54 = vadd.f32 %v522_v50, %v5087_v5  ;;  %v619_v55 = vadd.f32 %v618_v51, %v5087_v5 }
 0x175   : > { %v751_v56 = vmul.f32 %v5100_v19, %v675_v48  ;;  %v783_v57 = vmul.f32 %v5100_v19, %v707_v49  ;;  %v524_v58 = vpop.f32.mrf.mxu0  ;;  %v620_v59 = vpop.f32.mrf.mxu1  ;;  %v868_v60 = vadd.f32 %v782_v45, %v781_v35  ;;  %v820_v61 = vadd.f32 %v750_v44, %v749_v34 }
 0x176   : > { %v752_v62 = vmul.f32 %v5103_v21, %v676_v52  ;;  %v784_v63 = vmul.f32 %v5103_v21, %v708_v53  ;;  %v677_v3 = vmax.f32 %v523_v54, 0.0  ;;  %v709_v7 = vmax.f32 %v619_v55, 0.0 }
 0x177   : > { %v525_v8 = vadd.f32 %v524_v58, %v5090_v6  ;;  %v621_v9 = vadd.f32 %v620_v59, %v5090_v6  ;;  %869 = vadd.xlane.f32.xlu1 %v868_v60  ;;  %821 = vadd.xlane.f32.xlu0 %v820_v61  ;;  %v528_v10 = vpop.f32.mrf.mxu0  ;;  %v624_v11 = vpop.f32.mrf.mxu1 }
 0x178   : > { %v753_v12 = vmul.f32 %v5100_v19, %v677_v3  ;;  %v785_v13 = vmul.f32 %v5100_v19, %v709_v7  ;;  %v529_v14 = vadd.f32 %v528_v10, %v5087_v5  ;;  %v625_v15 = vadd.f32 %v624_v11, %v5087_v5 }
 0x179   : > { %v678_v16 = vmax.f32 %v525_v8, 0.0  ;;  %v710_v17 = vmax.f32 %v621_v9, 0.0  ;;  %v530_v18 = vpop.f32.mrf.mxu0  ;;  %v626_v20 = vpop.f32.mrf.mxu1  ;;  %v871_v22 = vadd.f32 %v784_v63, %v783_v57  ;;  %v823_v23 = vadd.f32 %v752_v62, %v751_v56 }
 0x17a   : > { %v679_v24 = vmax.f32 %v529_v14, 0.0  ;;  %v711_v25 = vmax.f32 %v625_v15, 0.0  ;;  %v531_v26 = vadd.f32 %v530_v18, %v5090_v6  ;;  %v627_v27 = vadd.f32 %v626_v20, %v5090_v6 }
 0x17b   : > { %v754_v28 = vmul.f32 %v5103_v21, %v678_v16  ;;  %v786_v29 = vmul.f32 %v5103_v21, %v710_v17  ;;  %872 = vadd.xlane.f32.xlu1 %v871_v22  ;;  %824 = vadd.xlane.f32.xlu0 %v823_v23  ;;  %v534_v30 = vpop.f32.mrf.mxu0  ;;  %v630_v31 = vpop.f32.mrf.mxu1 }
 0x17c   : > { %v755_v32 = vmul.f32 %v5100_v19, %v679_v24  ;;  %v787_v33 = vmul.f32 %v5100_v19, %v711_v25  ;;  %v680_v34 = vmax.f32 %v531_v26, 0.0  ;;  %v712_v35 = vmax.f32 %v627_v27, 0.0 }
 0x17d   : > { %v535_v36 = vadd.f32 %v534_v30, %v5087_v5  ;;  %v631_v37 = vadd.f32 %v630_v31, %v5087_v5  ;;  %v536_v38 = vpop.f32.mrf.mxu0  ;;  %v632_v39 = vpop.f32.mrf.mxu1  ;;  %v874_v40 = vadd.f32 %v786_v29, %v785_v13  ;;  %v826_v41 = vadd.f32 %v754_v28, %v753_v12 }
 0x17e   : > { %v756_v42 = vmul.f32 %v5103_v21, %v680_v34  ;;  %v788_v43 = vmul.f32 %v5103_v21, %v712_v35  ;;  %v537_v44 = vadd.f32 %v536_v38, %v5090_v6  ;;  %v633_v45 = vadd.f32 %v632_v39, %v5090_v6 }
 0x17f   : > { %v681_v46 = vmax.f32 %v535_v36, 0.0  ;;  %v713_v47 = vmax.f32 %v631_v37, 0.0  ;;  %875 = vadd.xlane.f32.xlu1 %v874_v40  ;;  %827 = vadd.xlane.f32.xlu0 %v826_v41  ;;  %v540_v48 = vpop.f32.mrf.mxu0  ;;  %v636_v49 = vpop.f32.mrf.mxu1 }
 0x180   : > { %v682_v50 = vmax.f32 %v537_v44, 0.0  ;;  %v714_v51 = vmax.f32 %v633_v45, 0.0  ;;  %v541_v52 = vadd.f32 %v540_v48, %v5087_v5  ;;  %v637_v53 = vadd.f32 %v636_v49, %v5087_v5 }
 0x181   : > { %v757_v54 = vmul.f32 %v5100_v19, %v681_v46  ;;  %v789_v55 = vmul.f32 %v5100_v19, %v713_v47  ;;  %v542_v56 = vpop.f32.mrf.mxu0  ;;  %v638_v57 = vpop.f32.mrf.mxu1  ;;  %v877_v58 = vadd.f32 %v788_v43, %v787_v33  ;;  %v829_v59 = vadd.f32 %v756_v42, %v755_v32 }
 0x182   : > { %v758_v60 = vmul.f32 %v5103_v21, %v682_v50  ;;  %v790_v61 = vmul.f32 %v5103_v21, %v714_v51  ;;  %v683_v62 = vmax.f32 %v541_v52, 0.0  ;;  %v715_v63 = vmax.f32 %v637_v53, 0.0 }
 0x183   : > { %v543_v3 = vadd.f32 %v542_v56, %v5090_v6  ;;  %v639_v7 = vadd.f32 %v638_v57, %v5090_v6  ;;  %878 = vadd.xlane.f32.xlu1 %v877_v58  ;;  %830 = vadd.xlane.f32.xlu0 %v829_v59  ;;  %v546_v8 = vpop.f32.mrf.mxu0  ;;  %v642_v9 = vpop.f32.mrf.mxu1 }
 0x184   : > { %v759_v10 = vmul.f32 %v5100_v19, %v683_v62  ;;  %v791_v11 = vmul.f32 %v5100_v19, %v715_v63  ;;  %v547_v12 = vadd.f32 %v546_v8, %v5087_v5  ;;  %v643_v13 = vadd.f32 %v642_v9, %v5087_v5 }
 0x185   : > { %v684_v14 = vmax.f32 %v543_v3, 0.0  ;;  %v716_v15 = vmax.f32 %v639_v7, 0.0  ;;  %v548_v16 = vpop.f32.mrf.mxu0  ;;  %v644_v17 = vpop.f32.mrf.mxu1  ;;  %v880_v18 = vadd.f32 %v790_v61, %v789_v55  ;;  %v832_v20 = vadd.f32 %v758_v60, %v757_v54 }
 0x186   : > { %v685_v22 = vmax.f32 %v547_v12, 0.0  ;;  %v717_v23 = vmax.f32 %v643_v13, 0.0  ;;  %v549_v24 = vadd.f32 %v548_v16, %v5090_v6  ;;  %v645_v25 = vadd.f32 %v644_v17, %v5090_v6 }
 0x187   : > { %v760_v26 = vmul.f32 %v5103_v21, %v684_v14  ;;  %v792_v27 = vmul.f32 %v5103_v21, %v716_v15  ;;  %881 = vadd.xlane.f32.xlu1 %v880_v18  ;;  %833 = vadd.xlane.f32.xlu0 %v832_v20  ;;  %v552_v28 = vpop.f32.mrf.mxu0  ;;  %v648_v29 = vpop.f32.mrf.mxu1  ;;  %v5229_v15 = vstv %s895_s28 }
 0x188   : > { %v761_v30 = vmul.f32 %v5100_v19, %v685_v22  ;;  %v793_v31 = vmul.f32 %v5100_v19, %v717_v23  ;;  %v686_v32 = vmax.f32 %v549_v24, 0.0  ;;  %v718_v33 = vmax.f32 %v645_v25, 0.0 }
 0x189   : > { %v553_v34 = vadd.f32 %v552_v28, %v5087_v5  ;;  %v649_v35 = vadd.f32 %v648_v29, %v5087_v5  ;;  %v554_v36 = vpop.f32.mrf.mxu0  ;;  %v650_v37 = vpop.f32.mrf.mxu1  ;;  %v883_v38 = vadd.f32 %v792_v27, %v791_v11  ;;  %v835_v39 = vadd.f32 %v760_v26, %v759_v10 }
 0x18a   : > { %v762_v40 = vmul.f32 %v5103_v21, %v686_v32  ;;  %v794_v41 = vmul.f32 %v5103_v21, %v718_v33  ;;  %v555_v42 = vadd.f32 %v554_v36, %v5090_v6  ;;  %v651_v43 = vadd.f32 %v650_v37, %v5090_v6 }
 0x18b   : > { %v687_v44 = vmax.f32 %v553_v34, 0.0  ;;  %v719_v45 = vmax.f32 %v649_v35, 0.0  ;;  %884 = vadd.xlane.f32.xlu1 %v883_v38  ;;  %836 = vadd.xlane.f32.xlu0 %v835_v39  ;;  %v558_v46 = vpop.f32.mrf.mxu0  ;;  %v654_v47 = vpop.f32.mrf.mxu1 }
 0x18c   : > { %v688_v48 = vmax.f32 %v555_v42, 0.0  ;;  %v720_v49 = vmax.f32 %v651_v43, 0.0  ;;  %v559_v50 = vadd.f32 %v558_v46, %v5087_v5  ;;  %v655_v51 = vadd.f32 %v654_v47, %v5087_v5 }
 0x18d   : > { %v763_v52 = vmul.f32 %v5100_v19, %v687_v44  ;;  %v795_v53 = vmul.f32 %v5100_v19, %v719_v45  ;;  %v560_v54 = vpop.f32.mrf.mxu0  ;;  %v656_v55 = vpop.f32.mrf.mxu1  ;;  %v886_v56 = vadd.f32 %v794_v41, %v793_v31  ;;  %v838_v57 = vadd.f32 %v762_v40, %v761_v30 }
 0x18e   : > { %v764_v58 = vmul.f32 %v5103_v21, %v688_v48  ;;  %v796_v59 = vmul.f32 %v5103_v21, %v720_v49  ;;  %v689_v60 = vmax.f32 %v559_v50, 0.0  ;;  %v721_v61 = vmax.f32 %v655_v51, 0.0 }
 0x18f   : > { %v561_v62 = vadd.f32 %v560_v54, %v5090_v6  ;;  %v657_v63 = vadd.f32 %v656_v55, %v5090_v6  ;;  %887 = vadd.xlane.f32.xlu1 %v886_v56  ;;  %839 = vadd.xlane.f32.xlu0 %v838_v57  ;;  %v4838_v6 = vmov 0  }
 0x190   : > { %v889_v5 = vadd.f32 %v796_v59, %v795_v53  ;;  %v841_v3 = vadd.f32 %v764_v58, %v763_v52  ;;  %v765_v7 = vmul.f32 %v5100_v19, %v689_v60  ;;  %v797_v8 = vmul.f32 %v5100_v19, %v721_v61  ;;  %4580 = vset.pattern.permute.xlu0 %v4838_v6 }
 0x191   : > { %v690_v9 = vmax.f32 %v561_v62, 0.0  ;;  %v722_v10 = vmax.f32 %v657_v63, 0.0  ;;  %4581 = vset.pattern.permute.xlu1 %v4838_v6  ;;  %v4839_v60 = vmov 1966171168  }
 0x192   : > { %v2470_v61 = vunpack.c.l.s4 %v4839_v60 }
 0x193   : > { %v766_v11 = vmul.f32 %v5103_v21, %v690_v9  ;;  %v798_v12 = vmul.f32 %v5103_v21, %v722_v10  ;;  %890 = vadd.xlane.f32.xlu1 %v889_v5  ;;  %842 = vadd.xlane.f32.xlu0 %v841_v3 }
 0x195   : > { %v892_v13 = vadd.f32 %v798_v12, %v797_v8  ;;  %v844_v14 = vadd.f32 %v766_v11, %v765_v7  ;;  %v2471_v11 = vunpack.c.0.s8 %v2470_v61 }
 0x197   : > { %893 = vadd.xlane.f32.xlu1 %v892_v13  ;;  %845 = vadd.xlane.f32.xlu0 %v844_v14 }
 0x1e4   : > { %v849_v16 = vpop.xlane.xlu1 %848  ;;  %v801_v19 = vpop.xlane.xlu0 %800 }
 0x1e5   : > { %v5232_v17 = vadd.f32 %v5229_v15, %v849_v16  ;;  %v5235_v18 = vadd.f32 %v5229_v15, %v801_v19  ;;  %v5278_v16 = vsub.s32 2, %v5075_v1  ;;  %v5281_v19 = vsub.s32 3, %v5075_v1 }
 0x1e7   : > { %v977_v21 = vand.u32 2147483647, %v5232_v17  ;;  %v961_v20 = vand.u32 2147483647, %v5235_v18 }
 0x1e8   : > { %v852_v22 = vpop.xlane.xlu1 %851  ;;  %v804_v23 = vpop.xlane.xlu0 %803 }
 0x1e9   : > { %v1009_v24 = vsub.f32 0.0, %v977_v21  ;;  %v993_v25 = vsub.f32 0.0, %v961_v20  ;;  %v5240_v26 = vadd.f32 %v5229_v15, %v852_v22  ;;  %v5243_v27 = vadd.f32 %v5229_v15, %v804_v23 }
 0x1ea   : > { %v5284_v21 = vsub.s32 4, %v5075_v1  ;;  %v5287_v20 = vsub.s32 5, %v5075_v1  ;;  %v5290_v22 = vsub.s32 6, %v5075_v1 }
 0x1eb   : > { %v1057_v28 = vmul.f32 1.442695, %v1009_v24  ;;  %v1025_v29 = vmul.f32 1.442695, %v993_v25  ;;  %v978_v30 = vand.u32 2147483647, %v5240_v26 }
 0x1ec   : > { %v962_v31 = vand.u32 2147483647, %v5243_v27  ;;  %v855_v32 = vpop.xlane.xlu1 %854  ;;  %v807_v33 = vpop.xlane.xlu0 %806  ;;  %v5295_v25 = vsub.s32 7, %v5075_v1 }
 0x1ed   : > { %4582 = vpow2.f32 %v1057_v28  ;;  %v5248_v34 = vadd.f32 %v5229_v15, %v855_v32  ;;  %v5251_v35 = vadd.f32 %v5229_v15, %v807_v33  ;;  %v1010_v36 = vsub.f32 0.0, %v978_v30 }
 0x1ee   : > { %4584 = vpow2.f32 %v1025_v29  ;;  %v994_v37 = vsub.f32 0.0, %v962_v31  ;;  %v5298_v28 = vsub.s32 %v2471_v11, %v5075_v1  ;;  %v945_v30 = vmax.f32 %v5232_v17, 0.0 }
 0x1ef   : > { %v979_v38 = vand.u32 2147483647, %v5248_v34  ;;  %v963_v39 = vand.u32 2147483647, %v5251_v35  ;;  %v1059_v40 = vmul.f32 1.442695, %v1010_v36 }
 0x1f0   : > { %v1027_v41 = vmul.f32 1.442695, %v994_v37  ;;  %v858_v42 = vpop.xlane.xlu1 %857  ;;  %v810_v43 = vpop.xlane.xlu0 %809  ;;  %v929_v31 = vmax.f32 %v5235_v18, 0.0 }
 0x1f1   : > { %v1011_v44 = vsub.f32 0.0, %v979_v38  ;;  %v995_v45 = vsub.f32 0.0, %v963_v39  ;;  %v5256_v46 = vadd.f32 %v5229_v15, %v858_v42  ;;  %v5259_v47 = vadd.f32 %v5229_v15, %v810_v43 }
 0x1f2   : > { %4586 = vpow2.f32 %v1059_v40 }
 0x1f3   : > { %4588 = vpow2.f32 %v1027_v41  ;;  %v1061_v48 = vmul.f32 1.442695, %v1011_v44  ;;  %v1029_v49 = vmul.f32 1.442695, %v995_v45  ;;  %v980_v50 = vand.u32 2147483647, %v5256_v46 }
 0x1f4   : > { %v964_v51 = vand.u32 2147483647, %v5259_v47  ;;  %v861_v52 = vpop.xlane.xlu1 %860  ;;  %v813_v53 = vpop.xlane.xlu0 %812 }
 0x1f5   : > { %4590 = vpow2.f32 %v1061_v48  ;;  %v5264_v54 = vadd.f32 %v5229_v15, %v861_v52  ;;  %v5267_v55 = vadd.f32 %v5229_v15, %v813_v53  ;;  %v1012_v56 = vsub.f32 0.0, %v980_v50 }
 0x1f6   : > { %4592 = vpow2.f32 %v1029_v49  ;;  %v996_v57 = vsub.f32 0.0, %v964_v51 }
 0x1f7   : > { %v981_v58 = vand.u32 2147483647, %v5264_v54  ;;  %v965_v59 = vand.u32 2147483647, %v5267_v55  ;;  %v1063_v62 = vmul.f32 1.442695, %v1012_v56 }
 0x1f8   : > { %v1031_v63 = vmul.f32 1.442695, %v996_v57  ;;  %v864_v7 = vpop.xlane.xlu1 %863  ;;  %v816_v36 = vpop.xlane.xlu0 %815  ;;  %v6771_v57 = vmax.f32 %v5240_v26, 0.0 }
 0x1f9   : > { %v1013_v5 = vsub.f32 0.0, %v981_v58  ;;  %v997_v3 = vsub.f32 0.0, %v965_v59  ;;  %4594 = vpow2.f32 %v1063_v62  ;;  %v5275_v14 = vadd.f32 %v5229_v15, %v864_v7 }
 0x1fa   : > { %v4583_v8 = vpop.eup %4582  ;;  %4596 = vpow2.f32 %v1031_v63  ;;  %v5318_v49 = vadd.f32 %v5229_v15, %v816_v36 }
 0x1fb   : > { %v5271_v9 = vpop.eup %4584  ;;  %v1233_v10 = vadd.f32 1.0, %v4583_v8  ;;  %v1065_v13 = vmul.f32 1.442695, %v1013_v5  ;;  %v1033_v6 = vmul.f32 1.442695, %v997_v3  ;;  %v1236_v24 = vmul.f32 -0.5, %v4583_v8 }
 0x1fc   : > { %v1089_v12 = vadd.f32 1.0, %v5271_v9  ;;  %v982_v33 = vand.u32 2147483647, %v5275_v14  ;;  %v1092_v37 = vmul.f32 -0.5, %v5271_v9  ;;  %v1239_v50 = vand.u32 2147483647, %v4583_v8 }
 0x1fd   : > { %4598 = vlog2.f32 %v1233_v10  ;;  %v1237_v45 = vadd.f32 1.0, %v1236_v24  ;;  %v1095_v51 = vand.u32 2147483647, %v5271_v9  ;;  %v966_v7 = vand.u32 2147483647, %v5318_v49 }
 0x1fe   : > { %4600 = vlog2.f32 %v1089_v12  ;;  %v1014_v53 = vsub.f32 0.0, %v982_v33  ;;  %v1093_v56 = vadd.f32 1.0, %v1092_v37  ;;  %vm5336_vm0 = vcmp.lt.f32.partialorder %v1239_v50, 0.0004427343 }
 0x1ff   : > { %v5292_v23 = vpop.eup %4586  ;;  %4602 = vpow2.f32 %v1065_v13  ;;  %v5330_v5 = vmul.f32 %v4583_v8, %v1237_v45  ;;  %vm5340_vm1 = vcmp.lt.f32.partialorder %v1095_v51, 0.0004427343  ;;  %v998_v51 = vsub.f32 0.0, %v966_v7 }
 0x200   : > { %v5300_v29 = vpop.eup %4588  ;;  %v1242_v32 = vadd.f32 1.0, %v5292_v23  ;;  %4604 = vpow2.f32 %v1033_v6  ;;  %v1245_v60 = vmul.f32 -0.5, %v5292_v23  ;;  %v1067_v6 = vmul.f32 1.442695, %v1014_v53 }
 0x201   : > { %v1098_v39 = vadd.f32 1.0, %v5300_v29  ;;  %v1101_v3 = vmul.f32 -0.5, %v5300_v29  ;;  %v1248_v33 = vand.u32 2147483647, %v5292_v23  ;;  %v1104_v50 = vand.u32 2147483647, %v5300_v29 }
 0x202   : > { %v5309_v40 = vpop.eup %4590  ;;  %4606 = vlog2.f32 %v1242_v32  ;;  %v5348_v32 = vmul.f32 %v5271_v9, %v1093_v56  ;;  %v1035_v61 = vmul.f32 1.442695, %v998_v51 }
 0x203   : > { %v5314_v44 = vpop.eup %4592  ;;  %4608 = vlog2.f32 %v1098_v39  ;;  %v1251_v48 = vadd.f32 1.0, %v5309_v40  ;;  %v1254_v13 = vmul.f32 -0.5, %v5309_v40  ;;  %v867_v39 = vpop.xlane.xlu1 %866  ;;  %v1102_v53 = vadd.f32 1.0, %v1101_v3 }
 0x204   : > { %v1107_v52 = vadd.f32 1.0, %v5314_v44  ;;  %v1110_v36 = vmul.f32 -0.5, %v5314_v44  ;;  %v1257_v62 = vand.u32 2147483647, %v5309_v40  ;;  %vm5359_vm2 = vcmp.lt.f32.partialorder %v1248_v33, 0.0004427343 }
 0x205   : > { %4610 = vlog2.f32 %v1251_v48  ;;  %v1246_v48 = vadd.f32 1.0, %v1245_v60  ;;  %v1255_v24 = vadd.f32 1.0, %v1254_v13  ;;  %vm5366_vm3 = vcmp.lt.f32.partialorder %v1104_v50, 0.0004427343 }
 0x206   : > { %v5328_v63 = vpop.eup %4594  ;;  %4612 = vlog2.f32 %v1107_v52  ;;  %v1111_v7 = vadd.f32 1.0, %v1110_v36  ;;  %v1113_v13 = vand.u32 2147483647, %v5314_v44  ;;  %v1103_v50 = vmul.f32 %v5300_v29, %v1102_v53 }
 0x207   : > { %v5334_v10 = vpop.eup %4596  ;;  %v1260_v8 = vadd.f32 1.0, %v5328_v63  ;;  %v1263_v0 = vmul.f32 -0.5, %v5328_v63  ;;  %v870_v43 = vpop.xlane.xlu1 %869  ;;  %v5378_v41 = vmul.f32 %v5309_v40, %v1255_v24  ;;  %v1266_v38 = vand.u32 2147483647, %v5328_v63 }
 0x208   : > { %v1116_v37 = vadd.f32 1.0, %v5334_v10  ;;  %v1119_v9 = vmul.f32 -0.5, %v5334_v10  ;;  %vm5388_vm4 = vcmp.lt.f32.partialorder %v1257_v62, 0.0004427343  ;;  %v5393_v29 = vmul.f32 %v5314_v44, %v1111_v7 }
 0x209   : > { %4614 = vlog2.f32 %v1260_v8  ;;  %v819_v8 = vpop.xlane.xlu0 %818  ;;  %v1264_v51 = vadd.f32 1.0, %v1263_v0  ;;  %vm5395_vm5 = vcmp.lt.f32.partialorder %v1113_v13, 0.0004427343  ;;  %vm5426_vm6 = vcmp.lt.f32.partialorder %v1266_v38, 0.0004427343 }
 0x20a   : > { %v4599_v45 = vpop.eup %4598  ;;  %4616 = vlog2.f32 %v1116_v37  ;;  %v1120_v36 = vadd.f32 1.0, %v1119_v9 }
 0x20b   : > { %v4601_v52 = vpop.eup %4600  ;;  %4618 = vpow2.f32 %v1067_v6  ;;  %v1235_v59 = vmul.f32 0.6931472, %v4599_v45  ;;  %v5372_v6 = vadd.f32 %v5229_v15, %v867_v39  ;;  %v1247_v45 = vmul.f32 %v5292_v23, %v1246_v48  ;;  %v873_v13 = vpop.xlane.xlu1 %872 }
 0x20c   : > { %v5356_v56 = vpop.eup %4602  ;;  %v1091_v60 = vmul.f32 0.6931472, %v4601_v52  ;;  %4620 = vpow2.f32 %v1035_v61  ;;  %v5404_v12 = vmul.f32 %v5328_v63, %v1264_v51  ;;  %v5407_v44 = vmul.f32 %v5334_v10, %v1120_v36 }
 0x20d   : > { %v1269_v3 = vadd.f32 1.0, %v5356_v56  ;;  %v5364_v37 = vpop.eup %4604  ;;  %v1272_v61 = vmul.f32 -0.5, %v5356_v56  ;;  %v1241_v39 = vsel %vm5336_vm0, %v5330_v5, %v1235_v59  ;;  %v983_v59 = vand.u32 2147483647, %v5372_v6  ;;  %v822_v48 = vpop.xlane.xlu0 %821 }
 0x20e   : > { %v1125_v52 = vadd.f32 1.0, %v5364_v37  ;;  %v1097_v0 = vsel %vm5340_vm1, %v5348_v32, %v1091_v60  ;;  %v5401_v5 = vadd.f32 %v5229_v15, %v819_v8  ;;  %v1122_v32 = vand.u32 2147483647, %v5334_v10 }
 0x20f   : > { %v4607_v33 = vpop.eup %4606  ;;  %4622 = vlog2.f32 %v1269_v3  ;;  %v5412_v9 = vadd.f32 %v1241_v39, %v945_v30  ;;  %v1273_v60 = vadd.f32 1.0, %v1272_v61  ;;  %v1275_v7 = vand.u32 2147483647, %v5356_v56 }
 0x210   : > { %v4609_v42 = vpop.eup %4608  ;;  %v1244_v40 = vmul.f32 0.6931472, %v4607_v33  ;;  %4624 = vlog2.f32 %v1125_v52  ;;  %v1015_v3 = vsub.f32 0.0, %v983_v59  ;;  %v1128_v63 = vmul.f32 -0.5, %v5364_v37 }
 0x211   : > { %v1100_v62 = vmul.f32 0.6931472, %v4609_v42  ;;  %v5417_v42 = vadd.f32 %v1097_v0, %v929_v31  ;;  %v967_v8 = vand.u32 2147483647, %v5401_v5  ;;  %v5422_v10 = vadd.f32 %v5229_v15, %v870_v43 }
 0x212   : > { %v4611_v11 = vpop.eup %4610  ;;  %v1250_v17 = vsel %vm5359_vm2, %v1247_v45, %v1244_v40  ;;  %v1069_v51 = vmul.f32 1.442695, %v1015_v3  ;;  %v5431_v18 = vadd.f32 %v5229_v15, %v822_v48  ;;  %vm5435_vm7 = vcmp.lt.f32.partialorder %v1122_v32, 0.0004427343  ;;  %v825_v32 = vpop.xlane.xlu0 %824 }
 0x213   : > { %v4613_v53 = vpop.eup %4612  ;;  %v1253_v30 = vmul.f32 0.6931472, %v4611_v11  ;;  %v1106_v36 = vsel %vm5366_vm3, %v1103_v50, %v1100_v62  ;;  %v999_v58 = vsub.f32 0.0, %v967_v8  ;;  %v984_v45 = vand.u32 2147483647, %v5422_v10 }
 0x214   : > { %v1109_v52 = vmul.f32 0.6931472, %v4613_v53  ;;  %v5441_v61 = vmul.f32 %v5356_v56, %v1273_v60  ;;  %v1131_v39 = vand.u32 2147483647, %v5364_v37  ;;  %4626 = vpow2.f32 %v1069_v51 }
 0x215   : > { %v5449_v50 = vadd.f32 %v1250_v17, %v6771_v57  ;;  %v1129_v59 = vadd.f32 1.0, %v1128_v63  ;;  %v1037_v11 = vmul.f32 1.442695, %v999_v58  ;;  %v1016_v62 = vsub.f32 0.0, %v984_v45 }
 0x216   : > { %v4615_v31 = vpop.eup %4614  ;;  %v6772_v48 = vmax.f32 %v5243_v27, 0.0  ;;  %v1259_v56 = vsel %vm5388_vm4, %v5378_v41, %v1253_v30  ;;  %v968_v3 = vand.u32 2147483647, %v5431_v18  ;;  %v1115_v26 = vsel %vm5395_vm5, %v5393_v29, %v1109_v52  ;;  %v876_v27 = vpop.xlane.xlu1 %875 }
 0x217   : > { %v4617_v38 = vpop.eup %4616  ;;  %v1262_v63 = vmul.f32 0.6931472, %v4615_v31  ;;  %4628 = vpow2.f32 %v1037_v11  ;;  %v1071_v17 = vmul.f32 1.442695, %v1016_v62  ;;  %vm5465_vm8 = vcmp.lt.f32.partialorder %v1275_v7, 0.0004427343  ;;  %v828_v11 = vpop.xlane.xlu0 %827 }
 0x218   : > { %v5445_v40 = vpop.eup %4618  ;;  %v5453_v53 = vadd.f32 %v1106_v36, %v6772_v48  ;;  %v1118_v51 = vmul.f32 0.6931472, %v4617_v38  ;;  %v5471_v23 = vadd.f32 %v5229_v15, %v873_v13  ;;  %v6775_v30 = vmax.f32 %v5248_v34, 0.0 }
 0x219   : > { %v1278_v60 = vadd.f32 1.0, %v5445_v40  ;;  %v5460_v8 = vpop.eup %4620  ;;  %v1281_v41 = vmul.f32 -0.5, %v5445_v40  ;;  %v1130_v29 = vmul.f32 %v5364_v37, %v1129_v59  ;;  %vm5478_vm9 = vcmp.lt.f32.partialorder %v1131_v39, 0.0004427343 }
 0x21a   : > { %v5475_v58 = vadd.f32 %v1259_v56, %v6775_v30  ;;  %v1134_v7 = vadd.f32 1.0, %v5460_v8  ;;  %v6778_v45 = vmax.f32 %v5251_v35, 0.0  ;;  %v1000_v34 = vsub.f32 0.0, %v968_v3 }
 0x21b   : > { %4630 = vlog2.f32 %v1278_v60  ;;  %v1268_v37 = vsel %vm5426_vm6, %v5404_v12, %v1262_v63  ;;  %v1284_v39 = vand.u32 2147483647, %v5445_v40  ;;  %v1124_v35 = vsel %vm5435_vm7, %v5407_v44, %v1118_v51  ;;  %v831_v24 = vpop.xlane.xlu0 %830 }
 0x21c   : > { %v4623_v52 = vpop.eup %4622  ;;  %v5486_v38 = vadd.f32 %v1115_v26, %v6778_v45  ;;  %4632 = vpow2.f32 %v1071_v17  ;;  %v1282_v62 = vadd.f32 1.0, %v1281_v41  ;;  %v1039_v48 = vmul.f32 1.442695, %v1000_v34  ;;  %v879_v26 = vpop.xlane.xlu1 %878 }
 0x21d   : > { %v4625_v57 = vpop.eup %4624  ;;  %4634 = vlog2.f32 %v1134_v7  ;;  %v985_v56 = vand.u32 2147483647, %v5471_v23  ;;  %v1271_v60 = vmul.f32 0.6931472, %v4623_v52  ;;  %v1137_v3 = vmul.f32 -0.5, %v5460_v8 }
 0x21e   : > { %v5500_v33 = vadd.f32 %v5229_v15, %v825_v32  ;;  %v5503_v12 = vadd.f32 %v5229_v15, %v876_v27  ;;  %v1127_v63 = vmul.f32 0.6931472, %v4625_v57  ;;  %4636 = vpow2.f32 %v1039_v48 }
 0x21f   : > { %v1017_v17 = vsub.f32 0.0, %v985_v56  ;;  %v5506_v43 = vadd.f32 %v5229_v15, %v828_v11  ;;  %v6779_v44 = vmax.f32 %v5256_v46, 0.0  ;;  %v6781_v41 = vmax.f32 %v5259_v47, 0.0 }
 0x220   : > { %v969_v32 = vand.u32 2147483647, %v5500_v33  ;;  %v986_v27 = vand.u32 2147483647, %v5503_v12  ;;  %v1140_v7 = vand.u32 2147483647, %v5460_v8  ;;  %v5521_v34 = vadd.f32 %v5229_v15, %v879_v26 }
 0x221   : > { %v5510_v51 = vadd.f32 %v1268_v37, %v6779_v44  ;;  %v5514_v30 = vadd.f32 %v1124_v35, %v6781_v41  ;;  %v1073_v52 = vmul.f32 1.442695, %v1017_v17  ;;  %v970_v45 = vand.u32 2147483647, %v5506_v43  ;;  %v4627_v57 = vpop.eup %4626 }
 0x222   : > { %v1277_v46 = vsel %vm5465_vm8, %v5441_v61, %v1271_v60  ;;  %v1138_v47 = vadd.f32 1.0, %v1137_v3  ;;  %v1001_v37 = vsub.f32 0.0, %v969_v32  ;;  %v1018_v11 = vsub.f32 0.0, %v986_v27 }
 0x223   : > { %6780 = vst [vmem:[#allocation13_spill] sm:$0xff] %v5510_v51  ;;  %v1133_v35 = vsel %vm5478_vm9, %v1130_v29, %v1127_v63  ;;  %v1283_v48 = vmul.f32 %v5445_v40, %v1282_v62  ;;  %v1287_v56 = vadd.f32 1.0, %v4627_v57  ;;  %4638 = vpow2.f32 %v1073_v52 }
 0x224   : > { %vm5529_vm10 = vcmp.lt.f32.partialorder %v1284_v39, 0.0004427343  ;;  %v1041_v44 = vmul.f32 1.442695, %v1001_v37  ;;  %v1075_v41 = vmul.f32 1.442695, %v1018_v11  ;;  %v4629_v61 = vpop.eup %4628  ;;  %v1139_v32 = vmul.f32 %v5460_v8, %v1138_v47 }
 0x225   : > { %v1002_v36 = vsub.f32 0.0, %v970_v45  ;;  %v6784_v60 = vmax.f32 %v5264_v54, 0.0  ;;  %vm5538_vm11 = vcmp.lt.f32.partialorder %v1140_v7, 0.0004427343  ;;  %4640 = vlog2.f32 %v1287_v56  ;;  %v882_v45 = vpop.xlane.xlu1 %881 }
 0x226   : > { %v987_v40 = vand.u32 2147483647, %v5521_v34  ;;  %v6787_v62 = vmax.f32 %v5267_v55, 0.0  ;;  %v1143_v27 = vadd.f32 1.0, %v4629_v61  ;;  %4642 = vpow2.f32 %v1041_v44 }
 0x227   : > { %v5536_v3 = vadd.f32 %v1277_v46, %v6784_v60  ;;  %v1290_v54 = vmul.f32 -0.5, %v4627_v57  ;;  %4644 = vpow2.f32 %v1075_v41  ;;  %v1043_v7 = vmul.f32 1.442695, %v1002_v36 }
 0x228   : > { %v4631_v39 = vpop.eup %4630  ;;  %v5545_v63 = vadd.f32 %v1133_v35, %v6787_v62  ;;  %4646 = vlog2.f32 %v1143_v27  ;;  %v1146_v37 = vmul.f32 -0.5, %v4629_v61  ;;  %v1019_v11 = vsub.f32 0.0, %v987_v40 }
 0x229   : > { %v4633_v46 = vpop.eup %4632  ;;  %v5550_v56 = vadd.f32 %v5229_v15, %v831_v24  ;;  %v1280_v35 = vmul.f32 0.6931472, %v4631_v39  ;;  %v1293_v60 = vand.u32 2147483647, %v4627_v57  ;;  %4648 = vpow2.f32 %v1043_v7  ;;  %v834_v39 = vpop.xlane.xlu0 %833 }
 0x22a   : > { %6788 = vst [vmem:[#allocation14_spill] sm:$0xff] %v5545_v63  ;;  %v4635_v55 = vpop.eup %4634  ;;  %v1296_v62 = vadd.f32 1.0, %v4633_v46  ;;  %v5555_v41 = vadd.f32 %v5229_v15, %v882_v45  ;;  %v1291_v36 = vadd.f32 1.0, %v1290_v54  ;;  %v1299_v27 = vmul.f32 -0.5, %v4633_v46 }
 0x22b   : > { %v1136_v47 = vmul.f32 0.6931472, %v4635_v55  ;;  %v1077_v40 = vmul.f32 1.442695, %v1019_v11  ;;  %v5557_v52 = vpop.eup %4636  ;;  %v1147_v24 = vadd.f32 1.0, %v1146_v37  ;;  %v1286_v55 = vsel %vm5529_vm10, %v1283_v48, %v1280_v35 }
 0x22c   : > { %4650 = vlog2.f32 %v1296_v62  ;;  %v1149_v26 = vand.u32 2147483647, %v4629_v61  ;;  %v971_v59 = vand.u32 2147483647, %v5550_v56  ;;  %vm5563_vm12 = vcmp.lt.f32.partialorder %v1293_v60, 0.0004427343 }
 0x22d   : > { %v1302_v45 = vand.u32 2147483647, %v4633_v46  ;;  %v1152_v54 = vadd.f32 1.0, %v5557_v52  ;;  %v1142_v11 = vsel %vm5538_vm11, %v1139_v32, %v1136_v47  ;;  %4652 = vpow2.f32 %v1077_v40 }
 0x22e   : > { %v1003_v37 = vsub.f32 0.0, %v971_v59  ;;  %v988_v62 = vand.u32 2147483647, %v5555_v41  ;;  %v1292_v44 = vmul.f32 %v4627_v57, %v1291_v36  ;;  %v1300_v8 = vadd.f32 1.0, %v1299_v27  ;;  %v837_v27 = vpop.xlane.xlu0 %836 }
 0x22f   : > { %4654 = vlog2.f32 %v1152_v54  ;;  %v1155_v48 = vmul.f32 -0.5, %v5557_v52  ;;  %v6791_v35 = vmax.f32 %v5275_v14, 0.0  ;;  %v1148_v13 = vmul.f32 %v4629_v61, %v1147_v24 }
 0x230   : > { %v4639_v17 = vpop.eup %4638  ;;  %vm5576_vm13 = vcmp.lt.f32.partialorder %v1149_v26, 0.0004427343  ;;  %v1045_v29 = vmul.f32 1.442695, %v1003_v37  ;;  %v1020_v59 = vsub.f32 0.0, %v988_v62  ;;  %v6795_v32 = vmax.f32 %v5318_v49, 0.0 }
 0x231   : > { %v5574_v60 = vadd.f32 %v1286_v55, %v6791_v35  ;;  %v1305_v57 = vadd.f32 1.0, %v4639_v17  ;;  %vm5586_vm14 = vcmp.lt.f32.partialorder %v1302_v45, 0.0004427343  ;;  %v1308_v26 = vmul.f32 -0.5, %v4639_v17  ;;  %v885_v55 = vpop.xlane.xlu1 %884 }
 0x232   : > { %v5582_v47 = vadd.f32 %v1142_v11, %v6795_v32  ;;  %v4641_v40 = vpop.eup %4640  ;;  %4656 = vpow2.f32 %v1045_v29  ;;  %v1079_v61 = vmul.f32 1.442695, %v1020_v59  ;;  %v5591_v24 = vadd.f32 %v5229_v15, %v834_v39 }
 0x233   : > { %6792 = vst [vmem:[#allocation15_spill] sm:$0xff] %v5574_v60  ;;  %v4643_v49 = vpop.eup %4642  ;;  %v5593_v54 = vmul.f32 %v4633_v46, %v1300_v8  ;;  %v1156_v11 = vadd.f32 1.0, %v1155_v48  ;;  %v1158_v37 = vand.u32 2147483647, %v5557_v52  ;;  %4658 = vlog2.f32 %v1305_v57 }
 0x234   : > { %6796 = vst [vmem:[#allocation16_spill] sm:$0xff] %v5582_v47  ;;  %v4645_v62 = vpop.eup %4644  ;;  %v1289_v35 = vmul.f32 0.6931472, %v4641_v40  ;;  %v1161_v45 = vadd.f32 1.0, %v4643_v49  ;;  %v1164_v32 = vmul.f32 -0.5, %v4643_v49  ;;  %4660 = vpow2.f32 %v1079_v61 }
 0x235   : > { %v4647_v36 = vpop.eup %4646  ;;  %v1311_v29 = vand.u32 2147483647, %v4639_v17  ;;  %v1314_v59 = vadd.f32 1.0, %v4645_v62  ;;  %v1317_v0 = vmul.f32 -0.5, %v4645_v62  ;;  %v5597_v39 = vadd.f32 %v5229_v15, %v885_v55 }
 0x236   : > { %v1145_v1 = vmul.f32 0.6931472, %v4647_v36  ;;  %v1309_v46 = vadd.f32 1.0, %v1308_v26  ;;  %4662 = vlog2.f32 %v1161_v45  ;;  %v972_v8 = vand.u32 2147483647, %v5591_v24  ;;  %v4649_v48 = vpop.eup %4648 }
 0x237   : > { %v5601_v57 = vmul.f32 %v5557_v52, %v1156_v11  ;;  %v1167_v40 = vand.u32 2147483647, %v4643_v49  ;;  %4664 = vlog2.f32 %v1314_v59  ;;  %v5604_v61 = vadd.f32 %v5229_v15, %v837_v27 }
 0x238   : > { %v1295_v47 = vsel %vm5563_vm12, %v1292_v44, %v1289_v35  ;;  %v1165_v55 = vadd.f32 1.0, %v1164_v32  ;;  %v1318_v63 = vadd.f32 1.0, %v1317_v0  ;;  %v1170_v36 = vadd.f32 1.0, %v4649_v48 }
 0x239   : > { %v4651_v60 = vpop.eup %4650  ;;  %v1151_v26 = vsel %vm5576_vm13, %v1148_v13, %v1145_v1  ;;  %vm5610_vm15 = vcmp.lt.f32.partialorder %v1158_v37, 0.0004427343  ;;  %v1173_v52 = vmul.f32 -0.5, %v4649_v48  ;;  %v5615_v27 = vmul.f32 %v4639_v17, %v1309_v46 }
 0x23a   : > { %v1298_v45 = vmul.f32 0.6931472, %v4651_v60  ;;  %vm5617_vm0 = vcmp.lt.f32.partialorder %v1311_v29, 0.0004427343  ;;  %4666 = vlog2.f32 %v1170_v36  ;;  %v1004_v0 = vsub.f32 0.0, %v972_v8  ;;  %v4653_v44 = vpop.eup %4652 }
 0x23b   : > { %v6803_v31 = vmax.f32 %v5372_v6, 0.0  ;;  %vm5625_vm1 = vcmp.lt.f32.partialorder %v1167_v40, 0.0004427343  ;;  %v1320_v7 = vand.u32 2147483647, %v4645_v62  ;;  %v6806_v37 = vmax.f32 %v5401_v5, 0.0  ;;  %v888_v5 = vpop.xlane.xlu1 %887 }
 0x23c   : > { %v989_v60 = vand.u32 2147483647, %v5597_v39  ;;  %v4655_v17 = vpop.eup %4654  ;;  %v5634_v32 = vmul.f32 %v4643_v49, %v1165_v55  ;;  %v5636_v29 = vmul.f32 %v4645_v62, %v1318_v63  ;;  %v1323_v46 = vadd.f32 1.0, %v4653_v44 }
 0x23d   : > { %v5623_v1 = vadd.f32 %v1295_v47, %v6803_v31  ;;  %v5632_v35 = vadd.f32 %v1151_v26, %v6806_v37  ;;  %v1304_v6 = vsel %vm5586_vm14, %v5593_v54, %v1298_v45  ;;  %v1174_v47 = vadd.f32 1.0, %v1173_v52 }
 0x23e   : > { %v1176_v8 = vand.u32 2147483647, %v4649_v48  ;;  %v1021_v40 = vsub.f32 0.0, %v989_v60  ;;  %v1154_v36 = vmul.f32 0.6931472, %v4655_v17  ;;  %4668 = vlog2.f32 %v1323_v46 }
 0x23f   : > { %6807 = vst [vmem:[#allocation17_spill] sm:$0xff] %v5632_v35  ;;  %v1047_v31 = vmul.f32 1.442695, %v1004_v0  ;;  %v973_v11 = vand.u32 2147483647, %v5604_v61  ;;  %v4657_v26 = vpop.eup %4656  ;;  %v1326_v63 = vmul.f32 -0.5, %v4653_v44  ;;  %v5655_v35 = vadd.f32 %v5229_v15, %v888_v5 }
 0x240   : > { %vm5642_vm2 = vcmp.lt.f32.partialorder %v1320_v7, 0.0004427343  ;;  %v1081_v55 = vmul.f32 1.442695, %v1021_v40  ;;  %v4659_v54 = vpop.eup %4658  ;;  %v6810_v45 = vmax.f32 %v5422_v10, 0.0  ;;  %v1179_v60 = vadd.f32 1.0, %v4657_v26 }
 0x241   : > { %v1329_v0 = vand.u32 2147483647, %v4653_v44  ;;  %v1182_v17 = vmul.f32 -0.5, %v4657_v26  ;;  %v4661_v37 = vpop.eup %4660  ;;  %v1307_v46 = vmul.f32 0.6931472, %v4659_v54  ;;  %v5652_v7 = vmul.f32 %v4649_v48, %v1174_v47  ;;  %v840_v47 = vpop.xlane.xlu0 %839 }
 0x242   : > { %v5650_v52 = vadd.f32 %v1304_v6, %v6810_v45  ;;  %4670 = vpow2.f32 %v1047_v31  ;;  %v1160_v40 = vsel %vm5610_vm15, %v5601_v57, %v1154_v36  ;;  %v1332_v14 = vadd.f32 1.0, %v4661_v37  ;;  %v891_v57 = vpop.xlane.xlu1 %890 }
 0x243   : > { %4672 = vlog2.f32 %v1179_v60  ;;  %v1005_v10 = vsub.f32 0.0, %v973_v11  ;;  %v4663_v6 = vpop.eup %4662  ;;  %vm5660_vm3 = vcmp.lt.f32.partialorder %v1176_v8, 0.0004427343  ;;  %v1327_v62 = vadd.f32 1.0, %v1326_v63 }
 0x244   : > { %6811 = vst [vmem:[#allocation18_spill] sm:$0xff] %v5650_v52  ;;  %v1185_v54 = vand.u32 2147483647, %v4657_v26  ;;  %v1335_v48 = vmul.f32 -0.5, %v4661_v37  ;;  %4674 = vpow2.f32 %v1081_v55  ;;  %v4665_v31 = vpop.eup %4664  ;;  %v1163_v5 = vmul.f32 0.6931472, %v4663_v6 }
 0x245   : > { %vm5664_vm4 = vcmp.lt.f32.partialorder %v1329_v0, 0.0004427343  ;;  %v1183_v51 = vadd.f32 1.0, %v1182_v17  ;;  %4676 = vlog2.f32 %v1332_v14  ;;  %v6816_v11 = vmax.f32 %v5431_v18, 0.0 }
 0x246   : > { %v1313_v36 = vsel %vm5617_vm0, %v5615_v27, %v1307_v46  ;;  %v1316_v63 = vmul.f32 0.6931472, %v4665_v31  ;;  %v1336_v55 = vadd.f32 1.0, %v1335_v48  ;;  %v1169_v0 = vsel %vm5625_vm1, %v5634_v32, %v1163_v5 }
 0x247   : > { %v5670_v8 = vadd.f32 %v1160_v40, %v6816_v11  ;;  %v1049_v60 = vmul.f32 1.442695, %v1005_v10  ;;  %v990_v6 = vand.u32 2147483647, %v5655_v35  ;;  %v5680_v14 = vadd.f32 %v5229_v15, %v840_v47  ;;  %v4667_v17 = vpop.eup %4666  ;;  %v843_v40 = vpop.xlane.xlu0 %842 }
 0x248   : > { %v1328_v18 = vmul.f32 %v4653_v44, %v1327_v62  ;;  %vm5682_vm5 = vcmp.lt.f32.partialorder %v1185_v54, 0.0004427343  ;;  %v1338_v59 = vand.u32 2147483647, %v4661_v37  ;;  %v5687_v27 = vadd.f32 %v5229_v15, %v891_v57 }
 0x249   : > { %6817 = vst [vmem:[#allocation19_spill] sm:$0xff] %v5670_v8  ;;  %v6820_v46 = vmax.f32 %v5471_v23, 0.0  ;;  %v1184_v32 = vmul.f32 %v4657_v26, %v1183_v51  ;;  %4678 = vpow2.f32 %v1049_v60  ;;  %v1022_v10 = vsub.f32 0.0, %v990_v6 }
 0x24a   : > { %v6821_v48 = vmax.f32 %v5500_v33, 0.0  ;;  %v974_v62 = vand.u32 2147483647, %v5680_v14  ;;  %v991_v54 = vand.u32 2147483647, %v5687_v27  ;;  %v1322_v31 = vsel %vm5642_vm2, %v5636_v29, %v1316_v63 }
 0x24b   : > { %v5691_v13 = vadd.f32 %v1313_v36, %v6820_v46  ;;  %v1172_v23 = vmul.f32 0.6931472, %v4667_v17  ;;  %v5703_v5 = vmul.f32 %v4661_v37, %v1336_v55  ;;  %v1083_v26 = vmul.f32 1.442695, %v1022_v10  ;;  %v4669_v51 = vpop.eup %4668 }
 0x24c   : > { %v5695_v47 = vadd.f32 %v1169_v0, %v6821_v48  ;;  %vm5705_vm6 = vcmp.lt.f32.partialorder %v1338_v59, 0.0004427343  ;;  %v1006_v33 = vsub.f32 0.0, %v974_v62  ;;  %v1023_v11 = vsub.f32 0.0, %v991_v54 }
 0x24d   : > { %v1444_v36 = vrot.slane %v5417_v42, %v5078_v2  ;;  %v1448_v0 = vrot.slane %v5417_v42, %v5084_v4  ;;  %v1325_v60 = vmul.f32 0.6931472, %v4669_v51  ;;  %4680 = vpow2.f32 %v1083_v26 }
 0x24e   : > { %6822 = vst [vmem:[#allocation20_spill] sm:$0xff] %v5695_v47  ;;  %v1452_v29 = vrot.slane %v5417_v42, %v5278_v16  ;;  %v1456_v49 = vrot.slane %v5417_v42, %v5281_v19  ;;  %v1051_v37 = vmul.f32 1.442695, %v1006_v33  ;;  %v1460_v63 = vrot.slane %v5417_v42, %v5284_v21 }
 0x24f   : > { %v1464_v55 = vrot.slane %v5417_v42, %v5287_v20  ;;  %v1468_v6 = vrot.slane %v5417_v42, %v5290_v22  ;;  %v4671_v17 = vpop.eup %4670  ;;  %v6825_v59 = vmax.f32 %v5503_v12, 0.0  ;;  %v1178_v10 = vsel %vm5660_vm3, %v5652_v7, %v1172_v23 }
 0x250   : > { %v1472_v62 = vrot.slane %v5417_v42, %v5295_v25  ;;  %v4673_v54 = vpop.eup %4672  ;;  %v1331_v26 = vsel %vm5664_vm4, %v1328_v18, %v1325_v60  ;;  %v1188_v51 = vadd.f32 1.0, %v4671_v17  ;;  %v1085_v33 = vmul.f32 1.442695, %v1023_v11 }
 0x251   : > { %v5725_v46 = vadd.f32 %v1322_v31, %v6825_v59  ;;  %v2465_v44 = vcombine.low %v1444_v36, %v1448_v0  ;;  %v4675_v47 = vpop.eup %4674  ;;  %v1181_v12 = vmul.f32 0.6931472, %v4673_v54  ;;  %v1191_v31 = vmul.f32 -0.5, %v4671_v17 }
 0x252   : > { %4682 = vpow2.f32 %v1051_v37  ;;  %v2466_v59 = vcombine.low %v1452_v29, %v1456_v49  ;;  %v1341_v7 = vadd.f32 1.0, %v4675_v47  ;;  %v2467_v45 = vcombine.low %v1460_v63, %v1464_v55 }
 0x253   : > { %6826 = vst [vmem:[#allocation21_spill] sm:$0xff] %v5725_v46  ;;  %v4677_v46 = vpop.eup %4676  ;;  %4684 = vlog2.f32 %v1188_v51  ;;  %v2468_v23 = vcombine.low %v1468_v6, %v1472_v62  ;;  %v1187_v42 = vsel %vm5682_vm5, %v1184_v32, %v1181_v12  ;;  %v1194_v8 = vand.u32 2147483647, %v4671_v17  ;;  %v894_v32 = vpop.xlane.xlu1 %893 }
 0x254   : > { %v1334_v48 = vmul.f32 0.6931472, %v4677_v46  ;;  %v1344_v52 = vmul.f32 -0.5, %v4675_v47  ;;  %v6827_v18 = vmax.f32 %v5506_v43, 0.0  ;;  %4686 = vlog2.f32 %v1341_v7 }
 0x255   : > { %v959_v36 = vmax.f32 %v5687_v27, 0.0  ;;  %v2475_v0 = vrot.slane %v2465_v44, %v5298_v28  ;;  %v6828_v60 = vmax.f32 %v5521_v34, 0.0  ;;  %v1192_v49 = vadd.f32 1.0, %v1191_v31 }
 0x256   : > { %v5739_v11 = vadd.f32 %v1178_v10, %v6827_v18  ;;  %v1347_v37 = vand.u32 2147483647, %v4675_v47  ;;  %4688 = vpow2.f32 %v1085_v33  ;;  %v4679_v63 = vpop.eup %4678  ;;  %v6829_v55 = vmax.f32 %v5550_v56, 0.0 }
 0x257   : > { %v5745_v29 = vadd.f32 %v1331_v26, %v6828_v60  ;;  %v2482_v6 = vrot.slane %v2466_v59, %v5298_v28  ;;  %v2489_v46 = vrot.slane %v2467_v45, %v5298_v28  ;;  %v2496_v44 = vrot.slane %v2468_v23, %v5298_v28 }
 0x258   : > { %v5749_v43 = vadd.f32 %v1187_v42, %v6829_v55  ;;  %v1340_v34 = vsel %vm5705_vm6, %v5703_v5, %v1334_v48  ;;  %vm5757_vm7 = vcmp.lt.f32.partialorder %v1194_v8, 0.0004427343  ;;  %v1345_v62 = vadd.f32 1.0, %v1344_v52 }
 0x259   : > { %v1197_v54 = vadd.f32 1.0, %v4679_v63  ;;  %v1200_v26 = vmul.f32 -0.5, %v4679_v63  ;;  %v2497_v56 = vcombine.low %v2475_v0, %v2482_v6  ;;  %v2498_v51 = vcombine.low %v2489_v46, %v2496_v44 }
 0x25a   : > { %v5762_v33 = vadd.f32 %v5229_v15, %v843_v40  ;;  %v5765_v12 = vadd.f32 %v5229_v15, %v894_v32  ;;  %v1193_v31 = vmul.f32 %v4671_v17, %v1192_v49  ;;  %vm5767_vm8 = vcmp.lt.f32.partialorder %v1347_v37, 0.0004427343  ;;  %v4681_v5 = vpop.eup %4680 }
 0x25b   : > { %4690 = vlog2.f32 %v1197_v54  ;;  %v1201_v8 = vadd.f32 1.0, %v1200_v26  ;;  %v6834_v57 = vmax.f32 %v5555_v41, 0.0  ;;  %v2505_v7 = vrot.slane %v2497_v56, %v5298_v28 }
 0x25c   : > { %v2512_v45 = vrot.slane %v2498_v51, %v5298_v28  ;;  %v975_v23 = vand.u32 2147483647, %v5762_v33  ;;  %v1346_v42 = vmul.f32 %v4675_v47, %v1345_v62  ;;  %v1203_v52 = vand.u32 2147483647, %v4679_v63 }
 0x25d   : > { %v5773_v48 = vadd.f32 %v1340_v34, %v6834_v57  ;;  %v1350_v17 = vadd.f32 1.0, %v4681_v5  ;;  %v1353_v18 = vmul.f32 -0.5, %v4681_v5  ;;  %v992_v49 = vand.u32 2147483647, %v5765_v12 }
 0x25e   : > { %v2513_v0 = vcombine.low %v2505_v7, %v2512_v45  ;;  %v1007_v60 = vsub.f32 0.0, %v975_v23  ;;  %v1956_v37 = vrot.slane %v5412_v9, %v5078_v2  ;;  %v5781_v41 = vmul.f32 %v4679_v63, %v1201_v8 }
 0x25f   : > { %4692 = vlog2.f32 %v1350_v17  ;;  %v1356_v40 = vand.u32 2147483647, %v4681_v5  ;;  %v943_v32 = vmax.f32 %v5762_v33, 0.0  ;;  %v4683_v55 = vpop.eup %4682  ;;  %v1354_v6 = vadd.f32 1.0, %v1353_v18 }
 0x260   : > { %4034 = vperm.xlu0 %4580, %v2513_v0   ;;  %v1053_v47 = vmul.f32 1.442695, %v1007_v60  ;;  %v1024_v46 = vsub.f32 0.0, %v992_v49  ;;  %v1960_v44 = vrot.slane %v5412_v9, %v5084_v4  ;;  %v4685_v34 = vpop.eup %4684  ;;  %vm5786_vm9 = vcmp.lt.f32.partialorder %v1203_v52, 0.0004427343 }
 0x261   : > { %v1206_v54 = vadd.f32 1.0, %v4683_v55  ;;  %v1209_v63 = vmul.f32 -0.5, %v4683_v55  ;;  %v1964_v26 = vrot.slane %v5412_v9, %v5278_v16  ;;  %v1968_v56 = vrot.slane %v5412_v9, %v5281_v19  ;;  %v4687_v7 = vpop.eup %4686 }
 0x262   : > { %v1190_v51 = vmul.f32 0.6931472, %v4685_v34  ;;  %v1212_v8 = vand.u32 2147483647, %v4683_v55  ;;  %4694 = vpow2.f32 %v1053_v47  ;;  %v1087_v57 = vmul.f32 1.442695, %v1024_v46 }
 0x263   : > { %4696 = vlog2.f32 %v1206_v54  ;;  %v1210_v45 = vadd.f32 1.0, %v1209_v63  ;;  %v1972_v23 = vrot.slane %v5412_v9, %v5284_v21  ;;  %v1976_v52 = vrot.slane %v5412_v9, %v5287_v20  ;;  %v4689_v17 = vpop.eup %4688 }
 0x264   : > { %v1196_v18 = vsel %vm5757_vm7, %v1193_v31, %v1190_v51  ;;  %v1343_v0 = vmul.f32 0.6931472, %v4687_v7  ;;  %4698 = vpow2.f32 %v1087_v57  ;;  %v1980_v60 = vrot.slane %v5412_v9, %v5290_v22 }
 0x265   : > { %v5802_v49 = vmul.f32 %v4681_v5, %v1354_v6  ;;  %vm5804_vm10 = vcmp.lt.f32.partialorder %v1356_v40, 0.0004427343  ;;  %v1359_v46 = vadd.f32 1.0, %v4689_v17  ;;  %v960_v34 = vmax.f32 %v5765_v12, 0.0 }
 0x266   : > { %v6839_v54 = vmax.f32 %v5591_v24, 0.0  ;;  %v1349_v10 = vsel %vm5767_vm8, %v1346_v42, %v1343_v0  ;;  %v1984_v31 = vrot.slane %v5412_v9, %v5295_v25  ;;  %v3249_v51 = vcombine.low %v1956_v37, %v1960_v44 }
 0x267   : > { %v5817_v5 = vmul.f32 %v4683_v55, %v1210_v45  ;;  %4700 = vlog2.f32 %v1359_v46  ;;  %v1362_v40 = vmul.f32 -0.5, %v4689_v17  ;;  %v3250_v6 = vcombine.low %v1964_v26, %v1968_v56 }
 0x268   : > { %v5811_v63 = vadd.f32 %v1196_v18, %v6839_v54  ;;  %v4691_v57 = vpop.eup %4690  ;;  %vm5819_vm11 = vcmp.lt.f32.partialorder %v1212_v8, 0.0004427343  ;;  %v1365_v24 = vand.u32 2147483647, %v4689_v17  ;;  %v3251_v18 = vcombine.low %v1972_v23, %v1976_v52 }
 0x269   : > { %v3252_v54 = vcombine.low %v1980_v60, %v1984_v31  ;;  %v3259_v59 = vrot.slane %v3249_v51, %v5298_v28  ;;  %v6842_v42 = vmax.f32 %v5597_v39, 0.0  ;;  %v1199_v9 = vmul.f32 0.6931472, %v4691_v57 }
 0x26a   : > { %v3266_v37 = vrot.slane %v3250_v6, %v5298_v28  ;;  %v1476_v55 = vrot.slane %v5453_v53, %v5078_v2  ;;  %v3273_v44 = vrot.slane %v3251_v18, %v5298_v28  ;;  %v1480_v56 = vrot.slane %v5453_v53, %v5084_v4 }
 0x26b   : > { %v5826_v0 = vadd.f32 %v1349_v10, %v6842_v42  ;;  %v3280_v26 = vrot.slane %v3252_v54, %v5298_v28  ;;  %v1484_v8 = vrot.slane %v5453_v53, %v5278_v16  ;;  %v1363_v45 = vadd.f32 1.0, %v1362_v40  ;;  %v846_v40 = vpop.xlane.xlu0 %845 }
 0x26c   : > { %v3281_v39 = vcombine.low %v3259_v59, %v3266_v37  ;;  %v1488_v23 = vrot.slane %v5453_v53, %v5281_v19  ;;  %v1492_v52 = vrot.slane %v5453_v53, %v5284_v21  ;;  %v4693_v60 = vpop.eup %4692  ;;  %v1205_v46 = vsel %vm5786_vm9, %v5781_v41, %v1199_v9 }
 0x26d   : > { %v3282_v10 = vcombine.low %v3273_v44, %v3280_v26  ;;  %v1496_v31 = vrot.slane %v5453_v53, %v5287_v20  ;;  %v1500_v51 = vrot.slane %v5453_v53, %v5290_v22  ;;  %v1352_v6 = vmul.f32 0.6931472, %v4693_v60 }
 0x26e   : > { %v3289_v57 = vrot.slane %v3281_v39, %v5298_v28  ;;  %v1504_v18 = vrot.slane %v5453_v53, %v5295_v25  ;;  %v2514_v54 = vcombine.low %v1476_v55, %v1480_v56  ;;  %vm5851_vm12 = vcmp.lt.f32.partialorder %v1365_v24, 0.0004427343 }
 0x26f   : > { %v3296_v41 = vrot.slane %v3282_v10, %v5298_v28  ;;  %v2515_v62 = vcombine.low %v1484_v8, %v1488_v23  ;;  %v2516_v42 = vcombine.low %v1492_v52, %v1496_v31  ;;  %v4695_v9 = vpop.eup %4694  ;;  %v6845_v37 = vmax.f32 %v5604_v61, 0.0 }
 0x270   : > { %v5860_v26 = vmul.f32 %v4689_v17, %v1363_v45  ;;  %v2517_v39 = vcombine.low %v1500_v51, %v1504_v18  ;;  %v5863_v60 = vadd.f32 %v5229_v15, %v846_v40  ;;  %v4697_v53 = vpop.eup %4696  ;;  %v1358_v24 = vsel %vm5804_vm10, %v5802_v49, %v1352_v6 }
 0x271   : > { %v5858_v44 = vadd.f32 %v1205_v46, %v6845_v37  ;;  %v1215_v55 = vadd.f32 1.0, %v4695_v9  ;;  %v1218_v56 = vmul.f32 -0.5, %v4695_v9  ;;  %v2524_v8 = vrot.slane %v2514_v54, %v5298_v28  ;;  %v4699_v23 = vpop.eup %4698 }
 0x272   : > { %v1208_v52 = vmul.f32 0.6931472, %v4697_v53  ;;  %v3297_v61 = vcombine.low %v3289_v57, %v3296_v41  ;;  %v2531_v46 = vrot.slane %v2515_v62, %v5298_v28  ;;  %v2538_v17 = vrot.slane %v2516_v42, %v5298_v28 }
 0x273   : > { %4702 = vlog2.f32 %v1215_v55  ;;  %v1219_v45 = vadd.f32 1.0, %v1218_v56  ;;  %v1368_v15 = vadd.f32 1.0, %v4699_v23  ;;  %v2020_v10 = vrot.slane %v5475_v58, %v5078_v2 }
 0x274   : > { %v1214_v49 = vsel %vm5819_vm11, %v5817_v5, %v1208_v52  ;;  %v1221_v47 = vand.u32 2147483647, %v4695_v9  ;;  %v1371_v31 = vmul.f32 -0.5, %v4699_v23  ;;  %4082 = vperm.xlu0 %4580, %v3297_v61   ;;  %v2545_v51 = vrot.slane %v2517_v39, %v5298_v28  ;;  %v4701_v40 = vpop.eup %4700 }
 0x275   : > { %v6846_v6 = vmax.f32 %v5655_v35, 0.0  ;;  %4704 = vlog2.f32 %v1368_v15  ;;  %v1374_v18 = vand.u32 2147483647, %v4699_v23  ;;  %v2546_v54 = vcombine.low %v2524_v8, %v2531_v46 }
 0x276   : > { %v6847_v41 = vmax.f32 %v5680_v14, 0.0  ;;  %v1361_v42 = vmul.f32 0.6931472, %v4701_v40  ;;  %v1372_v7 = vadd.f32 1.0, %v1371_v31  ;;  %v2547_v5 = vcombine.low %v2538_v17, %v2545_v51 }
 0x277   : > { %v5879_v57 = vadd.f32 %v1358_v24, %v6846_v6  ;;  %v1220_v37 = vmul.f32 %v4695_v9, %v1219_v45  ;;  %v2554_v53 = vrot.slane %v2546_v54, %v5298_v28  ;;  %v976_v39 = vand.u32 2147483647, %v5863_v60 }
 0x278   : > { %v5883_v62 = vadd.f32 %v1214_v49, %v6847_v41  ;;  %v2024_v35 = vrot.slane %v5475_v58, %v5084_v4  ;;  %v1367_v24 = vsel %vm5851_vm12, %v5860_v26, %v1361_v42  ;;  %vm5892_vm13 = vcmp.lt.f32.partialorder %v1221_v47, 0.0004427343 }
 0x279   : > { %v2561_v14 = vrot.slane %v2547_v5, %v5298_v28  ;;  %v944_v56 = vmax.f32 %v5863_v60, 0.0  ;;  %v2028_v9 = vrot.slane %v5475_v58, %v5278_v16  ;;  %v5900_v8 = vmul.f32 %v4699_v23, %v1372_v7 }
 0x27a   : > { %v1008_v52 = vsub.f32 0.0, %v976_v39  ;;  %v2032_v61 = vrot.slane %v5475_v58, %v5281_v19  ;;  %v2036_v59 = vrot.slane %v5475_v58, %v5284_v21  ;;  %v2040_v46 = vrot.slane %v5475_v58, %v5287_v20 }
 0x27b   : > { %v2562_v26 = vcombine.low %v2554_v53, %v2561_v14  ;;  %v2044_v17 = vrot.slane %v5475_v58, %v5290_v22  ;;  %v2048_v45 = vrot.slane %v5475_v58, %v5295_v25  ;;  %vm5912_vm14 = vcmp.lt.f32.partialorder %v1374_v18, 0.0004427343 }
 0x27c   : > { %v1055_v15 = vmul.f32 1.442695, %v1008_v52  ;;  %v3347_v49 = vcombine.low %v2020_v10, %v2024_v35  ;;  %v3348_v47 = vcombine.low %v2028_v9, %v2032_v61  ;;  %v1988_v31 = vrot.slane %v5449_v50, %v5078_v2 }
 0x27d   : > { %4037 = vperm.xlu1 %4581, %v2562_v26   ;;  %v3349_v51 = vcombine.low %v2036_v59, %v2040_v46  ;;  %v3350_v40 = vcombine.low %v2044_v17, %v2048_v45  ;;  %v1992_v6 = vrot.slane %v5449_v50, %v5084_v4  ;;  %v1996_v54 = vrot.slane %v5449_v50, %v5278_v16 }
 0x27e   : > { %4706 = vpow2.f32 %v1055_v15  ;;  %v3357_v58 = vrot.slane %v3347_v49, %v5298_v28  ;;  %v3364_v18 = vrot.slane %v3348_v47, %v5298_v28  ;;  %v2000_v10 = vrot.slane %v5449_v50, %v5281_v19 }
 0x27f   : > { %v3371_v41 = vrot.slane %v3349_v51, %v5298_v28  ;;  %v3378_v42 = vrot.slane %v3350_v40, %v5298_v28  ;;  %v2004_v7 = vrot.slane %v5449_v50, %v5284_v21  ;;  %v2008_v5 = vrot.slane %v5449_v50, %v5287_v20 }
 0x280   : > { %v3379_v53 = vcombine.low %v3357_v58, %v3364_v18  ;;  %v2012_v39 = vrot.slane %v5449_v50, %v5290_v22  ;;  %v2016_v35 = vrot.slane %v5449_v50, %v5295_v25  ;;  %v3298_v14 = vcombine.low %v1988_v31, %v1992_v6  ;;  %v4703_v9 = vpop.eup %4702 }
 0x281   : > { %v3380_v52 = vcombine.low %v3371_v41, %v3378_v42  ;;  %v3299_v61 = vcombine.low %v1996_v54, %v2000_v10  ;;  %v3300_v59 = vcombine.low %v2004_v7, %v2008_v5  ;;  %v1508_v26 = vrot.slane %v5486_v38, %v5078_v2 }
 0x282   : > { %v1217_v46 = vmul.f32 0.6931472, %v4703_v9  ;;  %v3387_v17 = vrot.slane %v3379_v53, %v5298_v28  ;;  %v3301_v45 = vcombine.low %v2012_v39, %v2016_v35  ;;  %v3308_v15 = vrot.slane %v3298_v14, %v5298_v28  ;;  %v4705_v49 = vpop.eup %4704 }
 0x283   : > { %v3394_v47 = vrot.slane %v3380_v52, %v5298_v28  ;;  %v3315_v51 = vrot.slane %v3299_v61, %v5298_v28  ;;  %v3322_v50 = vrot.slane %v3300_v59, %v5298_v28  ;;  %v1512_v31 = vrot.slane %v5486_v38, %v5084_v4 }
 0x284   : > { %v1223_v40 = vsel %vm5892_vm13, %v1220_v37, %v1217_v46  ;;  %v1370_v6 = vmul.f32 0.6931472, %v4705_v49  ;;  %v3329_v54 = vrot.slane %v3301_v45, %v5298_v28  ;;  %v1516_v58 = vrot.slane %v5486_v38, %v5278_v16 }
 0x285   : > { %v5952_v18 = vadd.f32 %v1367_v24, %v959_v36  ;;  %v3395_v10 = vcombine.low %v3387_v17, %v3394_v47  ;;  %v3330_v41 = vcombine.low %v3308_v15, %v3315_v51  ;;  %v1520_v42 = vrot.slane %v5486_v38, %v5281_v19 }
 0x286   : > { %v5958_v7 = vadd.f32 %v1223_v40, %v943_v32  ;;  %v3331_v37 = vcombine.low %v3322_v50, %v3329_v54  ;;  %v1524_v55 = vrot.slane %v5486_v38, %v5284_v21  ;;  %v1528_v5 = vrot.slane %v5486_v38, %v5287_v20 }
 0x287   : > { %v1376_v27 = vsel %vm5912_vm14, %v5900_v8, %v1370_v6  ;;  %4088 = vperm.xlu0 %4580, %v3395_v10   ;;  %v3338_v36 = vrot.slane %v3330_v41, %v5298_v28  ;;  %v1532_v24 = vrot.slane %v5486_v38, %v5290_v22  ;;  %v1536_v33 = vrot.slane %v5486_v38, %v5295_v25 }
 0x288   : > { %v3345_v32 = vrot.slane %v3331_v37, %v5298_v28  ;;  %v2563_v53 = vcombine.low %v1508_v26, %v1512_v31  ;;  %v2564_v39 = vcombine.low %v1516_v58, %v1520_v42  ;;  %v2565_v35 = vcombine.low %v1524_v55, %v1528_v5 }
 0x289   : > { %v2566_v14 = vcombine.low %v1532_v24, %v1536_v33  ;;  %v2084_v9 = vrot.slane %v5536_v3, %v5078_v2  ;;  %v2088_v8 = vrot.slane %v5536_v3, %v5084_v4  ;;  %v2092_v23 = vrot.slane %v5536_v3, %v5278_v16 }
 0x28a   : > { %v3346_v52 = vcombine.low %v3338_v36, %v3345_v32  ;;  %v2573_v61 = vrot.slane %v2563_v53, %v5298_v28  ;;  %v2580_v38 = vrot.slane %v2564_v39, %v5298_v28  ;;  %v2587_v59 = vrot.slane %v2565_v35, %v5298_v28 }
 0x28b   : > { %v4707_v26 = vpop.eup %4706  ;;  %v2594_v46 = vrot.slane %v2566_v14, %v5298_v28  ;;  %v2096_v17 = vrot.slane %v5536_v3, %v5281_v19  ;;  %v2100_v45 = vrot.slane %v5536_v3, %v5284_v21  ;;  %v2104_v15 = vrot.slane %v5536_v3, %v5287_v20 }
 0x28c   : > { %v5991_v49 = vadd.f32 %v1376_v27, %v960_v34  ;;  %v1224_v47 = vadd.f32 1.0, %v4707_v26  ;;  %v1227_v51 = vmul.f32 -0.5, %v4707_v26  ;;  %4085 = vperm.xlu1 %4581, %v3346_v52   ;;  %v2595_v50 = vcombine.low %v2573_v61, %v2580_v38 }
 0x28d   : > { %v2596_v31 = vcombine.low %v2587_v59, %v2594_v46  ;;  %v2108_v40 = vrot.slane %v5536_v3, %v5290_v22  ;;  %v2112_v6 = vrot.slane %v5536_v3, %v5295_v25  ;;  %v3445_v54 = vcombine.low %v2084_v9, %v2088_v8  ;;  %v6854_v46 = vld [vmem:[#allocation13_spill] sm:$0xff] }
 0x28e   : > { %4708 = vlog2.f32 %v1224_v47  ;;  %v1228_v58 = vadd.f32 1.0, %v1227_v51  ;;  %v1230_v10 = vand.u32 2147483647, %v4707_v26  ;;  %v2603_v41 = vrot.slane %v2595_v50, %v5298_v28 }
 0x28f   : > { %v2610_v12 = vrot.slane %v2596_v31, %v5298_v28  ;;  %v3446_v34 = vcombine.low %v2092_v23, %v2096_v17  ;;  %v3447_v42 = vcombine.low %v2100_v45, %v2104_v15  ;;  %v3448_v37 = vcombine.low %v2108_v40, %v2112_v6 }
 0x290   : > { %v5999_v55 = vmul.f32 %v4707_v26, %v1228_v58  ;;  %v3455_v5 = vrot.slane %v3445_v54, %v5298_v28  ;;  %v1540_v27 = vrot.slane %v5514_v30, %v5078_v2  ;;  %v1544_v3 = vrot.slane %v5514_v30, %v5084_v4 }
 0x291   : > { %v2611_v36 = vcombine.low %v2603_v41, %v2610_v12  ;;  %v3462_v24 = vrot.slane %v3446_v34, %v5298_v28  ;;  %v3469_v33 = vrot.slane %v3447_v42, %v5298_v28  ;;  %v3476_v32 = vrot.slane %v3448_v37, %v5298_v28 }
 0x292   : > { %v1548_v53 = vrot.slane %v5514_v30, %v5278_v16  ;;  %v1552_v39 = vrot.slane %v5514_v30, %v5281_v19  ;;  %v1556_v35 = vrot.slane %v5514_v30, %v5284_v21  ;;  %v1560_v14 = vrot.slane %v5514_v30, %v5287_v20 }
 0x293   : > { %vm6017_vm15 = vcmp.lt.f32.partialorder %v1230_v10, 0.0004427343  ;;  %4040 = vperm.xlu1 %4581, %v2611_v36   ;;  %v3477_v8 = vcombine.low %v3455_v5, %v3462_v24  ;;  %v3478_v23 = vcombine.low %v3469_v33, %v3476_v32  ;;  %v1564_v52 = vrot.slane %v5514_v30, %v5290_v22 }
 0x294   : > { %v1568_v61 = vrot.slane %v5514_v30, %v5295_v25  ;;  %v2612_v38 = vcombine.low %v1540_v27, %v1544_v3  ;;  %v2613_v59 = vcombine.low %v1548_v53, %v1552_v39  ;;  %v2614_v26 = vcombine.low %v1556_v35, %v1560_v14 }
 0x295   : > { %v2052_v17 = vrot.slane %v6854_v46, %v5078_v2  ;;  %v3485_v45 = vrot.slane %v3477_v8, %v5298_v28  ;;  %v3492_v15 = vrot.slane %v3478_v23, %v5298_v28  ;;  %v2056_v51 = vrot.slane %v6854_v46, %v5084_v4 }
 0x296   : > { %v2615_v47 = vcombine.low %v1564_v52, %v1568_v61  ;;  %v2622_v50 = vrot.slane %v2612_v38, %v5298_v28  ;;  %v2629_v31 = vrot.slane %v2613_v59, %v5298_v28  ;;  %v2636_v30 = vrot.slane %v2614_v26, %v5298_v28 }
 0x297   : > { %v2060_v40 = vrot.slane %v6854_v46, %v5278_v16  ;;  %v3493_v6 = vcombine.low %v3485_v45, %v3492_v15  ;;  %v2064_v58 = vrot.slane %v6854_v46, %v5281_v19  ;;  %v2068_v10 = vrot.slane %v6854_v46, %v5284_v21 }
 0x298   : > { %v2643_v54 = vrot.slane %v2615_v47, %v5298_v28  ;;  %v2644_v41 = vcombine.low %v2622_v50, %v2629_v31  ;;  %v2072_v12 = vrot.slane %v6854_v46, %v5287_v20  ;;  %v2076_v34 = vrot.slane %v6854_v46, %v5290_v22 }
 0x299   : > { %v2080_v42 = vrot.slane %v6854_v46, %v5295_v25  ;;  %4094 = vperm.xlu0 %4580, %v3493_v6   ;;  %v3396_v5 = vcombine.low %v2052_v17, %v2056_v51  ;;  %v3397_v27 = vcombine.low %v2060_v40, %v2064_v58  ;;  %v2148_v3 = vrot.slane %v5623_v1, %v5078_v2 }
 0x29a   : > { %v2645_v37 = vcombine.low %v2636_v30, %v2643_v54  ;;  %v2652_v36 = vrot.slane %v2644_v41, %v5298_v28  ;;  %v3398_v24 = vcombine.low %v2068_v10, %v2072_v12  ;;  %v2152_v32 = vrot.slane %v5623_v1, %v5084_v4  ;;  %v6855_v54 = vld [vmem:[#allocation14_spill] sm:$0xff] }
 0x29b   : > { %v3399_v33 = vcombine.low %v2076_v34, %v2080_v42  ;;  %v4709_v53 = vpop.eup %4708  ;;  %v3406_v35 = vrot.slane %v3396_v5, %v5298_v28  ;;  %v3413_v14 = vrot.slane %v3397_v27, %v5298_v28  ;;  %v2156_v8 = vrot.slane %v5623_v1, %v5278_v16 }
 0x29c   : > { %v2659_v39 = vrot.slane %v2645_v37, %v5298_v28  ;;  %v1226_v23 = vmul.f32 0.6931472, %v4709_v53  ;;  %v3420_v52 = vrot.slane %v3398_v24, %v5298_v28  ;;  %v2160_v38 = vrot.slane %v5623_v1, %v5281_v19 }
 0x29d   : > { %v3427_v61 = vrot.slane %v3399_v33, %v5298_v28  ;;  %v3428_v26 = vcombine.low %v3406_v35, %v3413_v14  ;;  %v2164_v46 = vrot.slane %v5623_v1, %v5284_v21  ;;  %v2168_v17 = vrot.slane %v5623_v1, %v5287_v20  ;;  %v6856_v35 = vld [vmem:[#allocation16_spill] sm:$0xff] }
 0x29e   : > { %v2660_v59 = vcombine.low %v2652_v36, %v2659_v39  ;;  %v1232_v45 = vsel %vm6017_vm15, %v5999_v55, %v1226_v23  ;;  %v2172_v47 = vrot.slane %v5623_v1, %v5290_v22  ;;  %v2176_v51 = vrot.slane %v5623_v1, %v5295_v25 }
 0x29f   : > { %v3429_v15 = vcombine.low %v3420_v52, %v3427_v61  ;;  %v6074_v50 = vadd.f32 %v1232_v45, %v944_v56  ;;  %v3436_v31 = vrot.slane %v3428_v26, %v5298_v28  ;;  %v3543_v30 = vcombine.low %v2148_v3, %v2152_v32 }
 0x2a0   : > { %4043 = vperm.xlu1 %4581, %v2660_v59   ;;  %v3544_v40 = vcombine.low %v2156_v8, %v2160_v38  ;;  %v3545_v9 = vcombine.low %v2164_v46, %v2168_v17  ;;  %v3546_v55 = vcombine.low %v2172_v47, %v2176_v51  ;;  %v1572_v58 = vrot.slane %v6855_v54, %v5078_v2 }
 0x2a1   : > { %v3443_v6 = vrot.slane %v3429_v15, %v5298_v28  ;;  %v3553_v10 = vrot.slane %v3543_v30, %v5298_v28  ;;  %v1576_v60 = vrot.slane %v6855_v54, %v5084_v4  ;;  %v1580_v56 = vrot.slane %v6855_v54, %v5278_v16 }
 0x2a2   : > { %v3560_v1 = vrot.slane %v3544_v40, %v5298_v28  ;;  %v3567_v12 = vrot.slane %v3545_v9, %v5298_v28  ;;  %v3574_v34 = vrot.slane %v3546_v55, %v5298_v28  ;;  %v1584_v42 = vrot.slane %v6855_v54, %v5281_v19 }
 0x2a3   : > { %v3444_v41 = vcombine.low %v3436_v31, %v3443_v6  ;;  %v1588_v5 = vrot.slane %v6855_v54, %v5284_v21  ;;  %v1592_v27 = vrot.slane %v6855_v54, %v5287_v20  ;;  %v1596_v3 = vrot.slane %v6855_v54, %v5290_v22 }
 0x2a4   : > { %v3575_v37 = vcombine.low %v3553_v10, %v3560_v1  ;;  %v3576_v36 = vcombine.low %v3567_v12, %v3574_v34  ;;  %v1600_v24 = vrot.slane %v6855_v54, %v5295_v25  ;;  %v2661_v33 = vcombine.low %v1572_v58, %v1576_v60 }
 0x2a5   : > { %4091 = vperm.xlu1 %4581, %v3444_v41   ;;  %v2662_v32 = vcombine.low %v1580_v56, %v1584_v42  ;;  %v2663_v39 = vcombine.low %v1588_v5, %v1592_v27  ;;  %v1604_v14 = vrot.slane %v6856_v35, %v5078_v2  ;;  %v1608_v8 = vrot.slane %v6856_v35, %v5084_v4 }
 0x2a6   : > { %v3583_v53 = vrot.slane %v3575_v37, %v5298_v28  ;;  %v3590_v23 = vrot.slane %v3576_v36, %v5298_v28  ;;  %v2664_v52 = vcombine.low %v1596_v3, %v1600_v24  ;;  %v2671_v61 = vrot.slane %v2661_v33, %v5298_v28 }
 0x2a7   : > { %v2678_v38 = vrot.slane %v2662_v32, %v5298_v28  ;;  %v2685_v59 = vrot.slane %v2663_v39, %v5298_v28  ;;  %v1612_v26 = vrot.slane %v6856_v35, %v5278_v16  ;;  %v1616_v46 = vrot.slane %v6856_v35, %v5281_v19 }
 0x2a8   : > { %v1620_v17 = vrot.slane %v6856_v35, %v5284_v21  ;;  %v3591_v45 = vcombine.low %v3583_v53, %v3590_v23  ;;  %v2692_v15 = vrot.slane %v2664_v52, %v5298_v28  ;;  %v1624_v51 = vrot.slane %v6856_v35, %v5287_v20  ;;  %v6857_v52 = vld [vmem:[#allocation15_spill] sm:$0xff] }
 0x2a9   : > { %v2693_v47 = vcombine.low %v2671_v61, %v2678_v38  ;;  %v1628_v31 = vrot.slane %v6856_v35, %v5290_v22  ;;  %v1632_v30 = vrot.slane %v6856_v35, %v5295_v25  ;;  %v2710_v40 = vcombine.low %v1604_v14, %v1608_v8 }
 0x2aa   : > { %v2711_v6 = vcombine.low %v1612_v26, %v1616_v46  ;;  %4100 = vperm.xlu0 %4580, %v3591_v45   ;;  %v2694_v9 = vcombine.low %v2685_v59, %v2692_v15  ;;  %v2712_v54 = vcombine.low %v1620_v17, %v1624_v51  ;;  %v2212_v58 = vrot.slane %v5691_v13, %v5078_v2 }
 0x2ab   : > { %v2701_v55 = vrot.slane %v2693_v47, %v5298_v28  ;;  %v2713_v10 = vcombine.low %v1628_v31, %v1632_v30  ;;  %v2720_v1 = vrot.slane %v2710_v40, %v5298_v28  ;;  %v2216_v56 = vrot.slane %v5691_v13, %v5084_v4 }
 0x2ac   : > { %v2727_v60 = vrot.slane %v2711_v6, %v5298_v28  ;;  %v2708_v41 = vrot.slane %v2694_v9, %v5298_v28  ;;  %v2734_v12 = vrot.slane %v2712_v54, %v5298_v28  ;;  %v2220_v34 = vrot.slane %v5691_v13, %v5278_v16 }
 0x2ad   : > { %v2224_v42 = vrot.slane %v5691_v13, %v5281_v19  ;;  %v2741_v37 = vrot.slane %v2713_v10, %v5298_v28  ;;  %v2228_v27 = vrot.slane %v5691_v13, %v5284_v21  ;;  %v2232_v3 = vrot.slane %v5691_v13, %v5287_v20 }
 0x2ae   : > { %v2742_v5 = vcombine.low %v2720_v1, %v2727_v60  ;;  %v2709_v36 = vcombine.low %v2701_v55, %v2708_v41  ;;  %v2236_v24 = vrot.slane %v5691_v13, %v5290_v22  ;;  %v2240_v33 = vrot.slane %v5691_v13, %v5295_v25  ;;  %v6858_v1 = vld [vmem:[#allocation17_spill] sm:$0xff] }
 0x2af   : > { %v3641_v32 = vcombine.low %v2212_v58, %v2216_v56  ;;  %v2743_v53 = vcombine.low %v2734_v12, %v2741_v37  ;;  %v3642_v35 = vcombine.low %v2220_v34, %v2224_v42  ;;  %v3643_v14 = vcombine.low %v2228_v27, %v2232_v3 }
 0x2b0   : > { %v2750_v39 = vrot.slane %v2742_v5, %v5298_v28  ;;  %4046 = vperm.xlu1 %4581, %v2709_v36   ;;  %v3644_v8 = vcombine.low %v2236_v24, %v2240_v33  ;;  %v2116_v61 = vrot.slane %v6857_v52, %v5078_v2  ;;  %v2120_v38 = vrot.slane %v6857_v52, %v5084_v4 }
 0x2b1   : > { %v3651_v23 = vrot.slane %v3641_v32, %v5298_v28  ;;  %v2757_v59 = vrot.slane %v2743_v53, %v5298_v28  ;;  %v3658_v13 = vrot.slane %v3642_v35, %v5298_v28  ;;  %v3665_v26 = vrot.slane %v3643_v14, %v5298_v28 }
 0x2b2   : > { %v2124_v46 = vrot.slane %v6857_v52, %v5278_v16  ;;  %v3672_v17 = vrot.slane %v3644_v8, %v5298_v28  ;;  %v2128_v45 = vrot.slane %v6857_v52, %v5281_v19  ;;  %v2132_v15 = vrot.slane %v6857_v52, %v5284_v21 }
 0x2b3   : > { %v2136_v47 = vrot.slane %v6857_v52, %v5287_v20  ;;  %v2758_v51 = vcombine.low %v2750_v39, %v2757_v59  ;;  %v3673_v31 = vcombine.low %v3651_v23, %v3658_v13  ;;  %v2140_v30 = vrot.slane %v6857_v52, %v5290_v22 }
 0x2b4   : > { %v2144_v40 = vrot.slane %v6857_v52, %v5295_v25  ;;  %v3674_v6 = vcombine.low %v3665_v26, %v3672_v17  ;;  %v3494_v9 = vcombine.low %v2116_v61, %v2120_v38  ;;  %v3495_v55 = vcombine.low %v2124_v46, %v2128_v45 }
 0x2b5   : > { %v3496_v54 = vcombine.low %v2132_v15, %v2136_v47  ;;  %4049 = vperm.xlu1 %4581, %v2758_v51   ;;  %v3681_v58 = vrot.slane %v3673_v31, %v5298_v28  ;;  %v1636_v60 = vrot.slane %v6858_v1, %v5078_v2  ;;  %v1640_v56 = vrot.slane %v6858_v1, %v5084_v4 }
 0x2b6   : > { %v3497_v10 = vcombine.low %v2140_v30, %v2144_v40  ;;  %v3688_v41 = vrot.slane %v3674_v6, %v5298_v28  ;;  %v3504_v12 = vrot.slane %v3494_v9, %v5298_v28  ;;  %v3511_v34 = vrot.slane %v3495_v55, %v5298_v28 }
 0x2b7   : > { %v3518_v42 = vrot.slane %v3496_v54, %v5298_v28  ;;  %v1644_v5 = vrot.slane %v6858_v1, %v5278_v16  ;;  %v1648_v27 = vrot.slane %v6858_v1, %v5281_v19  ;;  %v1652_v3 = vrot.slane %v6858_v1, %v5284_v21 }
 0x2b8   : > { %v3525_v37 = vrot.slane %v3497_v10, %v5298_v28  ;;  %v3689_v36 = vcombine.low %v3681_v58, %v3688_v41  ;;  %v3526_v24 = vcombine.low %v3504_v12, %v3511_v34  ;;  %v1656_v33 = vrot.slane %v6858_v1, %v5287_v20 }
 0x2b9   : > { %v1660_v32 = vrot.slane %v6858_v1, %v5290_v22  ;;  %v1664_v39 = vrot.slane %v6858_v1, %v5295_v25  ;;  %v2759_v35 = vcombine.low %v1636_v60, %v1640_v56  ;;  %v2760_v14 = vcombine.low %v1644_v5, %v1648_v27  ;;  %v6859_v1 = vld [vmem:[#allocation19_spill] sm:$0xff] }
 0x2ba   : > { %v3527_v53 = vcombine.low %v3518_v42, %v3525_v37  ;;  %4106 = vperm.xlu0 %4580, %v3689_v36   ;;  %v3534_v8 = vrot.slane %v3526_v24, %v5298_v28  ;;  %v2761_v23 = vcombine.low %v1652_v3, %v1656_v33  ;;  %v1732_v52 = vrot.slane %v5739_v11, %v5078_v2 }
 0x2bb   : > { %v1736_v61 = vrot.slane %v5739_v11, %v5084_v4  ;;  %v2762_v59 = vcombine.low %v1660_v32, %v1664_v39  ;;  %v2769_v13 = vrot.slane %v2759_v35, %v5298_v28  ;;  %v2776_v26 = vrot.slane %v2760_v14, %v5298_v28 }
 0x2bc   : > { %v3541_v38 = vrot.slane %v3527_v53, %v5298_v28  ;;  %v2783_v46 = vrot.slane %v2761_v23, %v5298_v28  ;;  %v1740_v17 = vrot.slane %v5739_v11, %v5278_v16  ;;  %v1744_v45 = vrot.slane %v5739_v11, %v5281_v19 }
 0x2bd   : > { %v1748_v15 = vrot.slane %v5739_v11, %v5284_v21  ;;  %v2790_v51 = vrot.slane %v2762_v59, %v5298_v28  ;;  %v2791_v31 = vcombine.low %v2769_v13, %v2776_v26  ;;  %v1752_v30 = vrot.slane %v5739_v11, %v5287_v20 }
 0x2be   : > { %v3542_v47 = vcombine.low %v3534_v8, %v3541_v38  ;;  %v1756_v40 = vrot.slane %v5739_v11, %v5290_v22  ;;  %v1760_v6 = vrot.slane %v5739_v11, %v5295_v25  ;;  %v2906_v9 = vcombine.low %v1732_v52, %v1736_v61 }
 0x2bf   : > { %v2907_v55 = vcombine.low %v1740_v17, %v1744_v45  ;;  %v2792_v54 = vcombine.low %v2783_v46, %v2790_v51  ;;  %v2799_v58 = vrot.slane %v2791_v31, %v5298_v28  ;;  %v2908_v10 = vcombine.low %v1748_v15, %v1752_v30 }
 0x2c0   : > { %4097 = vperm.xlu1 %4581, %v3542_v47   ;;  %v1668_v60 = vrot.slane %v6859_v1, %v5078_v2  ;;  %v2909_v56 = vcombine.low %v1756_v40, %v1760_v6  ;;  %v2916_v41 = vrot.slane %v2906_v9, %v5298_v28  ;;  %v1672_v34 = vrot.slane %v6859_v1, %v5084_v4 }
 0x2c1   : > { %v2923_v12 = vrot.slane %v2907_v55, %v5298_v28  ;;  %v2806_v11 = vrot.slane %v2792_v54, %v5298_v28  ;;  %v2930_v42 = vrot.slane %v2908_v10, %v5298_v28  ;;  %v1676_v37 = vrot.slane %v6859_v1, %v5278_v16 }
 0x2c2   : > { %v1680_v5 = vrot.slane %v6859_v1, %v5281_v19  ;;  %v2937_v27 = vrot.slane %v2909_v56, %v5298_v28  ;;  %v1684_v36 = vrot.slane %v6859_v1, %v5284_v21  ;;  %v1688_v24 = vrot.slane %v6859_v1, %v5287_v20 }
 0x2c3   : > { %v2938_v3 = vcombine.low %v2916_v41, %v2923_v12  ;;  %v2807_v33 = vcombine.low %v2799_v58, %v2806_v11  ;;  %v1692_v32 = vrot.slane %v6859_v1, %v5290_v22  ;;  %v1696_v53 = vrot.slane %v6859_v1, %v5295_v25 }
 0x2c4   : > { %v2808_v39 = vcombine.low %v1668_v60, %v1672_v34  ;;  %v2939_v35 = vcombine.low %v2930_v42, %v2937_v27  ;;  %v2809_v8 = vcombine.low %v1676_v37, %v1680_v5  ;;  %v2810_v23 = vcombine.low %v1684_v36, %v1688_v24  ;;  %v6860_v60 = vld [vmem:[#allocation18_spill] sm:$0xff] }
 0x2c5   : > { %v2946_v14 = vrot.slane %v2938_v3, %v5298_v28  ;;  %4052 = vperm.xlu1 %4581, %v2807_v33   ;;  %v2811_v52 = vcombine.low %v1692_v32, %v1696_v53  ;;  %v2276_v38 = vrot.slane %v5745_v29, %v5078_v2  ;;  %v2280_v59 = vrot.slane %v5745_v29, %v5084_v4 }
 0x2c6   : > { %v2818_v61 = vrot.slane %v2808_v39, %v5298_v28  ;;  %v2953_v13 = vrot.slane %v2939_v35, %v5298_v28  ;;  %v2825_v26 = vrot.slane %v2809_v8, %v5298_v28  ;;  %v2832_v46 = vrot.slane %v2810_v23, %v5298_v28 }
 0x2c7   : > { %v2284_v17 = vrot.slane %v5745_v29, %v5278_v16  ;;  %v2839_v45 = vrot.slane %v2811_v52, %v5298_v28  ;;  %v2288_v15 = vrot.slane %v5745_v29, %v5281_v19  ;;  %v2292_v47 = vrot.slane %v5745_v29, %v5284_v21 }
 0x2c8   : > { %v2296_v51 = vrot.slane %v5745_v29, %v5287_v20  ;;  %v2954_v31 = vcombine.low %v2946_v14, %v2953_v13  ;;  %v2840_v30 = vcombine.low %v2818_v61, %v2825_v26  ;;  %v2300_v40 = vrot.slane %v5745_v29, %v5290_v22 }
 0x2c9   : > { %v2304_v6 = vrot.slane %v5745_v29, %v5295_v25  ;;  %v2841_v9 = vcombine.low %v2832_v46, %v2839_v45  ;;  %v3739_v55 = vcombine.low %v2276_v38, %v2280_v59  ;;  %v3740_v54 = vcombine.low %v2284_v17, %v2288_v15 }
 0x2ca   : > { %v3741_v58 = vcombine.low %v2292_v47, %v2296_v51  ;;  %4061 = vperm.xlu0 %4580, %v2954_v31   ;;  %v2848_v10 = vrot.slane %v2840_v30, %v5298_v28  ;;  %v2180_v56 = vrot.slane %v6860_v60, %v5078_v2  ;;  %v2184_v41 = vrot.slane %v6860_v60, %v5084_v4 }
 0x2cb   : > { %v3742_v1 = vcombine.low %v2300_v40, %v2304_v6  ;;  %v2855_v12 = vrot.slane %v2841_v9, %v5298_v28  ;;  %v3749_v34 = vrot.slane %v3739_v55, %v5298_v28  ;;  %v3756_v29 = vrot.slane %v3740_v54, %v5298_v28 }
 0x2cc   : > { %v3763_v11 = vrot.slane %v3741_v58, %v5298_v28  ;;  %v2188_v37 = vrot.slane %v6860_v60, %v5278_v16  ;;  %v2192_v5 = vrot.slane %v6860_v60, %v5281_v19  ;;  %v2196_v27 = vrot.slane %v6860_v60, %v5284_v21 }
 0x2cd   : > { %v3770_v42 = vrot.slane %v3742_v1, %v5298_v28  ;;  %v2856_v3 = vcombine.low %v2848_v10, %v2855_v12  ;;  %v3771_v36 = vcombine.low %v3749_v34, %v3756_v29  ;;  %v2200_v24 = vrot.slane %v6860_v60, %v5287_v20  ;;  %v6861_v10 = vld [vmem:[#allocation20_spill] sm:$0xff] }
 0x2ce   : > { %v2204_v33 = vrot.slane %v6860_v60, %v5290_v22  ;;  %v2208_v53 = vrot.slane %v6860_v60, %v5295_v25  ;;  %v3592_v39 = vcombine.low %v2180_v56, %v2184_v41  ;;  %v3593_v35 = vcombine.low %v2188_v37, %v2192_v5 }
 0x2cf   : > { %v3772_v32 = vcombine.low %v3763_v11, %v3770_v42  ;;  %4055 = vperm.xlu1 %4581, %v2856_v3   ;;  %v3779_v14 = vrot.slane %v3771_v36, %v5298_v28  ;;  %v3594_v8 = vcombine.low %v2196_v27, %v2200_v24  ;;  %v2308_v23 = vrot.slane %v5773_v48, %v5078_v2 }
 0x2d0   : > { %v2312_v52 = vrot.slane %v5773_v48, %v5084_v4  ;;  %v3595_v38 = vcombine.low %v2204_v33, %v2208_v53  ;;  %v3602_v59 = vrot.slane %v3592_v39, %v5298_v28  ;;  %v3609_v13 = vrot.slane %v3593_v35, %v5298_v28 }
 0x2d1   : > { %v3786_v61 = vrot.slane %v3772_v32, %v5298_v28  ;;  %v3616_v26 = vrot.slane %v3594_v8, %v5298_v28  ;;  %v2316_v46 = vrot.slane %v5773_v48, %v5278_v16  ;;  %v2320_v17 = vrot.slane %v5773_v48, %v5281_v19 }
 0x2d2   : > { %v2324_v45 = vrot.slane %v5773_v48, %v5284_v21  ;;  %v3623_v47 = vrot.slane %v3595_v38, %v5298_v28  ;;  %v3624_v51 = vcombine.low %v3602_v59, %v3609_v13  ;;  %v2328_v31 = vrot.slane %v5773_v48, %v5287_v20 }
 0x2d3   : > { %v3787_v15 = vcombine.low %v3779_v14, %v3786_v61  ;;  %v2332_v30 = vrot.slane %v5773_v48, %v5290_v22  ;;  %v2336_v40 = vrot.slane %v5773_v48, %v5295_v25  ;;  %v3788_v6 = vcombine.low %v2308_v23, %v2312_v52 }
 0x2d4   : > { %v3789_v9 = vcombine.low %v2316_v46, %v2320_v17  ;;  %v3625_v55 = vcombine.low %v3616_v26, %v3623_v47  ;;  %v3632_v54 = vrot.slane %v3624_v51, %v5298_v28  ;;  %v3790_v58 = vcombine.low %v2324_v45, %v2328_v31 }
 0x2d5   : > { %4112 = vperm.xlu0 %4580, %v3787_v15   ;;  %v1700_v1 = vrot.slane %v6861_v10, %v5078_v2  ;;  %v3791_v60 = vcombine.low %v2332_v30, %v2336_v40  ;;  %v3798_v56 = vrot.slane %v3788_v6, %v5298_v28  ;;  %v1704_v12 = vrot.slane %v6861_v10, %v5084_v4 }
 0x2d6   : > { %v3805_v41 = vrot.slane %v3789_v9, %v5298_v28  ;;  %v3639_v48 = vrot.slane %v3625_v55, %v5298_v28  ;;  %v3812_v34 = vrot.slane %v3790_v58, %v5298_v28  ;;  %v1708_v29 = vrot.slane %v6861_v10, %v5278_v16  ;;  %v6862_v58 = vld [vmem:[#allocation21_spill] sm:$0xff] }
 0x2d7   : > { %v1712_v11 = vrot.slane %v6861_v10, %v5281_v19  ;;  %v3819_v42 = vrot.slane %v3791_v60, %v5298_v28  ;;  %v1716_v5 = vrot.slane %v6861_v10, %v5284_v21  ;;  %v1720_v27 = vrot.slane %v6861_v10, %v5287_v20 }
 0x2d8   : > { %v3820_v37 = vcombine.low %v3798_v56, %v3805_v41  ;;  %v3640_v3 = vcombine.low %v3632_v54, %v3639_v48  ;;  %v1724_v36 = vrot.slane %v6861_v10, %v5290_v22  ;;  %v1728_v24 = vrot.slane %v6861_v10, %v5295_v25 }
 0x2d9   : > { %v2857_v33 = vcombine.low %v1700_v1, %v1704_v12  ;;  %v3821_v32 = vcombine.low %v3812_v34, %v3819_v42  ;;  %v2858_v39 = vcombine.low %v1708_v29, %v1712_v11  ;;  %v2859_v35 = vcombine.low %v1716_v5, %v1720_v27 }
 0x2da   : > { %v3828_v53 = vrot.slane %v3820_v37, %v5298_v28  ;;  %4103 = vperm.xlu1 %4581, %v3640_v3   ;;  %v2860_v14 = vcombine.low %v1724_v36, %v1728_v24  ;;  %v2340_v23 = vrot.slane %v5826_v0, %v5078_v2  ;;  %v2344_v52 = vrot.slane %v5826_v0, %v5084_v4 }
 0x2db   : > { %v2867_v8 = vrot.slane %v2857_v33, %v5298_v28  ;;  %v3835_v61 = vrot.slane %v3821_v32, %v5298_v28  ;;  %v2874_v38 = vrot.slane %v2858_v39, %v5298_v28  ;;  %v2881_v59 = vrot.slane %v2859_v35, %v5298_v28 }
 0x2dc   : > { %v2348_v13 = vrot.slane %v5826_v0, %v5278_v16  ;;  %v2888_v26 = vrot.slane %v2860_v14, %v5298_v28  ;;  %v2352_v46 = vrot.slane %v5826_v0, %v5281_v19  ;;  %v2356_v17 = vrot.slane %v5826_v0, %v5284_v21 }
 0x2dd   : > { %v2360_v45 = vrot.slane %v5826_v0, %v5287_v20  ;;  %v3836_v15 = vcombine.low %v3828_v53, %v3835_v61  ;;  %v2889_v47 = vcombine.low %v2867_v8, %v2874_v38  ;;  %v2364_v51 = vrot.slane %v5826_v0, %v5290_v22 }
 0x2de   : > { %v2368_v31 = vrot.slane %v5826_v0, %v5295_v25  ;;  %v2890_v30 = vcombine.low %v2881_v59, %v2888_v26  ;;  %v3837_v40 = vcombine.low %v2340_v23, %v2344_v52  ;;  %v3838_v6 = vcombine.low %v2348_v13, %v2352_v46 }
 0x2df   : > { %v3839_v9 = vcombine.low %v2356_v17, %v2360_v45  ;;  %4115 = vperm.xlu0 %4580, %v3836_v15   ;;  %v2897_v55 = vrot.slane %v2889_v47, %v5298_v28  ;;  %v2244_v10 = vrot.slane %v6862_v58, %v5078_v2  ;;  %v2248_v1 = vrot.slane %v6862_v58, %v5084_v4 }
 0x2e0   : > { %v3840_v54 = vcombine.low %v2364_v51, %v2368_v31  ;;  %v2904_v60 = vrot.slane %v2890_v30, %v5298_v28  ;;  %v3847_v56 = vrot.slane %v3837_v40, %v5298_v28  ;;  %v3854_v0 = vrot.slane %v3838_v6, %v5298_v28 }
 0x2e1   : > { %v3861_v41 = vrot.slane %v3839_v9, %v5298_v28  ;;  %v2252_v48 = vrot.slane %v6862_v58, %v5278_v16  ;;  %v2256_v34 = vrot.slane %v6862_v58, %v5281_v19  ;;  %v2260_v29 = vrot.slane %v6862_v58, %v5284_v21 }
 0x2e2   : > { %v3868_v12 = vrot.slane %v3840_v54, %v5298_v28  ;;  %v2905_v11 = vcombine.low %v2897_v55, %v2904_v60  ;;  %v3869_v42 = vcombine.low %v3847_v56, %v3854_v0  ;;  %v2264_v37 = vrot.slane %v6862_v58, %v5287_v20 }
 0x2e3   : > { %v2268_v5 = vrot.slane %v6862_v58, %v5290_v22  ;;  %v2272_v3 = vrot.slane %v6862_v58, %v5295_v25  ;;  %v3690_v36 = vcombine.low %v2244_v10, %v2248_v1  ;;  %v3691_v24 = vcombine.low %v2252_v48, %v2256_v34 }
 0x2e4   : > { %v3870_v27 = vcombine.low %v3861_v41, %v3868_v12  ;;  %4058 = vperm.xlu1 %4581, %v2905_v11   ;;  %v3877_v33 = vrot.slane %v3869_v42, %v5298_v28  ;;  %v3692_v32 = vcombine.low %v2260_v29, %v2264_v37  ;;  %v2372_v53 = vrot.slane %v5879_v57, %v5078_v2 }
 0x2e5   : > { %v2376_v39 = vrot.slane %v5879_v57, %v5084_v4  ;;  %v3693_v14 = vcombine.low %v2268_v5, %v2272_v3  ;;  %v3700_v8 = vrot.slane %v3690_v36, %v5298_v28  ;;  %v3707_v23 = vrot.slane %v3691_v24, %v5298_v28 }
 0x2e6   : > { %v3884_v35 = vrot.slane %v3870_v27, %v5298_v28  ;;  %v3714_v52 = vrot.slane %v3692_v32, %v5298_v28  ;;  %v2380_v61 = vrot.slane %v5879_v57, %v5278_v16  ;;  %v2384_v38 = vrot.slane %v5879_v57, %v5281_v19 }
 0x2e7   : > { %v2388_v59 = vrot.slane %v5879_v57, %v5284_v21  ;;  %v3721_v26 = vrot.slane %v3693_v14, %v5298_v28  ;;  %v3722_v46 = vcombine.low %v3700_v8, %v3707_v23  ;;  %v2392_v17 = vrot.slane %v5879_v57, %v5287_v20 }
 0x2e8   : > { %v3885_v13 = vcombine.low %v3877_v33, %v3884_v35  ;;  %v2396_v45 = vrot.slane %v5879_v57, %v5290_v22  ;;  %v2400_v15 = vrot.slane %v5879_v57, %v5295_v25  ;;  %v3886_v47 = vcombine.low %v2372_v53, %v2376_v39 }
 0x2e9   : > { %v3887_v51 = vcombine.low %v2380_v61, %v2384_v38  ;;  %v3723_v31 = vcombine.low %v3714_v52, %v3721_v26  ;;  %v3730_v30 = vrot.slane %v3722_v46, %v5298_v28  ;;  %v3888_v40 = vcombine.low %v2388_v59, %v2392_v17 }
 0x2ea   : > { %4118 = vperm.xlu0 %4580, %v3885_v13   ;;  %v2404_v6 = vrot.slane %v5952_v18, %v5078_v2  ;;  %v3889_v9 = vcombine.low %v2396_v45, %v2400_v15  ;;  %v3896_v55 = vrot.slane %v3886_v47, %v5298_v28  ;;  %v2408_v58 = vrot.slane %v5952_v18, %v5084_v4 }
 0x2eb   : > { %v3903_v54 = vrot.slane %v3887_v51, %v5298_v28  ;;  %v3737_v57 = vrot.slane %v3723_v31, %v5298_v28  ;;  %v3910_v10 = vrot.slane %v3888_v40, %v5298_v28  ;;  %v2412_v1 = vrot.slane %v5952_v18, %v5278_v16 }
 0x2ec   : > { %v2416_v60 = vrot.slane %v5952_v18, %v5281_v19  ;;  %v3917_v56 = vrot.slane %v3889_v9, %v5298_v28  ;;  %v2420_v41 = vrot.slane %v5952_v18, %v5284_v21  ;;  %v2424_v12 = vrot.slane %v5952_v18, %v5287_v20 }
 0x2ed   : > { %v3918_v0 = vcombine.low %v3896_v55, %v3903_v54  ;;  %v3738_v48 = vcombine.low %v3730_v30, %v3737_v57  ;;  %v2428_v34 = vrot.slane %v5952_v18, %v5290_v22  ;;  %v2432_v29 = vrot.slane %v5952_v18, %v5295_v25 }
 0x2ee   : > { %v3935_v11 = vcombine.low %v2404_v6, %v2408_v58  ;;  %v3919_v42 = vcombine.low %v3910_v10, %v3917_v56  ;;  %v3936_v5 = vcombine.low %v2412_v1, %v2416_v60  ;;  %v3937_v27 = vcombine.low %v2420_v41, %v2424_v12 }
 0x2ef   : > { %v3926_v37 = vrot.slane %v3918_v0, %v5298_v28  ;;  %4109 = vperm.xlu1 %4581, %v3738_v48   ;;  %v3938_v3 = vcombine.low %v2428_v34, %v2432_v29  ;;  %v1764_v24 = vrot.slane %v5749_v43, %v5078_v2  ;;  %v1768_v33 = vrot.slane %v5749_v43, %v5084_v4 }
 0x2f0   : > { %v3945_v36 = vrot.slane %v3935_v11, %v5298_v28  ;;  %v3933_v32 = vrot.slane %v3919_v42, %v5298_v28  ;;  %v3952_v18 = vrot.slane %v3936_v5, %v5298_v28  ;;  %v3959_v53 = vrot.slane %v3937_v27, %v5298_v28 }
 0x2f1   : > { %v1772_v39 = vrot.slane %v5749_v43, %v5278_v16  ;;  %v3966_v35 = vrot.slane %v3938_v3, %v5298_v28  ;;  %v1776_v14 = vrot.slane %v5749_v43, %v5281_v19  ;;  %v1780_v8 = vrot.slane %v5749_v43, %v5284_v21 }
 0x2f2   : > { %v1784_v23 = vrot.slane %v5749_v43, %v5287_v20  ;;  %v3934_v52 = vcombine.low %v3926_v37, %v3933_v32  ;;  %v3967_v61 = vcombine.low %v3945_v36, %v3952_v18  ;;  %v1788_v38 = vrot.slane %v5749_v43, %v5290_v22 }
 0x2f3   : > { %v1792_v59 = vrot.slane %v5749_v43, %v5295_v25  ;;  %v3968_v13 = vcombine.low %v3959_v53, %v3966_v35  ;;  %v2955_v26 = vcombine.low %v1764_v24, %v1768_v33  ;;  %v2956_v46 = vcombine.low %v1772_v39, %v1776_v14 }
 0x2f4   : > { %v2957_v17 = vcombine.low %v1780_v8, %v1784_v23  ;;  %4121 = vperm.xlu0 %4580, %v3934_v52   ;;  %v3975_v45 = vrot.slane %v3967_v61, %v5298_v28  ;;  %v2436_v47 = vrot.slane %v5991_v49, %v5078_v2  ;;  %v2440_v51 = vrot.slane %v5991_v49, %v5084_v4 }
 0x2f5   : > { %v2958_v15 = vcombine.low %v1788_v38, %v1792_v59  ;;  %v3982_v31 = vrot.slane %v3968_v13, %v5298_v28  ;;  %v2965_v30 = vrot.slane %v2955_v26, %v5298_v28  ;;  %v2972_v43 = vrot.slane %v2956_v46, %v5298_v28 }
 0x2f6   : > { %v2979_v40 = vrot.slane %v2957_v17, %v5298_v28  ;;  %v2444_v9 = vrot.slane %v5991_v49, %v5278_v16  ;;  %v2448_v55 = vrot.slane %v5991_v49, %v5281_v19  ;;  %v2452_v54 = vrot.slane %v5991_v49, %v5284_v21 }
 0x2f7   : > { %v2986_v6 = vrot.slane %v2958_v15, %v5298_v28  ;;  %v3983_v58 = vcombine.low %v3975_v45, %v3982_v31  ;;  %v2987_v57 = vcombine.low %v2965_v30, %v2972_v43  ;;  %v2456_v10 = vrot.slane %v5991_v49, %v5287_v20 }
 0x2f8   : > { %v2460_v1 = vrot.slane %v5991_v49, %v5290_v22  ;;  %v2464_v56 = vrot.slane %v5991_v49, %v5295_v25  ;;  %v3984_v0 = vcombine.low %v2436_v47, %v2440_v51  ;;  %v3985_v41 = vcombine.low %v2444_v9, %v2448_v55 }
 0x2f9   : > { %v2988_v60 = vcombine.low %v2979_v40, %v2986_v6  ;;  %4124 = vperm.xlu0 %4580, %v3983_v58   ;;  %v2995_v12 = vrot.slane %v2987_v57, %v5298_v28  ;;  %v3986_v48 = vcombine.low %v2452_v54, %v2456_v10  ;;  %v1796_v34 = vrot.slane %v5811_v63, %v5078_v2 }
 0x2fa   : > { %v1800_v29 = vrot.slane %v5811_v63, %v5084_v4  ;;  %v3987_v42 = vcombine.low %v2460_v1, %v2464_v56  ;;  %v3994_v37 = vrot.slane %v3984_v0, %v5298_v28  ;;  %v4001_v5 = vrot.slane %v3985_v41, %v5298_v28 }
 0x2fb   : > { %v3002_v11 = vrot.slane %v2988_v60, %v5298_v28  ;;  %v4008_v49 = vrot.slane %v3986_v48, %v5298_v28  ;;  %v1804_v27 = vrot.slane %v5811_v63, %v5278_v16  ;;  %v1808_v3 = vrot.slane %v5811_v63, %v5281_v19 }
 0x2fc   : > { %v1812_v36 = vrot.slane %v5811_v63, %v5284_v21  ;;  %v4015_v33 = vrot.slane %v3987_v42, %v5298_v28  ;;  %v4016_v32 = vcombine.low %v3994_v37, %v4001_v5  ;;  %v1816_v18 = vrot.slane %v5811_v63, %v5287_v20 }
 0x2fd   : > { %v3003_v24 = vcombine.low %v2995_v12, %v3002_v11  ;;  %v1820_v53 = vrot.slane %v5811_v63, %v5290_v22  ;;  %v1824_v39 = vrot.slane %v5811_v63, %v5295_v25  ;;  %v3004_v35 = vcombine.low %v1796_v34, %v1800_v29 }
 0x2fe   : > { %v3005_v14 = vcombine.low %v1804_v27, %v1808_v3  ;;  %v4017_v8 = vcombine.low %v4008_v49, %v4015_v33  ;;  %v4024_v23 = vrot.slane %v4016_v32, %v5298_v28  ;;  %v3006_v52 = vcombine.low %v1812_v36, %v1816_v18 }
 0x2ff   : > { %4064 = vperm.xlu1 %4581, %v3003_v24   ;;  %v1828_v61 = vrot.slane %v5858_v44, %v5078_v2  ;;  %v3007_v38 = vcombine.low %v1820_v53, %v1824_v39  ;;  %v3014_v59 = vrot.slane %v3004_v35, %v5298_v28  ;;  %v1832_v26 = vrot.slane %v5858_v44, %v5084_v4 }
 0x300   : > { %v3021_v13 = vrot.slane %v3005_v14, %v5298_v28  ;;  %v4031_v63 = vrot.slane %v4017_v8, %v5298_v28  ;;  %v3028_v46 = vrot.slane %v3006_v52, %v5298_v28  ;;  %v1836_v17 = vrot.slane %v5858_v44, %v5278_v16 }
 0x301   : > { %v1840_v45 = vrot.slane %v5858_v44, %v5281_v19  ;;  %v3035_v15 = vrot.slane %v3007_v38, %v5298_v28  ;;  %v1844_v51 = vrot.slane %v5858_v44, %v5284_v21  ;;  %v1848_v31 = vrot.slane %v5858_v44, %v5287_v20 }
 0x302   : > { %v3036_v47 = vcombine.low %v3014_v59, %v3021_v13  ;;  %v4032_v30 = vcombine.low %v4024_v23, %v4031_v63  ;;  %v1852_v43 = vrot.slane %v5858_v44, %v5290_v22  ;;  %v1856_v40 = vrot.slane %v5858_v44, %v5295_v25 }
 0x303   : > { %v3053_v6 = vcombine.low %v1828_v61, %v1832_v26  ;;  %v3037_v9 = vcombine.low %v3028_v46, %v3035_v15  ;;  %v3054_v54 = vcombine.low %v1836_v17, %v1840_v45  ;;  %v3055_v58 = vcombine.low %v1844_v51, %v1848_v31 }
 0x304   : > { %v3044_v55 = vrot.slane %v3036_v47, %v5298_v28  ;;  %4127 = vperm.xlu0 %4580, %v4032_v30   ;;  %v3056_v57 = vcombine.low %v1852_v43, %v1856_v40  ;;  %v1860_v1 = vrot.slane %v5883_v62, %v5078_v2  ;;  %v1864_v60 = vrot.slane %v5883_v62, %v5084_v4 }
 0x305   : > { %v3063_v10 = vrot.slane %v3053_v6, %v5298_v28  ;;  %v3051_v56 = vrot.slane %v3037_v9, %v5298_v28  ;;  %v3070_v44 = vrot.slane %v3054_v54, %v5298_v28  ;;  %v3077_v0 = vrot.slane %v3055_v58, %v5298_v28 }
 0x306   : > { %v1868_v41 = vrot.slane %v5883_v62, %v5278_v16  ;;  %v3084_v12 = vrot.slane %v3056_v57, %v5298_v28  ;;  %v1872_v48 = vrot.slane %v5883_v62, %v5281_v19  ;;  %v1876_v34 = vrot.slane %v5883_v62, %v5284_v21 }
 0x307   : > { %v1880_v29 = vrot.slane %v5883_v62, %v5287_v20  ;;  %v3052_v11 = vcombine.low %v3044_v55, %v3051_v56  ;;  %v3085_v42 = vcombine.low %v3063_v10, %v3070_v44  ;;  %v1884_v37 = vrot.slane %v5883_v62, %v5290_v22 }
 0x308   : > { %v1888_v5 = vrot.slane %v5883_v62, %v5295_v25  ;;  %v3086_v49 = vcombine.low %v3077_v0, %v3084_v12  ;;  %v3102_v27 = vcombine.low %v1860_v1, %v1864_v60  ;;  %v3103_v3 = vcombine.low %v1868_v41, %v1872_v48 }
 0x309   : > { %v3104_v36 = vcombine.low %v1876_v34, %v1880_v29  ;;  %4067 = vperm.xlu1 %4581, %v3052_v11   ;;  %v3093_v24 = vrot.slane %v3085_v42, %v5298_v28  ;;  %v1892_v32 = vrot.slane %v5958_v7, %v5078_v2  ;;  %v1896_v18 = vrot.slane %v5958_v7, %v5084_v4  ;;  %v6568_v11 = vpop.permute.xlu1 %4037 }
 0x30a   : > { %v3105_v33 = vcombine.low %v1884_v37, %v1888_v5  ;;  %v3100_v53 = vrot.slane %v3086_v49, %v5298_v28  ;;  %v3112_v39 = vrot.slane %v3102_v27, %v5298_v28  ;;  %v3119_v62 = vrot.slane %v3103_v3, %v5298_v28  ;;  %v6576_v3 = vpop.permute.xlu0 %4034 }
 0x30b   : > { %v3126_v35 = vrot.slane %v3104_v36, %v5298_v28  ;;  %v1900_v8 = vrot.slane %v5958_v7, %v5278_v16  ;;  %v1904_v23 = vrot.slane %v5958_v7, %v5281_v19  ;;  %v1908_v52 = vrot.slane %v5958_v7, %v5284_v21 }
 0x30c   : > { %v3133_v14 = vrot.slane %v3105_v33, %v5298_v28  ;;  %v3101_v61 = vcombine.low %v3093_v24, %v3100_v53  ;;  %v3134_v38 = vcombine.low %v3112_v39, %v3119_v62  ;;  %v1912_v59 = vrot.slane %v5958_v7, %v5287_v20 }
 0x30d   : > { %v1916_v13 = vrot.slane %v5958_v7, %v5290_v22  ;;  %v1920_v63 = vrot.slane %v5958_v7, %v5295_v25  ;;  %v3151_v46 = vcombine.low %v1892_v32, %v1896_v18  ;;  %v3152_v17 = vcombine.low %v1900_v8, %v1904_v23  ;;  %v4086_v42 = vpop.permute.xlu1 %4085 }
 0x30e   : > { %v3135_v26 = vcombine.low %v3126_v35, %v3133_v14  ;;  %4070 = vperm.xlu1 %4581, %v3101_v61   ;;  %v3142_v45 = vrot.slane %v3134_v38, %v5298_v28  ;;  %v3153_v15 = vcombine.low %v1908_v52, %v1912_v59  ;;  %v1924_v47 = vrot.slane %v6074_v50, %v5078_v2  ;;  %v4083_v24 = vpop.permute.xlu0 %4082 }
 0x30f   : > { %v1928_v51 = vrot.slane %v6074_v50, %v5084_v4  ;;  %v3154_v30 = vcombine.low %v1916_v13, %v1920_v63  ;;  %v3161_v43 = vrot.slane %v3151_v46, %v5298_v28  ;;  %v3168_v40 = vrot.slane %v3152_v17, %v5298_v28  ;;  %v6864_v13 = vld [vmem:[#allocation12_spill] sm:$0xff] }
 0x310   : > { %v3149_v31 = vrot.slane %v3135_v26, %v5298_v28  ;;  %v3175_v7 = vrot.slane %v3153_v15, %v5298_v28  ;;  %v1932_v6 = vrot.slane %v6074_v50, %v5278_v16  ;;  %v1936_v9 = vrot.slane %v6074_v50, %v5281_v19 }
 0x311   : > { %v1940_v2 = vrot.slane %v6074_v50, %v5284_v21  ;;  %v3182_v4 = vrot.slane %v3154_v30, %v5298_v28  ;;  %v3183_v54 = vcombine.low %v3161_v43, %v3168_v40  ;;  %v1944_v58 = vrot.slane %v6074_v50, %v5287_v20  ;;  %v6570_v37 = vpop.permute.xlu1 %4040 }
 0x312   : > { %v3150_v55 = vcombine.low %v3142_v45, %v3149_v31  ;;  %v1948_v57 = vrot.slane %v6074_v50, %v5290_v22  ;;  %v1952_v10 = vrot.slane %v6074_v50, %v5295_v25  ;;  %v3200_v16 = vcombine.low %v1924_v47, %v1928_v51  ;;  %v4089_v32 = vpop.permute.xlu0 %4088 }
 0x313   : > { %v3201_v1 = vcombine.low %v1932_v6, %v1936_v9  ;;  %v3184_v19 = vcombine.low %v3175_v7, %v3182_v4  ;;  %v3191_v60 = vrot.slane %v3183_v54, %v5298_v28  ;;  %v3202_v21 = vcombine.low %v1940_v2, %v1944_v58 }
 0x314   : > { %4073 = vperm.xlu1 %4581, %v3150_v55   ;;  %v3203_v56 = vcombine.low %v1948_v57, %v1952_v10  ;;  %v3210_v44 = vrot.slane %v3200_v16, %v5298_v28  ;;  %v6863_v8 = vlaneseq  ;;  %vm4140_vm0 = vcmask 130112  }
 0x315   : > { %v3217_v0 = vrot.slane %v3201_v1, %v5298_v28  ;;  %v3198_v20 = vrot.slane %v3184_v19, %v5298_v28  ;;  %v3224_v41 = vrot.slane %v3202_v21, %v5298_v28  ;;  %vm4147_vm1 = vcmask 195712  }
 0x316   : > { %v3231_v22 = vrot.slane %v3203_v56, %v5298_v28  ;;  %v4095_v53 = vpop.permute.xlu0 %4094  ;;  %v6587_v23 = vand.u32 127, %v6863_v8  ;;  %vm4154_vm2 = vcmask 261312   ;;  %vm4161_vm3 = vcmask 326912  }
 0x317   : > { %v3232_v12 = vcombine.low %v3210_v44, %v3217_v0  ;;  %v3199_v25 = vcombine.low %v3191_v60, %v3198_v20  ;;  %vm4168_vm4 = vcmask 392512   ;;  %vm4175_vm5 = vcmask 458112  }
 0x318   : > { %v3233_v50 = vcombine.low %v3224_v41, %v3231_v22  ;;  %v4135_v61 = vadd.s32 4294967288, %v6587_v23  ;;  %v4142_v59 = vadd.s32 4294967280, %v6587_v23  ;;  %v4149_v63 = vadd.s32 4294967272, %v6587_v23 }
 0x319   : > { %v3240_v48 = vrot.slane %v3232_v12, %v5298_v28  ;;  %4076 = vperm.xlu1 %4581, %v3199_v25   ;;  %v4133_v45 = vsub.s32 %v6587_v23, %v6864_v13  ;;  %v4156_v51 = vadd.s32 4294967264, %v6587_v23  ;;  %v4163_v43 = vadd.s32 4294967256, %v6587_v23 }
 0x31a   : > { %v3247_v34 = vrot.slane %v3233_v50, %v5298_v28  ;;  %v4138_v26 = vsub.s32 %v4135_v61, %v6864_v13  ;;  %v4145_v46 = vsub.s32 %v4142_v59, %v6864_v13  ;;  %v4152_v30 = vsub.s32 %v4149_v63, %v6864_v13 }
 0x31b   : > { %v6572_v5 = vpop.permute.xlu1 %4043  ;;  %v4243_v31 = vrot.slane %v4083_v24, %v4133_v45  ;;  %v4159_v9 = vsub.s32 %v4156_v51, %v6864_v13  ;;  %v4170_v2 = vadd.s32 4294967248, %v6587_v23  ;;  %v6611_v4 = vsub.s32 %v4163_v43, %v6864_v13 }
 0x31c   : > { %v3248_v29 = vcombine.low %v3240_v48, %v3247_v34  ;;  %v4247_v15 = vrot.slane %v4086_v42, %v4138_v26  ;;  %v4252_v40 = vrot.slane %v4089_v32, %v4145_v46  ;;  %v4177_v54 = vadd.s32 4294967240, %v6587_v23 }
 0x31d   : > { %v4262_v1 = vrot.slane %v4095_v53, %v4159_v9  ;;  %v4173_v19 = vsub.s32 %v4170_v2, %v6864_v13  ;;  %v4184_v60 = vadd.s32 4294967232, %v6587_v23  ;;  %v4191_v21 = vadd.s32 4294967224, %v6587_v23 }
 0x31e   : > { %4079 = vperm.xlu1 %4581, %v3248_v29   ;;  %v4248_v7 = vsel %vm4140_vm0, %v4247_v15, %v4243_v31  ;;  %v4180_v56 = vsub.s32 %v4177_v54, %v6864_v13  ;;  %v4198_v50 = vadd.s32 4294967216, %v6587_v23  ;;  %v4139_v48 = vrot.slane %v6568_v11, %v4138_v26 }
 0x31f   : > { %v4253_v57 = vsel %vm4147_vm1, %v4252_v40, %v4248_v7  ;;  %v4187_v25 = vsub.s32 %v4184_v60, %v6864_v13  ;;  %v4194_v34 = vsub.s32 %v4191_v21, %v6864_v13  ;;  %v4134_v29 = vrot.slane %v6576_v3, %v4133_v45 }
 0x320   : > { %v4092_v49 = vpop.permute.xlu1 %4091  ;;  %v4146_v42 = vrot.slane %v6570_v37, %v4145_v46  ;;  %vm4182_vm6 = vcmask 523712   ;;  %vm4189_vm7 = vcmask 589312   ;;  %v4153_v53 = vrot.slane %v6572_v5, %v4152_v30 }
 0x321   : > { %v4257_v6 = vrot.slane %v4092_v49, %v4152_v30  ;;  %v4201_v11 = vsub.s32 %v4198_v50, %v6864_v13  ;;  %v4141_v3 = vsel %vm4140_vm0, %v4139_v48, %v4134_v29  ;;  %v4212_v37 = vadd.s32 4294967200, %v6587_v23 }
 0x322   : > { %v4148_v59 = vsel %vm4147_vm1, %v4146_v42, %v4141_v3  ;;  %vm4196_vm8 = vcmask 654912   ;;  %vm4203_vm9 = vcmask 720512   ;;  %vm4210_vm10 = vcmask 786112  }
 0x323   : > { %v4258_v10 = vsel %vm4154_vm2, %v4257_v6, %v4253_v57  ;;  %v4155_v45 = vsel %vm4154_vm2, %v4153_v53, %v4148_v59  ;;  %v4219_v31 = vadd.s32 4294967192, %v6587_v23  ;;  %v4226_v7 = vadd.s32 4294967184, %v6587_v23 }
 0x324   : > { %v4263_v44 = vsel %vm4161_vm3, %v4262_v1, %v4258_v10  ;;  %vm4217_vm11 = vcmask 851712   ;;  %vm4224_vm12 = vcmask 917312   ;;  %vm4231_vm13 = vcmask 982912  }
 0x325   : > { %v4101_v62 = vpop.permute.xlu0 %4100  ;;  %vm4238_vm14 = vcmask 1048512   ;;  %vm4337_vm15 = vcmp.lt.s32.totalorder %v6863_v8, 256 }
 0x326   : > { %v4272_v12 = vrot.slane %v4101_v62, %v4173_v19 }
 0x32b   : > { %v6574_v27 = vpop.permute.xlu1 %4046 }
 0x32c   : > { %v4160_v26 = vrot.slane %v6574_v27, %v4159_v9  ;;  %v4215_v27 = vsub.s32 %v4212_v37, %v6864_v13 }
 0x330   : > { %v6578_v36 = vpop.permute.xlu1 %4049 }
 0x331   : > { %v4167_v5 = vrot.slane %v6578_v36, %v6611_v4  ;;  %v4162_v36 = vsel %vm4161_vm3, %v4160_v26, %v4155_v45 }
 0x335   : > { %v6584_v35 = vpop.permute.xlu0 %4106 }
 0x336   : > { %v4282_v62 = vrot.slane %v6584_v35, %v4187_v25 }
 0x33b   : > { %v4098_v33 = vpop.permute.xlu1 %4097 }
 0x33c   : > { %v4267_v16 = vrot.slane %v4098_v33, %v6611_v4  ;;  %v4205_v33 = vadd.s32 4294967208, %v6587_v23  ;;  %v4222_v4 = vsub.s32 %v4219_v31, %v6864_v13 }
 0x33e   : > { %v4268_v20 = vsel %vm4168_vm4, %v4267_v16, %v4263_v44  ;;  %v4208_v35 = vsub.s32 %v4205_v33, %v6864_v13  ;;  %v4229_v16 = vsub.s32 %v4226_v7, %v6864_v13 }
 0x33f   : > { %v4273_v49 = vsel %vm4175_vm5, %v4272_v12, %v4268_v20 }
 0x340   : > { %v6580_v18 = vpop.permute.xlu1 %4052 }
 0x341   : > { %v4174_v15 = vrot.slane %v6580_v18, %v4173_v19  ;;  %v4169_v18 = vsel %vm4168_vm4, %v4167_v5, %v4162_v36 }
 0x343   : > { %v4176_v9 = vsel %vm4175_vm5, %v4174_v15, %v4169_v18 }
 0x345   : > { %v6589_v52 = vpop.permute.xlu0 %4061 }
 0x34a   : > { %v6582_v39 = vpop.permute.xlu1 %4055 }
 0x34b   : > { %v4181_v51 = vrot.slane %v6582_v39, %v4180_v56  ;;  %v4233_v39 = vadd.s32 4294967176, %v6587_v23 }
 0x34d   : > { %v4183_v2 = vsel %vm4182_vm6, %v4181_v51, %v4176_v9  ;;  %v4236_v1 = vsub.s32 %v4233_v39, %v6864_v13 }
 0x350   : > { %v6598_v17 = vpop.permute.xlu0 %4112 }
 0x355   : > { %v4104_v14 = vpop.permute.xlu1 %4103 }
 0x356   : > { %v4277_v41 = vrot.slane %v4104_v14, %v4180_v56 }
 0x358   : > { %v4278_v24 = vsel %vm4182_vm6, %v4277_v41, %v4273_v49 }
 0x359   : > { %v4283_v63 = vsel %vm4189_vm7, %v4282_v62, %v4278_v24 }
 0x35a   : > { %v6608_v55 = vpop.permute.xlu0 %4115 }
 0x35f   : > { %v6592_v38 = vpop.permute.xlu1 %4058 }
 0x360   : > { %v4188_v43 = vrot.slane %v6592_v38, %v4187_v25 }
 0x362   : > { %v4190_v54 = vsel %vm4189_vm7, %v4188_v43, %v4183_v2 }
 0x365   : > { %v6624_v0 = vpop.permute.xlu0 %4118 }
 0x366   : > { %v4302_v57 = vrot.slane %v6624_v0, %v4215_v27 }
 0x36a   : > { %v4110_v47 = vpop.permute.xlu1 %4109 }
 0x36b   : > { %v4287_v32 = vrot.slane %v4110_v47, %v4194_v34  ;;  %v4292_v47 = vrot.slane %v6598_v17, %v4201_v11  ;;  %v4297_v17 = vrot.slane %v6608_v55, %v4208_v35  ;;  %v4195_v55 = vrot.slane %v6589_v52, %v4194_v34 }
 0x36d   : > { %v4288_v46 = vsel %vm4196_vm8, %v4287_v32, %v4283_v63  ;;  %v4197_v0 = vsel %vm4196_vm8, %v4195_v55, %v4190_v54 }
 0x36e   : > { %v4293_v40 = vsel %vm4203_vm9, %v4292_v47, %v4288_v46 }
 0x36f   : > { %v4122_v14 = vpop.permute.xlu0 %4121  ;;  %v4298_v38 = vsel %vm4210_vm10, %v4297_v17, %v4293_v40 }
 0x370   : > { %v4303_v60 = vsel %vm4217_vm11, %v4302_v57, %v4298_v38  ;;  %v4307_v44 = vrot.slane %v4122_v14, %v4222_v4 }
 0x372   : > { %v4308_v52 = vsel %vm4224_vm12, %v4307_v44, %v4303_v60 }
 0x374   : > { %v4125_v6 = vpop.permute.xlu0 %4124 }
 0x375   : > { %v4312_v41 = vrot.slane %v4125_v6, %v4229_v16 }
 0x377   : > { %v4313_v29 = vsel %vm4231_vm13, %v4312_v41, %v4308_v52 }
 0x37a   : > { %v6614_v58 = vpop.permute.xlu1 %4064 }
 0x37b   : > { %v4202_v10 = vrot.slane %v6614_v58, %v4201_v11 }
 0x37d   : > { %v4204_v58 = vsel %vm4203_vm9, %v4202_v10, %v4197_v0 }
 0x37f   : > { %v4128_v21 = vpop.permute.xlu0 %4127 }
 0x384   : > { %v6627_v22 = vpop.permute.xlu1 %4067 }
 0x385   : > { %v4209_v23 = vrot.slane %v6627_v22, %v4208_v35  ;;  %v4317_v22 = vrot.slane %v4128_v21, %v4236_v1 }
 0x387   : > { %v4211_v13 = vsel %vm4210_vm10, %v4209_v23, %v4204_v58  ;;  %v4318_v49 = vsel %vm4238_vm14, %v4317_v22, %v4313_v29 }
 0x389   : > { %v4071_v61 = vpop.permute.xlu1 %4070 }
 0x38a   : > { %v4216_v56 = vrot.slane %v4071_v61, %v4215_v27 }
 0x38c   : > { %v4218_v25 = vsel %vm4217_vm11, %v4216_v56, %v4211_v13 }
 0x38f   : > { %v4074_v30 = vpop.permute.xlu1 %4073 }
 0x390   : > { %v4223_v20 = vrot.slane %v4074_v30, %v4222_v4 }
 0x392   : > { %v4225_v48 = vsel %vm4224_vm12, %v4223_v20, %v4218_v25 }
 0x394   : > { %v4077_v19 = vpop.permute.xlu1 %4076 }
 0x395   : > { %v4230_v12 = vrot.slane %v4077_v19, %v4229_v16 }
 0x397   : > { %v4232_v42 = vsel %vm4231_vm13, %v4230_v12, %v4225_v48 }
 0x399   : > { %v4080_v50 = vpop.permute.xlu1 %4079 }
 0x39a   : > { %v4237_v34 = vrot.slane %v4080_v50, %v4236_v1 }
 0x39c   : > { %v4239_v24 = vsel %vm4238_vm14, %v4237_v34, %v4232_v42 }
 0x39d   : > { %v4319_v33 = vcombine.low %v4239_v24, %v4318_v49 }
 0x39f   : > { %v4326_v32 = vrot.slane %v4319_v33, %v5298_v28 }
 0x3a1   : > { %v4333_v53 = vrot.slane %v4326_v32, %v5298_v28 }
 0x3a3   : > { %4339 = vst.msk [vmem:[%s259_s8] sm:$0x3] %vm4337_vm15, %v4333_v53 }
 0x3a4   : > { %4777 = shalt.err (!%p4774_p0)
}
 0x3a5   : > { %s4778_s25 = scalar_lea.hbm %s4353_s29, 32  ;;  %s4782_s10 = scalar_lea.hbm %s6725_s5, 64 }
 0x3a6   : > { %p4779_p5 = scmp.ne.s32.totalorder %s4353_s29, %s4778_s25  ;;  %p4783_p4 = scmp.lt.s32.totalorder %s4353_s29, %s6725_s5 }
 0x3a7   : > { %p4784_p6 = scmp.lt.s32.totalorder %s4782_s10, %s4778_s25 }
 0x3a8   : > { %p4780_p2 = pnand %p4779_p5, %p6865_p11 }
 0x3a9   : > { %p4785_p8 = por %p4784_p6, %p4783_p4 }
 0x3aa   : > { %p4781_p1 = pneg %p4780_p2 }
 0x3ac   : > { %p4786_p3 = pnand %p4785_p8, %p4781_p1 }
 0x3ae   : > { %4789 = shalt.err (!%p4786_p3)
}
 0x3af   : > { %4525 = dma.vmem_to_hbm [thread:$0]  (%p6865_p11), %s4356_s19, 32, %s4353_s29, %s4341_s12  }
 0x3b0 PF: > { %s4367_s30 = sand.u32 1, %s4820_s20   ;;  %p6866_p7 = scmp.ne.s32.totalorder %s6744_s26, 0 }
 0x3b1   : > { %p6867_p9 = scmp.ge.s32.totalorder %s4832_s23, 2  ;;  %s4368_s7 = scalar_lea.sflag [#allocation5], %s4367_s30 }
 0x3b3   : > { %p4536_p10 = pnand %p6867_p9, %p6866_p7 }
 0x3b5   : > { %p4537_p12 = pneg %p4536_p10 }
 0x3b7   : > { %4815 = dma.done.wait (%p4537_p12), %s4368_s7, 32  }
 0x3b8   : > { %4817 = vsyncadd (%p4537_p12), %s4368_s7, 4294967264  ;;  %p20_p13 = scmp.ge.s32.totalorder %s4928_s6, 4   ;;  %s6868_s20 = smov %s4824_s21 }
 0x3b9   : > { %s6869_s21 = smov %s4828_s22  ;;  %s6870_s22 = smov %s4948_s14 }
 0x3ba   : > { %s6871_s23 = smov %s4928_s6  ;;  %22 = sbr.rel (!%p20_p13) target bundleno = 8 (0x8), region = 89 }
 0x3bf   :  { %4373 = vsyncpa [#allocation4], 1 }
 0x3c0   :  { %4375 = vsyncpa [#allocation4 + $0x1], 1 }
 0x3c1   :  { %4376 = vsyncpa [#allocation7], 1 }
 0x3c2   :  { %4377 = vsyncpa [#allocation5], 1 }
 0x3c3   :  { %4379 = vsyncpa [#allocation5 + $0x1], 1 }

</bundles_post_ra>
